<compile_context>
chip_gen: v7x
topology: tpu7x:2x2x1
jax: 0.10.0
libtpu: 0.0.40
codegen_flags: <defaults>
</compile_context>

<pallas_src>
import functools

import jax
import jax.numpy as jnp
from jax.experimental import pallas as pl
from jax.experimental.pallas import tpu as pltpu

_LANE = 128
_NEG_SLOPE = 0.2  # GATConv default LeakyReLU slope


# ----------------------------------------------------------------------------
# Helpers
# ----------------------------------------------------------------------------
def _pick_tile(n, pref=_LANE):
    """Row tile: 128 rows when divisible, else the whole array."""
    return pref if (n % pref == 0 and n >= pref) else n


def _vmem_resident():
    """Grid-invariant operand: one whole-array copy resident in VMEM (no
    per-step DMA, no double-buffering -> halves its VMEM footprint)."""
    return pl.BlockSpec(memory_space=pltpu.MemorySpace.VMEM)


def _compiler_params():
    kwargs = {"dimension_semantics": ("parallel",)}
    try:
        cap = pltpu.get_tpu_info().vmem_capacity_bytes
        kwargs["vmem_limit_bytes"] = int(cap * 3 // 4)   # 96MiB v5e/v6e, 48MiB v7x
    except Exception:
        pass  # fall back to the compiler's default scoped-VMEM limit
    return pltpu.CompilerParams(**kwargs)


def _head_proj(a_src, a_dst, heads, f_out):
    """Build a [heads*f_out, 128] projection so that (h @ A)[n, k] gives
    <a_src[k], h_k[n]> for k < heads and <a_dst[k-heads], h_{k-heads}[n]> for
    heads <= k < 2*heads; remaining columns are zero padding so the in-kernel
    transpose of the logit block is a square, fully aligned 128x128."""
    hf = heads * f_out
    eye = jnp.eye(heads, dtype=jnp.float32)
    src = (a_src[:, :, None] * eye[:, None, :]).reshape(hf, heads)
    dst = (a_dst[:, :, None] * eye[:, None, :]).reshape(hf, heads)
    pad = jnp.zeros((hf, _LANE - 2 * heads), jnp.float32)
    return jnp.concatenate([src, dst, pad], axis=1)


# ----------------------------------------------------------------------------
# Kernel A: feature transform + per-node attention logits (all heads at once).
# Grid: node-row tiles ("parallel").
# ----------------------------------------------------------------------------
def _transform_kernel(x_ref, w_ref, a_ref, h_ref, st_ref, d_ref, *, heads):
    xv = x_ref[...]
    xb = xv if xv.dtype == jnp.bfloat16 else xv.astype(jnp.bfloat16)
    hb = jnp.dot(xb, w_ref[...],
                 preferred_element_type=jnp.float32).astype(jnp.bfloat16)
    h_ref[...] = hb                                           # [Tr, H*F] bf16

    # src/dst logits for every head in one 128-lane-wide MXU pass
    sd = jnp.dot(hb, a_ref[...], preferred_element_type=jnp.float32)  # [Tr,128]
    d_ref[...] = sd[:, heads:2 * heads]                       # [Tr, H]
    # lane-dense source logits: square 128x128 XLU transpose, then row slice
    st_ref[...] = jnp.transpose(sd)[:heads, :]                # [H, Tr]


def gat_transform(x, w, a_proj, *, heads, f_out):
    n, fin = x.shape
    hf = heads * f_out
    tr = _pick_tile(n)
    return pl.pallas_call(
        functools.partial(_transform_kernel, heads=heads),
        grid=(n // tr,),
        in_specs=[
            pl.BlockSpec((tr, fin), lambda i: (i, 0)),        # x rows (tiled)
            _vmem_resident(),                                 # W        (invariant)
            _vmem_resident(),                                 # [asrc|adst|0] (invariant)
        ],
        out_specs=[
            pl.BlockSpec((tr, hf), lambda i: (i, 0)),         # h rows
            pl.BlockSpec((heads, tr), lambda i: (0, i)),      # st (lane-dense cols)
            pl.BlockSpec((tr, heads), lambda i: (i, 0)),      # d rows
        ],
        out_shape=[
            jax.ShapeDtypeStruct((n, hf), jnp.bfloat16),      # Wx (bf16)
            jax.ShapeDtypeStruct((heads, n), jnp.float32),    # <a_src, Wx> (lane-dense)
            jax.ShapeDtypeStruct((n, heads), jnp.float32),    # <a_dst, Wx>
        ],
        compiler_params=_compiler_params(),
    )(x, w.astype(jnp.bfloat16), a_proj.astype(jnp.bfloat16))


# ----------------------------------------------------------------------------
# Kernel B: masked attention softmax + aggregation (+ bias, ReLU; and for the
# final layer: fused skip linear + residual + log_softmax).
# Grid: destination-row tiles ("parallel").
# ----------------------------------------------------------------------------
def _attn_kernel(*refs, heads, f_out, group, concat, relu, fuse_skip):
    if fuse_skip:
        d_ref, st_ref, h_ref, adj_ref, b_ref, x_ref, sw_ref, sb_ref, o_ref = refs
    else:
        d_ref, st_ref, h_ref, adj_ref, b_ref, o_ref = refs

    adjf = adj_ref[...].astype(jnp.float32)                   # 0/1 mask [Td, Ns]

    def head_agg(k):
        # per-edge logits: e[i, j] = <a_dst, Wx_i> + <a_src, Wx_j>
        e = d_ref[:, k:k + 1] + st_ref[k:k + 1, :]            # [Td, Ns] f32
        e = jnp.maximum(e, _NEG_SLOPE * e)                    # LeakyReLU(0.2)
        m = jnp.max(e, axis=-1, keepdims=True)                # shift-invariant
        p = jnp.exp(e - m) * adjf                             # single mask (multiply)
        denom = jnp.maximum(jnp.sum(p, axis=-1, keepdims=True), 1e-30)
        alpha = p * pl.reciprocal(denom, approx=True)         # EUP reciprocal
        h_k = h_ref[:, k * f_out:(k + 1) * f_out]             # bf16 [Ns, F]
        return jnp.dot(alpha.astype(jnp.bfloat16), h_k,
                       preferred_element_type=jnp.float32)    # [Td, F] f32

    if concat:
        gw = group * f_out                                    # 128-lane store slabs
        for g in range(heads // group):
            parts = [head_agg(g * group + j) for j in range(group)]
            blk = parts[0] if group == 1 else jnp.concatenate(parts, axis=-1)
            blk = blk + b_ref[:, g * gw:(g + 1) * gw]
            if relu:
                blk = jnp.maximum(blk, 0.0)
            o_ref[:, g * gw:(g + 1) * gw] = blk.astype(o_ref.dtype)
    else:
        acc = head_agg(0)
        for k in range(1, heads):
            acc = acc + head_agg(k)
        out = acc * (1.0 / heads) + b_ref[...]
        if relu:
            out = jnp.maximum(out, 0.0)
        if fuse_skip:
            skip = jnp.dot(x_ref[...].astype(jnp.bfloat16), sw_ref[...],
                           preferred_element_type=jnp.float32) + sb_ref[...]
            logits = out + skip
            z = logits - jnp.max(logits, axis=-1, keepdims=True)
            out = z - jnp.log(jnp.sum(jnp.exp(z), axis=-1, keepdims=True))
        o_ref[...] = out.astype(o_ref.dtype)


def gat_attention(d, st, h, adj_bf, bias, *, heads, f_out, concat, relu,
                  out_dtype, skip=None):
    n = adj_bf.shape[0]
    out_dim = heads * f_out if concat else f_out
    td = _pick_tile(n)

    # Group heads so each output store is a 128-lane-aligned slab
    # (conv1: 1 head of 128, conv2: 2 heads of 64, conv3: 4 heads of 32).
    group = 1
    if concat and f_out < _LANE and _LANE % f_out == 0:
        g = _LANE // f_out
        if heads % g == 0:
            group = g

    in_specs = [
        pl.BlockSpec((td, heads), lambda i: (i, 0)),          # dst logits (tiled)
        _vmem_resident(),                                     # src logits [H, N]
        _vmem_resident(),                                     # Wx, all sources
        pl.BlockSpec((td, n), lambda i: (i, 0)),              # adj rows (bf16)
        _vmem_resident(),                                     # bias
    ]
    args = [d, st, h, adj_bf, bias]

    fuse_skip = skip is not None
    if fuse_skip:
        x0, sw, sb = skip
        fin = x0.shape[1]
        in_specs += [
            pl.BlockSpec((td, fin), lambda i: (i, 0)),        # x rows (tiled)
            _vmem_resident(),                                 # skip W
            _vmem_resident(),                                 # skip b
        ]
        args += [x0, sw.astype(jnp.bfloat16), sb]

    kernel = functools.partial(_attn_kernel, heads=heads, f_out=f_out,
                               group=group, concat=concat, relu=relu,
                               fuse_skip=fuse_skip)
    return pl.pallas_call(
        kernel,
        grid=(n // td,),
        in_specs=in_specs,
        out_specs=pl.BlockSpec((td, out_dim), lambda i: (i, 0)),
        out_shape=jax.ShapeDtypeStruct((n, out_dim), out_dtype),
        compiler_params=_compiler_params(),
    )(*args)


# ----------------------------------------------------------------------------
# Full DynamicGAT forward (eval mode).
# ----------------------------------------------------------------------------
def gat_layer(x_in, layer_params, adj_bf, *, heads, f_out, concat, relu,
              out_dtype, skip=None):
    w, a_src, a_dst, b = layer_params
    a_proj = _head_proj(a_src, a_dst, heads, f_out)
    h, st, d = gat_transform(x_in, w, a_proj, heads=heads, f_out=f_out)
    return gat_attention(d, st, h, adj_bf, b, heads=heads, f_out=f_out,
                         concat=concat, relu=relu, out_dtype=out_dtype,
                         skip=skip)


def dynamic_gat_forward(x, adj, params, num_classes):
    n = x.shape[0]
    pad = (-n) % _LANE            # >=2 grid steps -> pipelining / v7x core split
    if pad:
        x = jnp.pad(x, ((0, pad), (0, 0)))
        adj = jnp.pad(adj, ((0, pad), (0, pad)))
    adj_bf = adj.astype(jnp.bfloat16)   # exact for a 0/1 mask; halves repeated reads

    x1 = gat_layer(x, params["conv1"], adj_bf, heads=16, f_out=128,
                   concat=True, relu=True, out_dtype=jnp.bfloat16)
    x2 = gat_layer(x1, params["conv2"], adj_bf, heads=16, f_out=64,
                   concat=True, relu=True, out_dtype=jnp.bfloat16)
    x3 = gat_layer(x2, params["conv3"], adj_bf, heads=16, f_out=32,
                   concat=True, relu=True, out_dtype=jnp.bfloat16)
    # conv4 + skip linear + residual + log_softmax fused in one kernel
    out = gat_layer(x3, params["conv4"], adj_bf, heads=1, f_out=num_classes,
                    concat=False, relu=False, out_dtype=jnp.float32,
                    skip=(x, params["skip_w"], params["skip_b"]))
    return out[:n] if pad else out


def init_params(key, num_node_features, num_classes):
    def gat_params(key, f_in, f_out, heads, concat):
        k1, k2, k3, k4 = jax.random.split(key, 4)
        out_dim = heads * f_out if concat else f_out
        w = 0.05 * jax.random.normal(k1, (f_in, heads * f_out), jnp.float32)
        a_src = 0.05 * jax.random.normal(k2, (heads, f_out), jnp.float32)
        a_dst = 0.05 * jax.random.normal(k3, (heads, f_out), jnp.float32)
        b = 0.05 * jax.random.normal(k4, (1, out_dim), jnp.float32)
        return (w, a_src, a_dst, b)

    k1, k2, k3, k4, k5, k6 = jax.random.split(key, 6)
    return {
        "conv1": gat_params(k1, num_node_features, 128, 16, True),
        "conv2": gat_params(k2, 128 * 16, 64, 16, True),
        "conv3": gat_params(k3, 64 * 16, 32, 16, True),
        "conv4": gat_params(k4, 32 * 16, num_classes, 1, False),
        "skip_w": 0.05 * jax.random.normal(k5, (num_node_features, num_classes),
                                           jnp.float32),
        "skip_b": 0.05 * jax.random.normal(k6, (1, num_classes), jnp.float32),
    }


if __name__ == "__main__":
    N = 256                    # number of nodes (2 dst-row tiles of 128)
    NUM_NODE_FEATURES = 32
    NUM_CLASSES = 8

    key = jax.random.PRNGKey(0)
    k_x, k_p = jax.random.split(key)

    # deterministic node features
    x = jax.random.normal(k_x, (N, NUM_NODE_FEATURES), jnp.float32)

    # deterministic small graph: ring edges i->i+1 and i->i+5, plus self loops
    idx = jnp.arange(N)
    src = jnp.concatenate([idx, idx])
    dst = jnp.concatenate([(idx + 1) % N, (idx + 5) % N])
    adj = jnp.zeros((N, N), jnp.float32)
    adj = adj.at[dst, src].set(1.0)
    adj = adj.at[idx, idx].set(1.0)   # add_self_loops=True (PyG default)

    params = init_params(k_p, NUM_NODE_FEATURES, NUM_CLASSES)

    out = dynamic_gat_forward(x, adj, params, NUM_CLASSES)
    out = jax.block_until_ready(out)

    assert out.shape == (N, NUM_CLASSES)
    assert bool(jnp.all(jnp.isfinite(out)))
    # rows of log_softmax should exp-sum to 1
    assert bool(jnp.allclose(jnp.sum(jnp.exp(out), axis=1), 1.0, atol=1e-3))
    print("KERNEL_OK")
</pallas_src>

<mosaic_0001>
module attributes {stable_mosaic.version = 11 : i64} {
  func.func @_transform_kernel(%arg0: i32, %arg1: memref<128x32xf32, #tpu.memory_space<vmem>>, %arg2: memref<32x2048xbf16, #tpu.memory_space<vmem>>, %arg3: memref<2048x128xbf16, #tpu.memory_space<vmem>>, %arg4: memref<128x2048xbf16, #tpu.memory_space<vmem>>, %arg5: memref<16x128xf32, #tpu.memory_space<vmem>>, %arg6: memref<128x16xf32, #tpu.memory_space<vmem>>) attributes {dimension_semantics = [#tpu.dimension_semantics<parallel>], iteration_bounds = array<i64: 2>, scalar_prefetch = 0 : i64, scratch_operands = 0 : i64, tpu.core_type = #tpu.core_type<tc>, window_params = [{transform_indices = @transform_0, window_bounds = array<i64: 128, 32>}, {pipeline_mode = #tpu.pipeline_mode<synchronous>, transform_indices = @transform_1, window_bounds = array<i64: 32, 2048>}, {pipeline_mode = #tpu.pipeline_mode<synchronous>, transform_indices = @transform_2, window_bounds = array<i64: 2048, 128>}, {transform_indices = @transform_3, window_bounds = array<i64: 128, 2048>}, {transform_indices = @transform_4, window_bounds = array<i64: 16, 128>}, {transform_indices = @transform_5, window_bounds = array<i64: 128, 16>}]} {
    %c0 = arith.constant 0 : index
    %c0_0 = arith.constant 0 : index
    %0 = vector.load %arg1[%c0, %c0_0] : memref<128x32xf32, #tpu.memory_space<vmem>>, vector<128x32xf32>
    %1 = arith.truncf %0 : vector<128x32xf32> to vector<128x32xbf16>
    %c0_1 = arith.constant 0 : index
    %c0_2 = arith.constant 0 : index
    %2 = vector.load %arg2[%c0_1, %c0_2] : memref<32x2048xbf16, #tpu.memory_space<vmem>>, vector<32x2048xbf16>
    %cst = arith.constant dense<0.000000e+00> : vector<128x2048xf32>
    %3 = tpu.matmul %1, %2, %cst {dimension_numbers = #tpu.dot_dimension_numbers<[1], [0], [0], [1], [0, 0, 1, 1], [], []>} : vector<128x32xbf16>, vector<32x2048xbf16>, vector<128x2048xf32> -> vector<128x2048xf32>
    %4 = arith.truncf %3 : vector<128x2048xf32> to vector<128x2048xbf16>
    %c0_3 = arith.constant 0 : index
    %c0_4 = arith.constant 0 : index
    %5 = vector.load %arg4[%c0_3, %c0_4] : memref<128x2048xbf16, #tpu.memory_space<vmem>>, vector<128x2048xbf16>
    tpu.vector_store %arg4[%c0_3, %c0_4], %4 {strides = array<i32>} : memref<128x2048xbf16, #tpu.memory_space<vmem>>, vector<128x2048xbf16>,
    %c0_5 = arith.constant 0 : index
    %c0_6 = arith.constant 0 : index
    %6 = vector.load %arg3[%c0_5, %c0_6] : memref<2048x128xbf16, #tpu.memory_space<vmem>>, vector<2048x128xbf16>
    %cst_7 = arith.constant dense<0.000000e+00> : vector<128x128xf32>
    %7 = tpu.matmul %4, %6, %cst_7 {dimension_numbers = #tpu.dot_dimension_numbers<[1], [0], [0], [1], [0, 0, 1, 1], [], []>} : vector<128x2048xbf16>, vector<2048x128xbf16>, vector<128x128xf32> -> vector<128x128xf32>
    %8 = vector.extract_strided_slice %7 {offsets = [0, 16], sizes = [128, 16], strides = [1, 1]} : vector<128x128xf32> to vector<128x16xf32>
    %c0_8 = arith.constant 0 : index
    %c0_9 = arith.constant 0 : index
    %9 = vector.load %arg6[%c0_8, %c0_9] : memref<128x16xf32, #tpu.memory_space<vmem>>, vector<128x16xf32>
    tpu.vector_store %arg6[%c0_8, %c0_9], %8 {strides = array<i32>} : memref<128x16xf32, #tpu.memory_space<vmem>>, vector<128x16xf32>,
    %10 = tpu.transpose %7, [1, 0] : vector<128x128xf32> -> vector<128x128xf32>
    %11 = vector.extract_strided_slice %10 {offsets = [0, 0], sizes = [16, 128], strides = [1, 1]} : vector<128x128xf32> to vector<16x128xf32>
    %c0_10 = arith.constant 0 : index
    %c0_11 = arith.constant 0 : index
    %12 = vector.load %arg5[%c0_10, %c0_11] : memref<16x128xf32, #tpu.memory_space<vmem>>, vector<16x128xf32>
    tpu.vector_store %arg5[%c0_10, %c0_11], %11 {strides = array<i32>} : memref<16x128xf32, #tpu.memory_space<vmem>>, vector<16x128xf32>,
    return
  }
  func.func @transform_0(%arg0: i32) -> (i32, i32) {
    %c0_i32 = arith.constant 0 : i32
    %c0_i32_0 = arith.constant 0 : i32
    return %arg0, %c0_i32 : i32, i32
  }
  func.func @transform_1(%arg0: i32) -> (i32, i32) {
    %c0_i32 = arith.constant 0 : i32
    %c0_i32_0 = arith.constant 0 : i32
    %c0_i32_1 = arith.constant 0 : i32
    return %c0_i32, %c0_i32_0 : i32, i32
  }
  func.func @transform_2(%arg0: i32) -> (i32, i32) {
    %c0_i32 = arith.constant 0 : i32
    %c0_i32_0 = arith.constant 0 : i32
    %c0_i32_1 = arith.constant 0 : i32
    return %c0_i32, %c0_i32_0 : i32, i32
  }
  func.func @transform_3(%arg0: i32) -> (i32, i32) {
    %c0_i32 = arith.constant 0 : i32
    %c0_i32_0 = arith.constant 0 : i32
    return %arg0, %c0_i32 : i32, i32
  }
  func.func @transform_4(%arg0: i32) -> (i32, i32) {
    %c0_i32 = arith.constant 0 : i32
    %c0_i32_0 = arith.constant 0 : i32
    return %c0_i32, %arg0 : i32, i32
  }
  func.func @transform_5(%arg0: i32) -> (i32, i32) {
    %c0_i32 = arith.constant 0 : i32
    %c0_i32_0 = arith.constant 0 : i32
    return %arg0, %c0_i32 : i32, i32
  }
}

</mosaic_0001>

<bundles_post_ra>
// kernel: tpu_custom_call.1
= control target key start
LH: loop header
LB: loop body
LE: loop exit
PB: predicated region body
PF: predicated region fallthrough
CT: control target
= control target key end

     0   :  { %11 = vsyncpa [#allocation3], 0  ;;  %s8091_s0 = inlined_call_operand.vmem [shape: f32[256,32], index: 0, kind: input, shape index: {}]   ;;  %s8092_s1 = inlined_call_operand.vmem [shape: bf16[32,2048], index: 1, kind: input, shape index: {}]   ;;  %s8093_s2 = inlined_call_operand.hbm [shape: bf16[2048,128], index: 2, kind: input, shape index: {}]   ;;  %s8094_s3 = inlined_call_operand.hbm [shape: bf16[256,2048], index: 3, kind: output, shape index: {0}]   ;;  %s8095_s4 = inlined_call_operand.hbm [shape: f32[16,256], index: 4, kind: output, shape index: {1}]   ;;  %s8096_s5 = inlined_call_operand.vmem [shape: f32[256,16], index: 5, kind: output, shape index: {2}]  }
   0x1   :  { %12 = vsyncpa [#allocation4], 0 }
   0x2   :  { %14 = vsyncpa [#allocation4 + $0x1], 0 }
   0x3   :  { %15 = vsyncpa [#allocation7], 0 }
   0x4   :  { %17 = vsyncpa [#allocation7 + $0x1], 0  ;;  %s5773_s18 = smov 0   ;;  %s5775_s19 = smov 0  }
   0x5   :  { %s5777_s20 = smov 0   ;;  %s5779_s21 = smov 0  }
   0x6 LB: > { %s5794_s22 = sadd.s32 4294967295, %s5729_s21   ;;  %s4397_s23 = sadd.s32 4294967294, %s5729_s21   ;;  %s5729_s21 = sphi %s5779_s21, %s8165_s21   ;;  %s5725_s20 = sphi %s5777_s20, %s8164_s20   ;;  %s5721_s19 = sphi %s5775_s19, %s8163_s19   ;;  %s5717_s18 = sphi %s5773_s18, %s8162_s18  }
   0x7   : > { %s5798_s24 = sadd.s32 1, %s5729_s21   ;;  %s98_s25 = sadd.s32 1, %s5725_s20 }
   0x8   : > { %s95_s26 = ssub.s32 %s5729_s21, %s5798_s24  ;;  %p108_p0 = scmp.ne.s32.totalorder %s5725_s20, %s5721_s19 }
   0x9   : > { %p96_p1 = scmp.eq.s32.totalorder %s95_s26, 0  ;;  %p109_p2 = scmp.eq.s32.totalorder %s5794_s22, 1 }
   0xa   : > { %p114_p3 = scmp.ne.s32.totalorder %s5721_s19, %s5717_s18  ;;  %p115_p4 = scmp.eq.s32.totalorder %s4397_s23, 1 }
   0xb   : > { %s5809_s27 = scalar_select %p96_p1, %s5725_s20, %s98_s25  }
   0xc   : > { %p5811_p5 = por %p109_p2, %p108_p0  ;;  %p5815_p6 = por %p115_p4, %p114_p3 }
   0xd   : > { %p4398_p7 = scmp.ge.s32.totalorder %s5729_s21, 1  ;;  %p174_p8 = scmp.lt.s32.totalorder %s5729_s21, 3 }
   0xe   : > { %s8100_s28 = scalar_select %p5811_p5, 1, 0 }
   0xf   : > { %s8101_s29 = scalar_select %p5815_p6, 1, 0 }
  0x10   : > { %p8097_p9 = scmp.eq.s32.totalorder %s5794_s22, 0  ;;  %p5822_p10 = pnand %p4398_p7, %p174_p8 }
  0x11   : > { %s5731_s6 = smov [#allocation2]   ;;  %s5603_s11 = scalar_lea.hbm %s8093_s2, 16384 }
  0x12   : > { %s8102_s30 = scalar_select %p5822_p10, 1, 0 }
  0x13   : > { %s189_s7 = sshll.u32 %s5731_s6, 4  ;;  %p5419_p11 = pneg %p5822_p10  ;;  %s190_s7 = int_to_ptr.vmem [resolvable:$true] %s189_s7 }
  0x14   : > { %p5604_p13 = scmp.ne.s32.totalorder %s8093_s2, %s5603_s11  ;;  %p5610_p3 = scmp.lt.u32.totalorder %s5603_s11, %s8093_s2 }
  0x15   : > { %p5830_p12 = pnand %p8097_p9, %p5419_p11 }
  0x17   : > { %p5605_p0 = pneg %p5830_p12 }
  0x19   : > { %p5606_p1 = pnand %p5605_p0, %p5604_p13 }
  0x1b   : > { %p5607_p2 = pneg %p5606_p1 }
  0x1d   : > { %p5612_p4 = pnand %p5610_p3, %p5607_p2 }
  0x1f   : > { %5615 = shalt.err (!%p5612_p4)
}
  0x20   : > { %s5616_s16 = scalar_lea.vmem %s190_s7, 16384  ;;  %p5624_p9 = scmp.lt.s32.totalorder %s190_s7, %s190_s7 }
  0x21   : > { %p5617_p7 = scmp.ne.s32.totalorder %s190_s7, %s5616_s16  ;;  %p5625_p6 = scmp.lt.s32.totalorder %s5616_s16, %s5616_s16 }
  0x23   : > { %p5619_p8 = pnand %p5617_p7, %p5605_p0  ;;  %p5626_p5 = por %p5625_p6, %p5624_p9 }
  0x25   : > { %p5620_p11 = pneg %p5619_p8 }
  0x27   : > { %p5627_p10 = pnand %p5626_p5, %p5620_p11 }
  0x29   : > { %5630 = shalt.err (!%p5627_p10)
}
  0x2a   : > { %s5732_s17 = smov 64   ;;  %s5733_s23 = smov 4  }
  0x2b   : > { %5422 = dma.hbm_to_vmem [thread:$0]  (!%p5830_p12), %s8093_s2, 16384, %s190_s7, [#allocation3], %s5732_s17, %s5732_s17, %s5733_s23  }
  0x2c   : > { %p8104_p13 = scmp.ne.s32.totalorder %s8102_s30, 0 }
  0x2d   : > { %p8105_p1 = scmp.eq.s32.totalorder (!%p8104_p13), %s5794_s22, 0 }
  0x2e   : > { %214 = sbr.rel (%p8104_p13) target bundleno = 979 (0x3d3), region = 32 }
  0x35   : > { %5704 = dma.done.wait (%p8105_p1), [#allocation3], 16384   ;;  %p8106_p0 = pmov %p8105_p1 }
  0x36   : > { %s4405_s6 = sshll.u32 %s5794_s22, 4  ;;  %v5734_v0 = vmov 0   ;;  %v290_v1 = vld [vmem:[%s8092_s1] sm:$0xff]  ;;  %v291_v3 = vld [vmem:[%s8092_s1 + $0x8] sm:$0xff]  ;;  %v292_v16 = vld [vmem:[%s8092_s1 + $0x10] sm:$0xff]  ;;  %vm482_vm0 = vcmask 261120  }
  0x37   : > { %5706 = vsyncadd (%p8106_p0), [#allocation3], 4294950912  ;;  %539 = vmatprep.mubr.bf16.mxu0 %v5734_v0  ;;  %652 = vmatprep.mubr.bf16.mxu1 %v5734_v0  ;;  %p253_p5 = scmp.lt.s32.totalorder %s4405_s6, 31  ;;  %v298_v2 = vld [vmem:[%s8092_s1 + $0x40] sm:$0xff]  ;;  %v299_v5 = vld [vmem:[%s8092_s1 + $0x48] sm:$0xff]  ;;  %s6170_s26 = sand.u32 1, %s5721_s19  }
  0x38   : > { %v4410_v4 = vcombine.high %v290_v1, %v298_v2  ;;  %v4409_v6 = vcombine.low %v290_v1, %v298_v2  ;;  %v306_v7 = vld [vmem:[%s8092_s1 + $0x80] sm:$0xff]  ;;  %v4412_v9 = vcombine.high %v291_v3, %v299_v5  ;;  %v4411_v10 = vcombine.low %v291_v3, %v299_v5  ;;  %v307_v12 = vld [vmem:[%s8092_s1 + $0x88] sm:$0xff]  ;;  %v300_v17 = vld [vmem:[%s8092_s1 + $0x50] sm:$0xff]  ;;  %s4403_s7 = sshll.u32 %s6170_s26, 10  ;;  %s5735_s9 = smov 112  }
  0x39   : > { %s8167_s6 = smov (!%p253_p5, %s4405_s6), 31  ;;  %v314_v8 = vld [vmem:[%s8092_s1 + $0xc0] sm:$0xff]  ;;  %v315_v13 = vld [vmem:[%s8092_s1 + $0xc8] sm:$0xff]  ;;  %v293_v20 = vld [vmem:[%s8092_s1 + $0x18] sm:$0xff]  ;;  %v4414_v23 = vcombine.high %v292_v16, %v300_v17  ;;  %v4413_v28 = vcombine.low %v292_v16, %v300_v17  ;;  %s6199_s8 = scalar_lea.vmem [#allocation5], %s4403_s7 }
  0x3a   : > { %s4406_s30 = sshll.u32 %s8167_s6, 3  ;;  %v4426_v11 = vcombine.high %v306_v7, %v314_v8  ;;  %507 = vmatprep.subr.bf16.mxu0 %v4410_v4  ;;  %v4428_v14 = vcombine.high %v307_v12, %v315_v13  ;;  %620 = vmatprep.subr.bf16.mxu1 %v4412_v9  ;;  %v4425_v18 = vcombine.low %v306_v7, %v314_v8  ;;  %v301_v21 = vld [vmem:[%s8092_s1 + $0x58] sm:$0xff]  ;;  %v308_v26 = vld [vmem:[%s8092_s1 + $0x90] sm:$0xff]  ;;  %v5924_v33 = vld [vmem:[%s8092_s1 + $0x20] sm:$0xff]  ;;  %s4247_s10 = sshll.u32 %s6199_s8, 4  ;;  %s7962_s10 = int_to_ptr.vmem [resolvable:$true] %s4247_s10 }
  0x3b   : > { %s5876_s15 = scalar_lea.vmem %s8091_s0, %s4406_s30  ;;  %508 = vmatpush1.bf16.msra.mxu0 %v4409_v6  ;;  %621 = vmatpush1.bf16.msra.mxu1 %v4411_v10  ;;  %v4427_v22 = vcombine.low %v307_v12, %v315_v13  ;;  %v4416_v24 = vcombine.high %v293_v20, %v301_v21  ;;  %v316_v27 = vld [vmem:[%s8092_s1 + $0xd0] sm:$0xff]  ;;  %v309_v29 = vld [vmem:[%s8092_s1 + $0x98] sm:$0xff]  ;;  %v4415_v31 = vcombine.low %v293_v20, %v301_v21  ;;  %v5931_v35 = vld [vmem:[%s8092_s1 + $0x60] sm:$0xff]  ;;  %s4223_s14 = scalar_lea.sflag [#allocation4], %s6170_s26 }
  0x3c   : > { %v266_v15 = vld [vmem:[%s5876_s15] sm:$0xff]  ;;  %v267_v19 = vld [vmem:[%s5876_s15 + $0x8] sm:$0xff]  ;;  %509 = vmatprep.subr.bf16.mxu0 %v4426_v11  ;;  %622 = vmatprep.subr.bf16.mxu1 %v4428_v14  ;;  %v317_v30 = vld [vmem:[%s8092_s1 + $0xd8] sm:$0xff]  ;;  %v4430_v32 = vcombine.high %v308_v26, %v316_v27  ;;  %v4429_v40 = vcombine.low %v308_v26, %v316_v27  ;;  %v4418_v42 = vcombine.high %v5924_v33, %v5931_v35  ;;  %s5631_s16 = scalar_lea.vmem %s7962_s10, 16384  ;;  %p8160_p9 = scmp.ne.s32.totalorder %s8100_s28, 0 }
  0x3d   : > { %v5907_v25 = vpack.c.bf16 %v267_v19, %v266_v15  ;;  %v4432_v34 = vcombine.high %v309_v29, %v317_v30  ;;  %v5936_v36 = vld [vmem:[%s8092_s1 + $0x28] sm:$0xff]  ;;  %v268_v38 = vld [vmem:[%s5876_s15 + $0x10] sm:$0xff]  ;;  %v269_v39 = vld [vmem:[%s5876_s15 + $0x18] sm:$0xff]  ;;  %v4431_v41 = vcombine.low %v309_v29, %v317_v30  ;;  %v4417_v4 = vcombine.low %v5924_v33, %v5931_v35  ;;  %p5632_p6 = scmp.ne.s32.totalorder %s7962_s10, %s5631_s16  ;;  %s5736_s17 = smov [#allocation5]  }
  0x3e   : > { %v5941_v37 = vld [vmem:[%s8092_s1 + $0x68] sm:$0xff]  ;;  %v5953_v44 = vpack.c.bf16 %v269_v39, %v268_v38  ;;  %v270_v45 = vld [vmem:[%s5876_s15 + $0x20] sm:$0xff]  ;;  %v272_v48 = vld [vmem:[%s5876_s15 + $0x30] sm:$0xff]  ;;  %s5635_s23 = sshll.u32 %s5736_s17, 4  ;;  %s5636_s23 = int_to_ptr.vmem [resolvable:$false] %s5635_s23 }
  0x3f   : > { %510 = vmatpush1.bf16.msra.mxu0 %v4425_v18  ;;  %623 = vmatpush1.bf16.msra.mxu1 %v4427_v22  ;;  %v4420_v43 = vcombine.high %v5936_v36, %v5941_v37  ;;  %v271_v46 = vld [vmem:[%s5876_s15 + $0x28] sm:$0xff]  ;;  %v273_v49 = vld [vmem:[%s5876_s15 + $0x38] sm:$0xff]  ;;  %v274_v51 = vld [vmem:[%s5876_s15 + $0x40] sm:$0xff]  ;;  %v4419_v7 = vcombine.low %v5936_v36, %v5941_v37  ;;  %p5633_p10 = pnand %p5632_p6, %p8160_p9  ;;  %s5637_s25 = scalar_lea.vmem %s5636_s23, 32768 }
  0x40   : > { %733 = vmatprep.subr.bf16.mxu0 %v4414_v23  ;;  %846 = vmatprep.subr.bf16.mxu1 %v4416_v24  ;;  %v5963_v47 = vpack.c.bf16 %v271_v46, %v270_v45  ;;  %v5973_v50 = vpack.c.bf16 %v273_v49, %v272_v48  ;;  %v275_v52 = vld [vmem:[%s5876_s15 + $0x48] sm:$0xff]  ;;  %v276_v54 = vld [vmem:[%s5876_s15 + $0x50] sm:$0xff]  ;;  %v277_v55 = vld [vmem:[%s5876_s15 + $0x58] sm:$0xff]  ;;  %p5638_p2 = scmp.lt.s32.totalorder %s7962_s10, %s5636_s23  ;;  %p5639_p3 = scmp.lt.s32.totalorder %s5637_s25, %s5631_s16 }
  0x41   : > { %v5983_v53 = vpack.c.bf16 %v275_v52, %v274_v51  ;;  %v5993_v56 = vpack.c.bf16 %v277_v55, %v276_v54  ;;  %v278_v57 = vld [vmem:[%s5876_s15 + $0x60] sm:$0xff]  ;;  %v279_v58 = vld [vmem:[%s5876_s15 + $0x68] sm:$0xff]  ;;  %v280_v60 = vld [vmem:[%s5876_s15 + $0x70] sm:$0xff]  ;;  %p5634_p12 = pneg %p5633_p10 }
  0x42   : > { %4441 = vmatmul.mubr.msk.bf16.vlgmr.msra.gmra.mrb[0].mxu0 %vm482_vm0, %v5907_v25  ;;  %4449 = vmatmul.mubr.msk.bf16.vlgmr.msra.gmra.mrb[0].mxu1 %vm482_vm0, %v5907_v25  ;;  %v6003_v59 = vpack.c.bf16 %v279_v58, %v278_v57  ;;  %v281_v61 = vld [vmem:[%s5876_s15 + $0x78] sm:$0xff]  ;;  %v310_v63 = vld [vmem:[%s8092_s1 + $0xa0] sm:$0xff]  ;;  %v311_v2 = vld [vmem:[%s8092_s1 + $0xa8] sm:$0xff]  ;;  %s4898_s15 = sshll.u32 %s5794_s22, 14  ;;  %p5640_p4 = por %p5639_p3, %p5638_p2 }
  0x43   : > { %734 = vmatpush1.bf16.msra.mxu0 %v4413_v28  ;;  %847 = vmatpush1.bf16.msra.mxu1 %v4415_v31  ;;  %v6013_v62 = vpack.c.bf16 %v281_v61, %v280_v60  ;;  %v318_v1 = vld [vmem:[%s8092_s1 + $0xe0] sm:$0xff]  ;;  %v319_v3 = vld [vmem:[%s8092_s1 + $0xe8] sm:$0xff]  ;;  %v296_v5 = vld [vmem:[%s8092_s1 + $0x30] sm:$0xff]  ;;  %s7960_s13 = scalar_lea.hbm %s8094_s3, %s4898_s15 }
  0x44   : > { %549 = vmatprep.mubr.bf16.mxu0 %v5734_v0  ;;  %662 = vmatprep.mubr.bf16.mxu1 %v5734_v0  ;;  %v304_v6 = vld [vmem:[%s8092_s1 + $0x70] sm:$0xff]  ;;  %v297_v8 = vld [vmem:[%s8092_s1 + $0x38] sm:$0xff]  ;;  %v4434_v10 = vcombine.high %v310_v63, %v318_v1  ;;  %v4436_v11 = vcombine.high %v311_v2, %v319_v3  ;;  %v4433_v12 = vcombine.low %v310_v63, %v318_v1  ;;  %v5475_v27 = vld [vmem:[#allocation2 + $0x40] sm:$0xff]   ;;  %p5641_p7 = pnand %p5640_p4, %p5634_p12 }
  0x45   : > { %735 = vmatprep.subr.bf16.mxu0 %v4430_v32  ;;  %848 = vmatprep.subr.bf16.mxu1 %v4432_v34  ;;  %v305_v9 = vld [vmem:[%s8092_s1 + $0x78] sm:$0xff]  ;;  %v4435_v13 = vcombine.low %v311_v2, %v319_v3  ;;  %v4422_v14 = vcombine.high %v296_v5, %v304_v6  ;;  %v312_v16 = vld [vmem:[%s8092_s1 + $0xb0] sm:$0xff]  ;;  %v4421_v18 = vcombine.low %v296_v5, %v304_v6  ;;  %v5477_v28 = vld [vmem:[#allocation2 + $0xc0] sm:$0xff]  }
  0x46   : > { %v4424_v15 = vcombine.high %v297_v8, %v305_v9  ;;  %v320_v17 = vld [vmem:[%s8092_s1 + $0xf0] sm:$0xff]  ;;  %v313_v19 = vld [vmem:[%s8092_s1 + $0xb8] sm:$0xff]  ;;  %v4423_v21 = vcombine.low %v297_v8, %v305_v9  ;;  %v5476_v29 = vld [vmem:[#allocation2] sm:$0xff]  }
  0x47   : > { %736 = vmatpush1.bf16.msra.mxu0 %v4429_v40  ;;  %849 = vmatpush1.bf16.msra.mxu1 %v4431_v41  ;;  %v321_v20 = vld [vmem:[%s8092_s1 + $0xf8] sm:$0xff]  ;;  %v4438_v22 = vcombine.high %v312_v16, %v320_v17  ;;  %v4437_v24 = vcombine.low %v312_v16, %v320_v17  ;;  %v5478_v30 = vld [vmem:[#allocation2 + $0x80] sm:$0xff]   ;;  %v5479_v31 = vld [vmem:[#allocation2 + $0x48] sm:$0xff]  }
  0x48   : > { %959 = vmatprep.subr.bf16.mxu0 %v4418_v42  ;;  %1072 = vmatprep.subr.bf16.mxu1 %v4420_v43  ;;  %v4440_v23 = vcombine.high %v313_v19, %v321_v20  ;;  %v4439_v26 = vcombine.low %v313_v19, %v321_v20  ;;  %v5481_v32 = vld [vmem:[#allocation2 + $0xc8] sm:$0xff]   ;;  %v5483_v35 = vld [vmem:[#allocation2 + $0x50] sm:$0xff]   ;;  %v5489_v39 = vld [vmem:[#allocation2 + $0xd8] sm:$0xff]  }
  0x49   : > { %v5480_v33 = vld [vmem:[#allocation2 + $0x8] sm:$0xff]   ;;  %v5485_v36 = vld [vmem:[#allocation2 + $0xd0] sm:$0xff]   ;;  %v5488_v40 = vld [vmem:[#allocation2 + $0x18] sm:$0xff]  }
  0x4a   : > { %4442 = vmatmul.mubr.msk.bf16.gmra.mrb[4].mxu0 %vm482_vm0, %v5953_v44  ;;  %4450 = vmatmul.mubr.msk.bf16.gmra.mrb[4].mxu1 %vm482_vm0, %v5953_v44  ;;  %v5482_v34 = vld [vmem:[#allocation2 + $0x88] sm:$0xff]   ;;  %v5484_v37 = vld [vmem:[#allocation2 + $0x10] sm:$0xff]   ;;  %v5490_v41 = vld [vmem:[#allocation2 + $0x98] sm:$0xff]  }
  0x4b   : > { %559 = vmatprep.mubr.bf16.mxu0 %v5734_v0  ;;  %672 = vmatprep.mubr.bf16.mxu1 %v5734_v0  ;;  %v5486_v38 = vld [vmem:[#allocation2 + $0x90] sm:$0xff]   ;;  %v5491_v42 = vld [vmem:[#allocation2 + $0x60] sm:$0xff]   ;;  %v5495_v46 = vld [vmem:[#allocation2 + $0x68] sm:$0xff]  }
  0x4c   : > { %v5493_v43 = vld [vmem:[#allocation2 + $0xe0] sm:$0xff]   ;;  %v5497_v48 = vld [vmem:[#allocation2 + $0xe8] sm:$0xff]   ;;  %v5499_v54 = vld [vmem:[#allocation2 + $0x70] sm:$0xff]  }
  0x4d   : > { %v5492_v45 = vld [vmem:[#allocation2 + $0x20] sm:$0xff]   ;;  %v5496_v49 = vld [vmem:[#allocation2 + $0x28] sm:$0xff]   ;;  %v5501_v58 = vld [vmem:[#allocation2 + $0xf0] sm:$0xff]  }
  0x4e   : > { %v5498_v52 = vld [vmem:[#allocation2 + $0xa8] sm:$0xff]   ;;  %v5502_v9 = vld [vmem:[#allocation2 + $0xb0] sm:$0xff]   ;;  %v5506_v16 = vld [vmem:[#allocation2 + $0xb8] sm:$0xff]  }
  0x4f   : > { %v5507_v17 = vld [vmem:[#allocation2 + $0x140] sm:$0xff]  }
  0x52   : > { %4443 = vmatmul.mubr.msk.bf16.gmra.mrb[8].mxu0 %vm482_vm0, %v5963_v47  ;;  %4451 = vmatmul.mubr.msk.bf16.gmra.mrb[8].mxu1 %vm482_vm0, %v5963_v47 }
  0x53   : > { %569 = vmatprep.mubr.bf16.mxu0 %v5734_v0  ;;  %682 = vmatprep.mubr.bf16.mxu1 %v5734_v0 }
  0x5a   : > { %4444 = vmatmul.mubr.msk.bf16.gmra.mrb[12].mxu0 %vm482_vm0, %v5973_v50  ;;  %4452 = vmatmul.mubr.msk.bf16.gmra.mrb[12].mxu1 %vm482_vm0, %v5973_v50 }
  0x5b   : > { %579 = vmatprep.mubr.bf16.mxu0 %v5734_v0  ;;  %692 = vmatprep.mubr.bf16.mxu1 %v5734_v0 }
  0x62   : > { %4445 = vmatmul.mubr.msk.bf16.gmra.mrb[16].mxu0 %vm482_vm0, %v5983_v53  ;;  %4453 = vmatmul.mubr.msk.bf16.gmra.mrb[16].mxu1 %vm482_vm0, %v5983_v53 }
  0x63   : > { %589 = vmatprep.mubr.bf16.mxu0 %v5734_v0  ;;  %702 = vmatprep.mubr.bf16.mxu1 %v5734_v0 }
  0x6a   : > { %4446 = vmatmul.mubr.msk.bf16.gmra.mrb[20].mxu0 %vm482_vm0, %v5993_v56  ;;  %4454 = vmatmul.mubr.msk.bf16.gmra.mrb[20].mxu1 %vm482_vm0, %v5993_v56 }
  0x6b   : > { %599 = vmatprep.mubr.bf16.mxu0 %v5734_v0  ;;  %712 = vmatprep.mubr.bf16.mxu1 %v5734_v0 }
  0x72   : > { %4447 = vmatmul.mubr.msk.bf16.gmra.mrb[24].mxu0 %vm482_vm0, %v6003_v59  ;;  %4455 = vmatmul.mubr.msk.bf16.gmra.mrb[24].mxu1 %vm482_vm0, %v6003_v59 }
  0x73   : > { %609 = vmatprep.mubr.bf16.mxu0 %v5734_v0  ;;  %722 = vmatprep.mubr.bf16.mxu1 %v5734_v0 }
  0x7a   : > { %4448 = vmatmul.mubr.msk.bf16.gmra.mrb[28].mxu0 %vm482_vm0, %v6013_v62  ;;  %4456 = vmatmul.mubr.msk.bf16.gmra.mrb[28].mxu1 %vm482_vm0, %v6013_v62 }
  0x7b   : > { %765 = vmatprep.mubr.bf16.mxu0 %v5734_v0  ;;  %878 = vmatprep.mubr.bf16.mxu1 %v5734_v0 }
  0x82   : > { %4457 = vmatmul.mubr.msk.bf16.vlgmr.msra.gmra.mrb[32].mxu0 %vm482_vm0, %v5907_v25  ;;  %4465 = vmatmul.mubr.msk.bf16.vlgmr.msra.gmra.mrb[32].mxu1 %vm482_vm0, %v5907_v25 }
  0x83   : > { %960 = vmatpush1.bf16.msra.mxu0 %v4417_v4  ;;  %1073 = vmatpush1.bf16.msra.mxu1 %v4419_v7  ;;  %v5500_v4 = vld [vmem:[#allocation2 + $0x30] sm:$0xff]  }
  0x84   : > { %775 = vmatprep.mubr.bf16.mxu0 %v5734_v0  ;;  %888 = vmatprep.mubr.bf16.mxu1 %v5734_v0 }
  0x85   : > { %961 = vmatprep.subr.bf16.mxu0 %v4434_v10  ;;  %1074 = vmatprep.subr.bf16.mxu1 %v4436_v11  ;;  %v5503_v10 = vld [vmem:[#allocation2 + $0x78] sm:$0xff]  }
  0x87   : > { %962 = vmatpush1.bf16.msra.mxu0 %v4433_v12  ;;  %1075 = vmatpush1.bf16.msra.mxu1 %v4435_v13  ;;  %v5505_v13 = vld [vmem:[#allocation2 + $0xf8] sm:$0xff]  }
  0x88   : > { %1185 = vmatprep.subr.bf16.mxu0 %v4422_v14  ;;  %1298 = vmatprep.subr.bf16.mxu1 %v4424_v15  ;;  %v5504_v14 = vld [vmem:[#allocation2 + $0x38] sm:$0xff]  }
  0x8a   : > { %4458 = vmatmul.mubr.msk.bf16.gmra.mrb[36].mxu0 %vm482_vm0, %v5953_v44  ;;  %4466 = vmatmul.mubr.msk.bf16.gmra.mrb[36].mxu1 %vm482_vm0, %v5953_v44 }
  0x8b   : > { %785 = vmatprep.mubr.bf16.mxu0 %v5734_v0  ;;  %898 = vmatprep.mubr.bf16.mxu1 %v5734_v0 }
  0x92   : > { %4459 = vmatmul.mubr.msk.bf16.gmra.mrb[40].mxu0 %vm482_vm0, %v5963_v47  ;;  %4467 = vmatmul.mubr.msk.bf16.gmra.mrb[40].mxu1 %vm482_vm0, %v5963_v47 }
  0x93   : > { %795 = vmatprep.mubr.bf16.mxu0 %v5734_v0  ;;  %908 = vmatprep.mubr.bf16.mxu1 %v5734_v0 }
  0x9a   : > { %4460 = vmatmul.mubr.msk.bf16.gmra.mrb[44].mxu0 %vm482_vm0, %v5973_v50  ;;  %4468 = vmatmul.mubr.msk.bf16.gmra.mrb[44].mxu1 %vm482_vm0, %v5973_v50 }
  0x9b   : > { %805 = vmatprep.mubr.bf16.mxu0 %v5734_v0  ;;  %918 = vmatprep.mubr.bf16.mxu1 %v5734_v0 }
  0xa2   : > { %4461 = vmatmul.mubr.msk.bf16.gmra.mrb[48].mxu0 %vm482_vm0, %v5983_v53  ;;  %4469 = vmatmul.mubr.msk.bf16.gmra.mrb[48].mxu1 %vm482_vm0, %v5983_v53 }
  0xa3   : > { %815 = vmatprep.mubr.bf16.mxu0 %v5734_v0  ;;  %928 = vmatprep.mubr.bf16.mxu1 %v5734_v0 }
  0xaa   : > { %4462 = vmatmul.mubr.msk.bf16.gmra.mrb[52].mxu0 %vm482_vm0, %v5993_v56  ;;  %4470 = vmatmul.mubr.msk.bf16.gmra.mrb[52].mxu1 %vm482_vm0, %v5993_v56 }
  0xab   : > { %825 = vmatprep.mubr.bf16.mxu0 %v5734_v0  ;;  %938 = vmatprep.mubr.bf16.mxu1 %v5734_v0 }
  0xb2   : > { %4463 = vmatmul.mubr.msk.bf16.gmra.mrb[56].mxu0 %vm482_vm0, %v6003_v59  ;;  %4471 = vmatmul.mubr.msk.bf16.gmra.mrb[56].mxu1 %vm482_vm0, %v6003_v59 }
  0xb3   : > { %835 = vmatprep.mubr.bf16.mxu0 %v5734_v0  ;;  %948 = vmatprep.mubr.bf16.mxu1 %v5734_v0 }
  0xba   : > { %4464 = vmatmul.mubr.msk.bf16.gmra.mrb[60].mxu0 %vm482_vm0, %v6013_v62  ;;  %4472 = vmatmul.mubr.msk.bf16.gmra.mrb[60].mxu1 %vm482_vm0, %v6013_v62 }
  0xbb   : > { %991 = vmatprep.mubr.bf16.mxu0 %v5734_v0  ;;  %1104 = vmatprep.mubr.bf16.mxu1 %v5734_v0 }
  0xc2   : > { %4473 = vmatmul.mubr.msk.bf16.vlgmr.msra.gmra.mrb[64].mxu0 %vm482_vm0, %v5907_v25  ;;  %4481 = vmatmul.mubr.msk.bf16.vlgmr.msra.gmra.mrb[64].mxu1 %vm482_vm0, %v5907_v25 }
  0xc3   : > { %1186 = vmatpush1.bf16.msra.mxu0 %v4421_v18  ;;  %1299 = vmatpush1.bf16.msra.mxu1 %v4423_v21 }
  0xc4   : > { %1001 = vmatprep.mubr.bf16.mxu0 %v5734_v0  ;;  %1114 = vmatprep.mubr.bf16.mxu1 %v5734_v0 }
  0xc5   : > { %1187 = vmatprep.subr.bf16.mxu0 %v4438_v22  ;;  %1300 = vmatprep.subr.bf16.mxu1 %v4440_v23 }
  0xc7   : > { %1188 = vmatpush1.bf16.msra.mxu0 %v4437_v24  ;;  %1301 = vmatpush1.bf16.msra.mxu1 %v4439_v26 }
  0xc8   : > { %4899 = vmatprep.subr.bf16.mxu0 %v5475_v27  ;;  %4963 = vmatprep.subr.bf16.mxu1 %v5477_v28 }
  0xca   : > { %4474 = vmatmul.mubr.msk.bf16.gmra.mrb[68].mxu0 %vm482_vm0, %v5953_v44  ;;  %4482 = vmatmul.mubr.msk.bf16.gmra.mrb[68].mxu1 %vm482_vm0, %v5953_v44 }
  0xcb   : > { %1011 = vmatprep.mubr.bf16.mxu0 %v5734_v0  ;;  %1124 = vmatprep.mubr.bf16.mxu1 %v5734_v0 }
  0xd2   : > { %4475 = vmatmul.mubr.msk.bf16.gmra.mrb[72].mxu0 %vm482_vm0, %v5963_v47  ;;  %4483 = vmatmul.mubr.msk.bf16.gmra.mrb[72].mxu1 %vm482_vm0, %v5963_v47 }
  0xd3   : > { %1021 = vmatprep.mubr.bf16.mxu0 %v5734_v0  ;;  %1134 = vmatprep.mubr.bf16.mxu1 %v5734_v0 }
  0xda   : > { %4476 = vmatmul.mubr.msk.bf16.gmra.mrb[76].mxu0 %vm482_vm0, %v5973_v50  ;;  %4484 = vmatmul.mubr.msk.bf16.gmra.mrb[76].mxu1 %vm482_vm0, %v5973_v50 }
  0xdb   : > { %1031 = vmatprep.mubr.bf16.mxu0 %v5734_v0  ;;  %1144 = vmatprep.mubr.bf16.mxu1 %v5734_v0 }
  0xe2   : > { %4477 = vmatmul.mubr.msk.bf16.gmra.mrb[80].mxu0 %vm482_vm0, %v5983_v53  ;;  %4485 = vmatmul.mubr.msk.bf16.gmra.mrb[80].mxu1 %vm482_vm0, %v5983_v53 }
  0xe3   : > { %1041 = vmatprep.mubr.bf16.mxu0 %v5734_v0  ;;  %1154 = vmatprep.mubr.bf16.mxu1 %v5734_v0 }
  0xea   : > { %4478 = vmatmul.mubr.msk.bf16.gmra.mrb[84].mxu0 %vm482_vm0, %v5993_v56  ;;  %4486 = vmatmul.mubr.msk.bf16.gmra.mrb[84].mxu1 %vm482_vm0, %v5993_v56 }
  0xeb   : > { %1051 = vmatprep.mubr.bf16.mxu0 %v5734_v0  ;;  %1164 = vmatprep.mubr.bf16.mxu1 %v5734_v0 }
  0xf2   : > { %4479 = vmatmul.mubr.msk.bf16.gmra.mrb[88].mxu0 %vm482_vm0, %v6003_v59  ;;  %4487 = vmatmul.mubr.msk.bf16.gmra.mrb[88].mxu1 %vm482_vm0, %v6003_v59 }
  0xf3   : > { %1061 = vmatprep.mubr.bf16.mxu0 %v5734_v0  ;;  %1174 = vmatprep.mubr.bf16.mxu1 %v5734_v0 }
  0xfa   : > { %4480 = vmatmul.mubr.msk.bf16.gmra.mrb[92].mxu0 %vm482_vm0, %v6013_v62  ;;  %4488 = vmatmul.mubr.msk.bf16.gmra.mrb[92].mxu1 %vm482_vm0, %v6013_v62 }
  0xfb   : > { %1217 = vmatprep.mubr.bf16.mxu0 %v5734_v0  ;;  %1330 = vmatprep.mubr.bf16.mxu1 %v5734_v0 }
 0x102   : > { %4489 = vmatmul.mubr.msk.bf16.vlgmr.msra.gmra.mrb[96].mxu0 %vm482_vm0, %v5907_v25  ;;  %4497 = vmatmul.mubr.msk.bf16.vlgmr.msra.gmra.mrb[96].mxu1 %vm482_vm0, %v5907_v25  ;;  %v5487_v25 = vld [vmem:[#allocation2 + $0x58] sm:$0xff]  }
 0x103   : > { %4900 = vmatpush3.bf16.msra.mxu0 %v5476_v29  ;;  %4964 = vmatpush3.bf16.msra.mxu1 %v5478_v30 }
 0x104   : > { %1227 = vmatprep.mubr.bf16.mxu0 %v5734_v0  ;;  %1340 = vmatprep.mubr.bf16.mxu1 %v5734_v0 }
 0x105   : > { %4901 = vmatprep.subr.bf16.mxu0 %v5479_v31  ;;  %4965 = vmatprep.subr.bf16.mxu1 %v5481_v32 }
 0x107   : > { %4902 = vmatpush3.bf16.msra.mxu0 %v5480_v33  ;;  %4966 = vmatpush3.bf16.msra.mxu1 %v5482_v34 }
 0x108   : > { %4903 = vmatprep.subr.bf16.mxu0 %v5483_v35  ;;  %4967 = vmatprep.subr.bf16.mxu1 %v5485_v36 }
 0x10a   : > { %4490 = vmatmul.mubr.msk.bf16.gmra.mrb[100].mxu0 %vm482_vm0, %v5953_v44  ;;  %4498 = vmatmul.mubr.msk.bf16.gmra.mrb[100].mxu1 %vm482_vm0, %v5953_v44  ;;  %v5494_v44 = vld [vmem:[#allocation2 + $0xa0] sm:$0xff]  }
 0x10b   : > { %1237 = vmatprep.mubr.bf16.mxu0 %v5734_v0  ;;  %1350 = vmatprep.mubr.bf16.mxu1 %v5734_v0 }
 0x10c   : > { %4904 = vmatpush3.bf16.msra.mxu0 %v5484_v37  ;;  %4968 = vmatpush3.bf16.msra.mxu1 %v5486_v38 }
 0x10d   : > { %4905 = vmatprep.subr.bf16.mxu0 %v5487_v25  ;;  %4969 = vmatprep.subr.bf16.mxu1 %v5489_v39 }
 0x110   : > { %4906 = vmatpush3.bf16.msra.mxu0 %v5488_v40  ;;  %4970 = vmatpush3.bf16.msra.mxu1 %v5490_v41 }
 0x111   : > { %4907 = vmatprep.subr.bf16.mxu0 %v5491_v42  ;;  %4971 = vmatprep.subr.bf16.mxu1 %v5493_v43 }
 0x112   : > { %4491 = vmatmul.mubr.msk.bf16.gmra.mrb[104].mxu0 %vm482_vm0, %v5963_v47  ;;  %4499 = vmatmul.mubr.msk.bf16.gmra.mrb[104].mxu1 %vm482_vm0, %v5963_v47 }
 0x113   : > { %1247 = vmatprep.mubr.bf16.mxu0 %v5734_v0  ;;  %1360 = vmatprep.mubr.bf16.mxu1 %v5734_v0 }
 0x114   : > { %4908 = vmatpush3.bf16.msra.mxu0 %v5492_v45  ;;  %4972 = vmatpush3.bf16.msra.mxu1 %v5494_v44 }
 0x115   : > { %v6179_v51 = vpop.f32.mrb[0].mxu0  ;;  %4909 = vmatprep.subr.bf16.mxu0 %v5495_v46  ;;  %v6181_v55 = vpop.f32.mrb[0].mxu1  ;;  %4973 = vmatprep.subr.bf16.mxu1 %v5497_v48 }
 0x116   : > { %v6183_v57 = vpop.f32.mrb[1].mxu0  ;;  %v6187_v60 = vpop.f32.mrb[1].mxu1 }
 0x117   : > { %v4769_v47 = vpack.c.bf16 %v6183_v57, %v6179_v51  ;;  %v6189_v61 = vpop.f32.mrb[2].mxu0  ;;  %v4770_v63 = vpack.c.bf16 %v6187_v60, %v6181_v55  ;;  %v6195_v2 = vpop.f32.mrb[2].mxu1 }
 0x118   : > { %v1411_v1 = vpack.c.bf16 %v6189_v61, %v6179_v51  ;;  %v6197_v3 = vpop.f32.mrb[3].mxu0  ;;  %4910 = vmatpush3.bf16.msra.mxu0 %v5496_v49  ;;  %v1413_v5 = vpack.c.bf16 %v6195_v2, %v6181_v55  ;;  %v6208_v8 = vpop.f32.mrb[3].mxu1  ;;  %4974 = vmatpush3.bf16.msra.mxu1 %v5498_v52  ;;  %v5514_v51 = vld [vmem:[#allocation2 + $0x188] sm:$0xff]  }
 0x119   : > { %2179 = vst [vmem:[%s6199_s8] sm:$0xff] %v4769_v47  ;;  %v1412_v6 = vpack.c.bf16 %v6197_v3, %v6183_v57  ;;  %v4777_v7 = vpack.c.bf16 %v6197_v3, %v6189_v61  ;;  %4911 = vmatprep.subr.bf16.mxu0 %v5499_v54  ;;  %2180 = vst [vmem:[%s6199_s8 + $0x8] sm:$0xff] %v4770_v63  ;;  %v1414_v11 = vpack.c.bf16 %v6208_v8, %v6187_v60  ;;  %v5510_v60 = vld [vmem:[#allocation2 + $0x180] sm:$0xff]   ;;  %v5515_v61 = vld [vmem:[#allocation2 + $0x150] sm:$0xff]  }
 0x11a   : > { %v4778_v12 = vpack.c.bf16 %v6208_v8, %v6195_v2  ;;  %4492 = vmatmul.mubr.msk.bf16.gmra.mrb[108].mxu0 %vm482_vm0, %v5973_v50  ;;  %4975 = vmatprep.subr.bf16.mxu1 %v5501_v58  ;;  %v5508_v8 = vld [vmem:[#allocation2 + $0x100] sm:$0xff]   ;;  %v5517_v2 = vld [vmem:[#allocation2 + $0x1d0] sm:$0xff]  }
 0x11b   : > { %2187 = vst [vmem:[%s6199_s8 + $0x40] sm:$0xff] %v4777_v7  ;;  %4500 = vmatmul.mubr.msk.bf16.gmra.mrb[108].mxu1 %vm482_vm0, %v5973_v50  ;;  %1257 = vmatprep.mubr.bf16.mxu0 %v5734_v0  ;;  %v5509_v50 = vld [vmem:[#allocation2 + $0x1c0] sm:$0xff]  }
 0x11c   : > { %2188 = vst [vmem:[%s6199_s8 + $0x48] sm:$0xff] %v4778_v12  ;;  %1370 = vmatprep.mubr.bf16.mxu1 %v5734_v0  ;;  %4912 = vmatpush3.bf16.msra.mxu0 %v5500_v4  ;;  %v5511_v4 = vld [vmem:[#allocation2 + $0x148] sm:$0xff]  }
 0x11d   : > { %v6223_v15 = vpop.f32.mrb[4].mxu0  ;;  %4976 = vmatpush3.bf16.msra.mxu1 %v5502_v9  ;;  %4913 = vmatprep.subr.bf16.mxu0 %v5503_v10  ;;  %v6225_v18 = vpop.f32.mrb[4].mxu1 }
 0x11e   : > { %v6227_v19 = vpop.f32.mrb[5].mxu0  ;;  %4977 = vmatprep.subr.bf16.mxu1 %v5505_v13  ;;  %v6231_v21 = vpop.f32.mrb[5].mxu1 }
 0x11f   : > { %v4785_v20 = vpack.c.bf16 %v6227_v19, %v6223_v15  ;;  %v6233_v22 = vpop.f32.mrb[6].mxu0  ;;  %v4786_v23 = vpack.c.bf16 %v6231_v21, %v6225_v18  ;;  %v6239_v26 = vpop.f32.mrb[6].mxu1 }
 0x120   : > { %v1427_v24 = vpack.c.bf16 %v6233_v22, %v6223_v15  ;;  %v6241_v27 = vpop.f32.mrb[7].mxu0  ;;  %4914 = vmatpush3.bf16.msra.mxu0 %v5504_v14  ;;  %v1429_v28 = vpack.c.bf16 %v6239_v26, %v6225_v18  ;;  %v6250_v31 = vpop.f32.mrb[7].mxu1 }
 0x121   : > { %2195 = vst [vmem:[%s6199_s8 + $0x80] sm:$0xff] %v4785_v20  ;;  %v1428_v29 = vpack.c.bf16 %v6241_v27, %v6227_v19  ;;  %v4793_v30 = vpack.c.bf16 %v6241_v27, %v6233_v22  ;;  %4978 = vmatpush3.bf16.msra.mxu1 %v5506_v16  ;;  %5027 = vmatprep.subr.bf16.mxu0 %v5507_v17  ;;  %2196 = vst [vmem:[%s6199_s8 + $0x88] sm:$0xff] %v4786_v23  ;;  %v5522_v22 = vld [vmem:[#allocation2 + $0x198] sm:$0xff]  }
 0x122   : > { %v1430_v32 = vpack.c.bf16 %v6250_v31, %v6231_v21  ;;  %v4794_v33 = vpack.c.bf16 %v6250_v31, %v6239_v26  ;;  %4493 = vmatmul.mubr.msk.bf16.gmra.mrb[112].mxu0 %vm482_vm0, %v5983_v53  ;;  %5091 = vmatprep.subr.bf16.mxu1 %v5509_v50 }
 0x123   : > { %2203 = vst [vmem:[%s6199_s8 + $0xc0] sm:$0xff] %v4793_v30  ;;  %4501 = vmatmul.mubr.msk.bf16.gmra.mrb[112].mxu1 %vm482_vm0, %v5983_v53  ;;  %1267 = vmatprep.mubr.bf16.mxu0 %v5734_v0 }
 0x124   : > { %2204 = vst [vmem:[%s6199_s8 + $0xc8] sm:$0xff] %v4794_v33  ;;  %1380 = vmatprep.mubr.bf16.mxu1 %v5734_v0 }
 0x125   : > { %v6265_v34 = vpop.f32.mrb[8].mxu0  ;;  %v6267_v35 = vpop.f32.mrb[8].mxu1 }
 0x126   : > { %v6269_v36 = vpop.f32.mrb[9].mxu0  ;;  %v6273_v38 = vpop.f32.mrb[9].mxu1 }
 0x127   : > { %v4801_v37 = vpack.c.bf16 %v6269_v36, %v6265_v34  ;;  %v6275_v25 = vpop.f32.mrb[10].mxu0  ;;  %v4802_v53 = vpack.c.bf16 %v6273_v38, %v6267_v35  ;;  %v6281_v40 = vpop.f32.mrb[10].mxu1 }
 0x128   : > { %v1443_v39 = vpack.c.bf16 %v6275_v25, %v6265_v34  ;;  %v6283_v41 = vpop.f32.mrb[11].mxu0  ;;  %v1445_v42 = vpack.c.bf16 %v6281_v40, %v6267_v35  ;;  %v6292_v44 = vpop.f32.mrb[11].mxu1 }
 0x129   : > { %2211 = vst [vmem:[%s6199_s8 + $0x100] sm:$0xff] %v4801_v37  ;;  %v1444_v43 = vpack.c.bf16 %v6283_v41, %v6269_v36  ;;  %v4809_v45 = vpack.c.bf16 %v6283_v41, %v6275_v25  ;;  %2212 = vst [vmem:[%s6199_s8 + $0x108] sm:$0xff] %v4802_v53  ;;  %v1446_v46 = vpack.c.bf16 %v6292_v44, %v6273_v38  ;;  %v5530_v25 = vld [vmem:[#allocation2 + $0x1a8] sm:$0xff]  }
 0x12a   : > { %v4810_v48 = vpack.c.bf16 %v6292_v44, %v6281_v40  ;;  %4494 = vmatmul.mubr.msk.bf16.gmra.mrb[116].mxu0 %vm482_vm0, %v5993_v56 }
 0x12b   : > { %2219 = vst [vmem:[%s6199_s8 + $0x140] sm:$0xff] %v4809_v45  ;;  %4502 = vmatmul.mubr.msk.bf16.gmra.mrb[116].mxu1 %vm482_vm0, %v5993_v56  ;;  %1277 = vmatprep.mubr.bf16.mxu0 %v5734_v0 }
 0x12c   : > { %2220 = vst [vmem:[%s6199_s8 + $0x148] sm:$0xff] %v4810_v48  ;;  %1390 = vmatprep.mubr.bf16.mxu1 %v5734_v0 }
 0x12d   : > { %v6307_v49 = vpop.f32.mrb[12].mxu0  ;;  %v6309_v52 = vpop.f32.mrb[12].mxu1 }
 0x12e   : > { %v6311_v54 = vpop.f32.mrb[13].mxu0  ;;  %v6315_v47 = vpop.f32.mrb[13].mxu1 }
 0x12f   : > { %v4817_v58 = vpack.c.bf16 %v6311_v54, %v6307_v49  ;;  %v6317_v63 = vpop.f32.mrb[14].mxu0  ;;  %v4818_v56 = vpack.c.bf16 %v6315_v47, %v6309_v52  ;;  %v6323_v7 = vpop.f32.mrb[14].mxu1 }
 0x130   : > { %v6325_v9 = vpop.f32.mrb[15].mxu0  ;;  %v6334_v14 = vpop.f32.mrb[15].mxu1 }
 0x131   : > { %2227 = vst [vmem:[%s6199_s8 + $0x180] sm:$0xff] %v4817_v58  ;;  %v1460_v12 = vpack.c.bf16 %v6325_v9, %v6311_v54  ;;  %v4825_v13 = vpack.c.bf16 %v6325_v9, %v6317_v63  ;;  %2228 = vst [vmem:[%s6199_s8 + $0x188] sm:$0xff] %v4818_v56  ;;  %v4826_v17 = vpack.c.bf16 %v6334_v14, %v6323_v7 }
 0x132   : > { %4495 = vmatmul.mubr.msk.bf16.gmra.mrb[120].mxu0 %vm482_vm0, %v6003_v59 }
 0x133   : > { %2235 = vst [vmem:[%s6199_s8 + $0x1c0] sm:$0xff] %v4825_v13  ;;  %4503 = vmatmul.mubr.msk.bf16.gmra.mrb[120].mxu1 %vm482_vm0, %v6003_v59  ;;  %1287 = vmatprep.mubr.bf16.mxu0 %v5734_v0  ;;  %2236 = vst [vmem:[%s6199_s8 + $0x1c8] sm:$0xff] %v4826_v17 }
 0x134   : > { %1400 = vmatprep.mubr.bf16.mxu1 %v5734_v0 }
 0x135   : > { %v6349_v50 = vpop.f32.mrb[16].mxu0  ;;  %v6351_v20 = vpop.f32.mrb[16].mxu1 }
 0x136   : > { %v6353_v23 = vpop.f32.mrb[17].mxu0  ;;  %v6357_v33 = vpop.f32.mrb[17].mxu1 }
 0x137   : > { %v4833_v30 = vpack.c.bf16 %v6353_v23, %v6349_v50  ;;  %v6359_v37 = vpop.f32.mrb[18].mxu0  ;;  %v4834_v59 = vpack.c.bf16 %v6357_v33, %v6351_v20  ;;  %v6365_v53 = vpop.f32.mrb[18].mxu1 }
 0x138   : > { %v6367_v45 = vpop.f32.mrb[19].mxu0  ;;  %v6376_v13 = vpop.f32.mrb[19].mxu1 }
 0x139   : > { %2243 = vst [vmem:[%s6199_s8 + $0x200] sm:$0xff] %v4833_v30  ;;  %v4841_v56 = vpack.c.bf16 %v6367_v45, %v6359_v37  ;;  %2244 = vst [vmem:[%s6199_s8 + $0x208] sm:$0xff] %v4834_v59  ;;  %v4842_v0 = vpack.c.bf16 %v6376_v13, %v6365_v53 }
 0x13a   : > { %4496 = vmatmul.mubr.msk.bf16.gmra.mrb[124].mxu0 %vm482_vm0, %v6013_v62 }
 0x13b   : > { %2251 = vst [vmem:[%s6199_s8 + $0x240] sm:$0xff] %v4841_v56  ;;  %4504 = vmatmul.mubr.msk.bf16.gmra.mrb[124].mxu1 %vm482_vm0, %v6013_v62  ;;  %3363 = vmatprep.mubr.bf16.mxu0 %v1412_v6  ;;  %2252 = vst [vmem:[%s6199_s8 + $0x248] sm:$0xff] %v4842_v0 }
 0x13c   : > { %3460 = vmatprep.mubr.bf16.mxu1 %v1414_v11  ;;  %v5513_v11 = vld [vmem:[#allocation2 + $0x1c8] sm:$0xff]  }
 0x13d   : > { %v6395_v30 = vpop.f32.mrb[20].mxu0  ;;  %v6397_v59 = vpop.f32.mrb[20].mxu1 }
 0x13e   : > { %v6399_v48 = vpop.f32.mrb[21].mxu0  ;;  %v6403_v62 = vpop.f32.mrb[21].mxu1 }
 0x13f   : > { %v4849_v56 = vpack.c.bf16 %v6399_v48, %v6395_v30  ;;  %v6405_v17 = vpop.f32.mrb[22].mxu0  ;;  %v4850_v57 = vpack.c.bf16 %v6403_v62, %v6397_v59  ;;  %v6411_v3 = vpop.f32.mrb[22].mxu1 }
 0x140   : > { %v6413_v6 = vpop.f32.mrb[23].mxu0  ;;  %v6422_v10 = vpop.f32.mrb[23].mxu1 }
 0x141   : > { %2259 = vst [vmem:[%s6199_s8 + $0x280] sm:$0xff] %v4849_v56  ;;  %v1492_v0 = vpack.c.bf16 %v6413_v6, %v6399_v48  ;;  %v4857_v58 = vpack.c.bf16 %v6413_v6, %v6405_v17  ;;  %2260 = vst [vmem:[%s6199_s8 + $0x288] sm:$0xff] %v4850_v57  ;;  %v4858_v56 = vpack.c.bf16 %v6422_v10, %v6411_v3  ;;  %v5512_v57 = vld [vmem:[#allocation2 + $0x108] sm:$0xff]  }
 0x142   : > { %3364 = vmatmul.mubr.bf16.vlgmr.msra.gmra.mrb[128].mxu0 %v1411_v1 }
 0x143   : > { %2267 = vst [vmem:[%s6199_s8 + $0x2c0] sm:$0xff] %v4857_v58  ;;  %3461 = vmatmul.mubr.bf16.vlgmr.msra.gmra.mrb[128].mxu1 %v1413_v5  ;;  %3371 = vmatprep.mubr.bf16.mxu0 %v1428_v29  ;;  %2268 = vst [vmem:[%s6199_s8 + $0x2c8] sm:$0xff] %v4858_v56  ;;  %v5518_v56 = vld [vmem:[#allocation2 + $0x190] sm:$0xff]   ;;  %v5519_v29 = vld [vmem:[#allocation2 + $0x158] sm:$0xff]  }
 0x144   : > { %3468 = vmatprep.mubr.bf16.mxu1 %v1430_v32  ;;  %5028 = vmatpush3.bf16.msra.mxu0 %v5508_v8  ;;  %v5521_v58 = vld [vmem:[#allocation2 + $0x1d8] sm:$0xff]  }
 0x145   : > { %v6443_v16 = vpop.f32.mrb[24].mxu0  ;;  %5092 = vmatpush3.bf16.msra.mxu1 %v5510_v60  ;;  %5029 = vmatprep.subr.bf16.mxu0 %v5511_v4  ;;  %v6445_v55 = vpop.f32.mrb[24].mxu1  ;;  %v5516_v4 = vld [vmem:[#allocation2 + $0x110] sm:$0xff]  }
 0x146   : > { %v6447_v1 = vpop.f32.mrb[25].mxu0  ;;  %5093 = vmatprep.subr.bf16.mxu1 %v5513_v11  ;;  %v6451_v19 = vpop.f32.mrb[25].mxu1 }
 0x147   : > { %v4865_v5 = vpack.c.bf16 %v6447_v1, %v6443_v16  ;;  %v6453_v21 = vpop.f32.mrb[26].mxu0  ;;  %v4866_v27 = vpack.c.bf16 %v6451_v19, %v6445_v55  ;;  %v6459_v31 = vpop.f32.mrb[26].mxu1 }
 0x148   : > { %v6461_v32 = vpop.f32.mrb[27].mxu0  ;;  %5030 = vmatpush3.bf16.msra.mxu0 %v5512_v57  ;;  %v6470_v11 = vpop.f32.mrb[27].mxu1 }
 0x149   : > { %2275 = vst [vmem:[%s6199_s8 + $0x300] sm:$0xff] %v4865_v5  ;;  %v1508_v60 = vpack.c.bf16 %v6461_v32, %v6447_v1  ;;  %v4873_v8 = vpack.c.bf16 %v6461_v32, %v6453_v21  ;;  %5094 = vmatpush3.bf16.msra.mxu1 %v5514_v51  ;;  %5031 = vmatprep.subr.bf16.mxu0 %v5515_v61  ;;  %2276 = vst [vmem:[%s6199_s8 + $0x308] sm:$0xff] %v4866_v27  ;;  %v5520_v51 = vld [vmem:[#allocation2 + $0x118] sm:$0xff]  }
 0x14a   : > { %v1510_v57 = vpack.c.bf16 %v6470_v11, %v6451_v19  ;;  %v4874_v5 = vpack.c.bf16 %v6470_v11, %v6459_v31  ;;  %3372 = vmatmul.mubr.bf16.gmra.mrb[132].mxu0 %v1427_v24  ;;  %5095 = vmatprep.subr.bf16.mxu1 %v5517_v2  ;;  %v5523_v24 = vld [vmem:[#allocation2 + $0x160] sm:$0xff]  }
 0x14b   : > { %2283 = vst [vmem:[%s6199_s8 + $0x340] sm:$0xff] %v4873_v8  ;;  %3469 = vmatmul.mubr.bf16.gmra.mrb[132].mxu1 %v1429_v28  ;;  %3379 = vmatprep.mubr.bf16.mxu0 %v1444_v43  ;;  %v5525_v28 = vld [vmem:[#allocation2 + $0x1e0] sm:$0xff]  }
 0x14c   : > { %2284 = vst [vmem:[%s6199_s8 + $0x348] sm:$0xff] %v4874_v5  ;;  %3476 = vmatprep.mubr.bf16.mxu1 %v1446_v46  ;;  %5032 = vmatpush3.bf16.msra.mxu0 %v5516_v4  ;;  %v5524_v2 = vld [vmem:[#allocation2 + $0x120] sm:$0xff]  }
 0x14d   : > { %v6491_v15 = vpop.f32.mrb[28].mxu0  ;;  %5096 = vmatpush3.bf16.msra.mxu1 %v5518_v56  ;;  %5033 = vmatprep.subr.bf16.mxu0 %v5519_v29  ;;  %v6493_v18 = vpop.f32.mrb[28].mxu1  ;;  %v5526_v8 = vld [vmem:[#allocation2 + $0x1a0] sm:$0xff]   ;;  %v5527_v56 = vld [vmem:[#allocation2 + $0x168] sm:$0xff]  }
 0x14e   : > { %v6495_v26 = vpop.f32.mrb[29].mxu0  ;;  %5097 = vmatprep.subr.bf16.mxu1 %v5521_v58  ;;  %v6499_v38 = vpop.f32.mrb[29].mxu1 }
 0x14f   : > { %v4881_v36 = vpack.c.bf16 %v6495_v26, %v6491_v15  ;;  %v6501_v41 = vpop.f32.mrb[30].mxu0  ;;  %v4882_v43 = vpack.c.bf16 %v6499_v38, %v6493_v18  ;;  %v6507_v46 = vpop.f32.mrb[30].mxu1 }
 0x150   : > { %v1523_v44 = vpack.c.bf16 %v6501_v41, %v6491_v15  ;;  %v6509_v61 = vpop.f32.mrb[31].mxu0  ;;  %5034 = vmatpush3.bf16.msra.mxu0 %v5520_v51  ;;  %v1525_v27 = vpack.c.bf16 %v6507_v46, %v6493_v18  ;;  %v6518_v58 = vpop.f32.mrb[31].mxu1 }
 0x151   : > { %2291 = vst [vmem:[%s6199_s8 + $0x380] sm:$0xff] %v4881_v36  ;;  %v1524_v29 = vpack.c.bf16 %v6509_v61, %v6495_v26  ;;  %v4889_v4 = vpack.c.bf16 %v6509_v61, %v6501_v41  ;;  %5098 = vmatpush3.bf16.msra.mxu1 %v5522_v22  ;;  %5035 = vmatprep.subr.bf16.mxu0 %v5523_v24  ;;  %2292 = vst [vmem:[%s6199_s8 + $0x388] sm:$0xff] %v4882_v43  ;;  %v5529_v36 = vld [vmem:[#allocation2 + $0x1e8] sm:$0xff]  }
 0x152   : > { %v1526_v5 = vpack.c.bf16 %v6518_v58, %v6499_v38  ;;  %v4890_v51 = vpack.c.bf16 %v6518_v58, %v6507_v46  ;;  %3380 = vmatmul.mubr.bf16.gmra.mrb[136].mxu0 %v1443_v39  ;;  %5099 = vmatprep.subr.bf16.mxu1 %v5525_v28  ;;  %v8107_v22 = vpack.c.bf16 %v6334_v14, %v6315_v47  ;;  %v5528_v24 = vld [vmem:[#allocation2 + $0x128] sm:$0xff]   ;;  %v5531_v39 = vld [vmem:[#allocation2 + $0x170] sm:$0xff]   ;;  %v5537_v14 = vld [vmem:[#allocation2 + $0x1f8] sm:$0xff]  }
 0x153   : > { %2299 = vst [vmem:[%s6199_s8 + $0x3c0] sm:$0xff] %v4889_v4  ;;  %3477 = vmatmul.mubr.bf16.gmra.mrb[136].mxu1 %v1445_v42  ;;  %3387 = vmatprep.mubr.bf16.mxu0 %v1460_v12  ;;  %v5533_v42 = vld [vmem:[#allocation2 + $0x1f0] sm:$0xff]   ;;  %v8108_v4 = vpack.c.bf16 %v6317_v63, %v6307_v49  ;;  %v5538_v63 = vld [vmem:[#allocation2 + $0x1b8] sm:$0xff]  }
 0x154   : > { %2300 = vst [vmem:[%s6199_s8 + $0x3c8] sm:$0xff] %v4890_v51  ;;  %3484 = vmatprep.mubr.bf16.mxu1 %v8107_v22  ;;  %5036 = vmatpush3.bf16.msra.mxu0 %v5524_v2  ;;  %v5532_v2 = vld [vmem:[#allocation2 + $0x130] sm:$0xff]   ;;  %v5535_v22 = vld [vmem:[#allocation2 + $0x178] sm:$0xff]  }
 0x155   : > { %v6539_v34 = vpop.f32.mrb[32].mxu0  ;;  %5100 = vmatpush3.bf16.msra.mxu1 %v5526_v8  ;;  %5037 = vmatprep.subr.bf16.mxu0 %v5527_v56  ;;  %v6541_v35 = vpop.f32.mrb[32].mxu1 }
 0x156   : > { %v6543_v40 = vpop.f32.mrb[33].mxu0  ;;  %5101 = vmatprep.subr.bf16.mxu1 %v5529_v36  ;;  %v6547_v47 = vpop.f32.mrb[33].mxu1  ;;  %v5534_v36 = vld [vmem:[#allocation2 + $0x1b0] sm:$0xff]  }
 0x157   : > { %v4771_v54 = vpack.c.bf16 %v6543_v40, %v6539_v34  ;;  %v6549_v9 = vpop.f32.mrb[34].mxu0  ;;  %v4772_v12 = vpack.c.bf16 %v6547_v47, %v6541_v35  ;;  %v6555_v28 = vpop.f32.mrb[34].mxu1 }
 0x158   : > { %v6557_v43 = vpop.f32.mrb[35].mxu0  ;;  %5038 = vmatpush3.bf16.msra.mxu0 %v5528_v24  ;;  %v6566_v51 = vpop.f32.mrb[35].mxu1  ;;  %v5536_v24 = vld [vmem:[#allocation2 + $0x138] sm:$0xff]  }
 0x159   : > { %2181 = vst [vmem:[%s6199_s8 + $0x10] sm:$0xff] %v4771_v54  ;;  %v1416_v8 = vpack.c.bf16 %v6557_v43, %v6543_v40  ;;  %v4779_v56 = vpack.c.bf16 %v6557_v43, %v6549_v9  ;;  %5102 = vmatpush3.bf16.msra.mxu1 %v5530_v25  ;;  %5039 = vmatprep.subr.bf16.mxu0 %v5531_v39  ;;  %2182 = vst [vmem:[%s6199_s8 + $0x18] sm:$0xff] %v4772_v12  ;;  %v5540_v43 = vld [vmem:[#allocation2 + $0x200] sm:$0xff]  }
 0x15a   : > { %v4780_v54 = vpack.c.bf16 %v6566_v51, %v6555_v28  ;;  %3388 = vmatmul.mubr.bf16.gmra.mrb[140].mxu0 %v8108_v4  ;;  %5103 = vmatprep.subr.bf16.mxu1 %v5533_v42  ;;  %v8109_v25 = vpack.c.bf16 %v6323_v7, %v6309_v52  ;;  %v8110_v39 = vpack.c.bf16 %v6367_v45, %v6353_v23  ;;  %v5539_v42 = vld [vmem:[#allocation2 + $0x240] sm:$0xff]  }
 0x15b   : > { %2189 = vst [vmem:[%s6199_s8 + $0x50] sm:$0xff] %v4779_v56  ;;  %v8111_v12 = vpack.c.bf16 %v6376_v13, %v6357_v33  ;;  %v5541_v23 = vld [vmem:[#allocation2 + $0x2c0] sm:$0xff]  }
 0x15c   : > { %3485 = vmatmul.mubr.bf16.gmra.mrb[140].mxu1 %v8109_v25  ;;  %3395 = vmatprep.mubr.bf16.mxu0 %v8110_v39  ;;  %2190 = vst [vmem:[%s6199_s8 + $0x58] sm:$0xff] %v4780_v54 }
 0x15d   : > { %3492 = vmatprep.mubr.bf16.mxu1 %v8111_v12  ;;  %5040 = vmatpush3.bf16.msra.mxu0 %v5532_v2  ;;  %v6587_v49 = vpop.f32.mrb[36].mxu0  ;;  %v6589_v52 = vpop.f32.mrb[36].mxu1  ;;  %v8112_v12 = vpack.c.bf16 %v6359_v37, %v6349_v50 }
 0x15e   : > { %5104 = vmatpush3.bf16.msra.mxu1 %v5534_v36  ;;  %5041 = vmatprep.subr.bf16.mxu0 %v5535_v22  ;;  %v6591_v7 = vpop.f32.mrb[37].mxu0  ;;  %v6595_v45 = vpop.f32.mrb[37].mxu1 }
 0x15f   : > { %5105 = vmatprep.subr.bf16.mxu1 %v5537_v14  ;;  %v4787_v33 = vpack.c.bf16 %v6591_v7, %v6587_v49  ;;  %v6597_v13 = vpop.f32.mrb[38].mxu0  ;;  %v4788_v2 = vpack.c.bf16 %v6595_v45, %v6589_v52  ;;  %v6603_v56 = vpop.f32.mrb[38].mxu1 }
 0x160   : > { %v1431_v4 = vpack.c.bf16 %v6597_v13, %v6587_v49  ;;  %v6605_v36 = vpop.f32.mrb[39].mxu0  ;;  %v1433_v14 = vpack.c.bf16 %v6603_v56, %v6589_v52  ;;  %v6614_v25 = vpop.f32.mrb[39].mxu1 }
 0x161   : > { %5042 = vmatpush3.bf16.msra.mxu0 %v5536_v24  ;;  %2197 = vst [vmem:[%s6199_s8 + $0x90] sm:$0xff] %v4787_v33  ;;  %v1432_v22 = vpack.c.bf16 %v6605_v36, %v6591_v7  ;;  %v4795_v54 = vpack.c.bf16 %v6605_v36, %v6597_v13  ;;  %2198 = vst [vmem:[%s6199_s8 + $0x98] sm:$0xff] %v4788_v2  ;;  %v1434_v39 = vpack.c.bf16 %v6614_v25, %v6595_v45  ;;  %v5549_v7 = vld [vmem:[#allocation2 + $0x2d0] sm:$0xff]   ;;  %v5554_v13 = vld [vmem:[#allocation2 + $0x298] sm:$0xff]  }
 0x162   : > { %5106 = vmatpush3.bf16.msra.mxu1 %v5538_v63  ;;  %5155 = vmatprep.subr.bf16.mxu0 %v5539_v42  ;;  %v4796_v24 = vpack.c.bf16 %v6614_v25, %v6603_v56  ;;  %v8113_v33 = vpack.c.bf16 %v6365_v53, %v6351_v20  ;;  %v8114_v63 = vpack.c.bf16 %v6422_v10, %v6403_v62 }
 0x163   : > { %3396 = vmatmul.mubr.bf16.gmra.mrb[144].mxu0 %v8112_v12  ;;  %5219 = vmatprep.subr.bf16.mxu1 %v5541_v23  ;;  %2205 = vst [vmem:[%s6199_s8 + $0xd0] sm:$0xff] %v4795_v54 }
 0x164   : > { %3493 = vmatmul.mubr.bf16.gmra.mrb[144].mxu1 %v8113_v33  ;;  %3403 = vmatprep.mubr.bf16.mxu0 %v1492_v0  ;;  %2206 = vst [vmem:[%s6199_s8 + $0xd8] sm:$0xff] %v4796_v24 }
 0x165   : > { %3500 = vmatprep.mubr.bf16.mxu1 %v8114_v63  ;;  %v6635_v42 = vpop.f32.mrb[40].mxu0  ;;  %v6637_v50 = vpop.f32.mrb[40].mxu1  ;;  %v8115_v63 = vpack.c.bf16 %v6405_v17, %v6395_v30 }
 0x166   : > { %v6639_v37 = vpop.f32.mrb[41].mxu0  ;;  %v6643_v53 = vpop.f32.mrb[41].mxu1 }
 0x167   : > { %v4803_v20 = vpack.c.bf16 %v6639_v37, %v6635_v42  ;;  %v6645_v48 = vpop.f32.mrb[42].mxu0  ;;  %v4804_v6 = vpack.c.bf16 %v6643_v53, %v6637_v50  ;;  %v6651_v62 = vpop.f32.mrb[42].mxu1 }
 0x168   : > { %v1447_v10 = vpack.c.bf16 %v6645_v48, %v6635_v42  ;;  %v6653_v0 = vpop.f32.mrb[43].mxu0  ;;  %v1449_v23 = vpack.c.bf16 %v6651_v62, %v6637_v50  ;;  %v6662_v24 = vpop.f32.mrb[43].mxu1 }
 0x169   : > { %2213 = vst [vmem:[%s6199_s8 + $0x110] sm:$0xff] %v4803_v20  ;;  %v1448_v2 = vpack.c.bf16 %v6653_v0, %v6639_v37  ;;  %v4811_v54 = vpack.c.bf16 %v6653_v0, %v6645_v48  ;;  %2214 = vst [vmem:[%s6199_s8 + $0x118] sm:$0xff] %v4804_v6  ;;  %v1450_v12 = vpack.c.bf16 %v6662_v24, %v6643_v53  ;;  %v5562_v48 = vld [vmem:[#allocation2 + $0x2a8] sm:$0xff]  }
 0x16a   : > { %v4812_v33 = vpack.c.bf16 %v6662_v24, %v6651_v62  ;;  %v8116_v20 = vpack.c.bf16 %v6411_v3, %v6397_v59 }
 0x16b   : > { %3404 = vmatmul.mubr.bf16.gmra.mrb[148].mxu0 %v8115_v63  ;;  %2221 = vst [vmem:[%s6199_s8 + $0x150] sm:$0xff] %v4811_v54 }
 0x16c   : > { %3501 = vmatmul.mubr.bf16.gmra.mrb[148].mxu1 %v8116_v20  ;;  %3411 = vmatprep.mubr.bf16.mxu0 %v1508_v60  ;;  %2222 = vst [vmem:[%s6199_s8 + $0x158] sm:$0xff] %v4812_v33 }
 0x16d   : > { %3508 = vmatprep.mubr.bf16.mxu1 %v1510_v57  ;;  %v6683_v6 = vpop.f32.mrb[44].mxu0  ;;  %v6685_v17 = vpop.f32.mrb[44].mxu1  ;;  %v8118_v57 = vpack.c.bf16 %v6459_v31, %v6445_v55 }
 0x16e   : > { %v6687_v30 = vpop.f32.mrb[45].mxu0  ;;  %v6691_v3 = vpop.f32.mrb[45].mxu1 }
 0x16f   : > { %v4819_v59 = vpack.c.bf16 %v6687_v30, %v6683_v6  ;;  %v6693_v1 = vpop.f32.mrb[46].mxu0  ;;  %v4820_v32 = vpack.c.bf16 %v6691_v3, %v6685_v17  ;;  %v6699_v60 = vpop.f32.mrb[46].mxu1 }
 0x170   : > { %v6701_v11 = vpop.f32.mrb[47].mxu0  ;;  %v6710_v63 = vpop.f32.mrb[47].mxu1 }
 0x171   : > { %2229 = vst [vmem:[%s6199_s8 + $0x190] sm:$0xff] %v4819_v59  ;;  %v1464_v54 = vpack.c.bf16 %v6701_v11, %v6687_v30  ;;  %v4827_v33 = vpack.c.bf16 %v6701_v11, %v6693_v1  ;;  %2230 = vst [vmem:[%s6199_s8 + $0x198] sm:$0xff] %v4820_v32  ;;  %v1466_v20 = vpack.c.bf16 %v6710_v63, %v6691_v3 }
 0x172   : > { %v4828_v19 = vpack.c.bf16 %v6710_v63, %v6699_v60  ;;  %v8117_v59 = vpack.c.bf16 %v6453_v21, %v6443_v16  ;;  %v5568_v63 = vld [vmem:[#allocation2 + $0x238] sm:$0xff]  }
 0x173   : > { %2237 = vst [vmem:[%s6199_s8 + $0x1d0] sm:$0xff] %v4827_v33 }
 0x174   : > { %3412 = vmatmul.mubr.bf16.gmra.mrb[152].mxu0 %v8117_v59  ;;  %3509 = vmatmul.mubr.bf16.gmra.mrb[152].mxu1 %v8118_v57  ;;  %2238 = vst [vmem:[%s6199_s8 + $0x1d8] sm:$0xff] %v4828_v19  ;;  %v5545_v19 = vld [vmem:[#allocation2 + $0x2c8] sm:$0xff]  }
 0x175   : > { %3419 = vmatprep.mubr.bf16.mxu0 %v1524_v29  ;;  %3516 = vmatprep.mubr.bf16.mxu1 %v1526_v5  ;;  %v6731_v32 = vpop.f32.mrb[48].mxu0  ;;  %v6733_v16 = vpop.f32.mrb[48].mxu1 }
 0x176   : > { %v6735_v21 = vpop.f32.mrb[49].mxu0  ;;  %v6739_v31 = vpop.f32.mrb[49].mxu1 }
 0x177   : > { %v4835_v55 = vpack.c.bf16 %v6735_v21, %v6731_v32  ;;  %v6741_v26 = vpop.f32.mrb[50].mxu0  ;;  %v4836_v61 = vpack.c.bf16 %v6739_v31, %v6733_v16  ;;  %v6747_v29 = vpop.f32.mrb[50].mxu1 }
 0x178   : > { %v6749_v58 = vpop.f32.mrb[51].mxu0  ;;  %v6758_v33 = vpop.f32.mrb[51].mxu1 }
 0x179   : > { %2245 = vst [vmem:[%s6199_s8 + $0x210] sm:$0xff] %v4835_v55  ;;  %v4843_v57 = vpack.c.bf16 %v6749_v58, %v6741_v26  ;;  %2246 = vst [vmem:[%s6199_s8 + $0x218] sm:$0xff] %v4836_v61  ;;  %v4844_v38 = vpack.c.bf16 %v6758_v33, %v6747_v29  ;;  %v8119_v55 = vpack.c.bf16 %v6566_v51, %v6547_v47 }
 0x17a   : > { %v8121_v51 = vpack.c.bf16 %v6555_v28, %v6541_v35 }
 0x17b   : > { %2253 = vst [vmem:[%s6199_s8 + $0x250] sm:$0xff] %v4843_v57  ;;  %2254 = vst [vmem:[%s6199_s8 + $0x258] sm:$0xff] %v4844_v38 }
 0x17c   : > { %3420 = vmatmul.mubr.bf16.gmra.mrb[156].mxu0 %v1523_v44  ;;  %3517 = vmatmul.mubr.bf16.gmra.mrb[156].mxu1 %v1525_v27  ;;  %v5543_v27 = vld [vmem:[#allocation2 + $0x248] sm:$0xff]  }
 0x17d   : > { %3557 = vmatprep.mubr.bf16.mxu0 %v1416_v8  ;;  %3654 = vmatprep.mubr.bf16.mxu1 %v8119_v55  ;;  %v6779_v61 = vpop.f32.mrb[52].mxu0  ;;  %v6781_v5 = vpop.f32.mrb[52].mxu1  ;;  %v5542_v55 = vld [vmem:[#allocation2 + $0x280] sm:$0xff]   ;;  %v8120_v8 = vpack.c.bf16 %v6549_v9, %v6539_v34  ;;  %v5546_v34 = vld [vmem:[#allocation2 + $0x288] sm:$0xff]   ;;  %v5547_v9 = vld [vmem:[#allocation2 + $0x250] sm:$0xff]  }
 0x17e   : > { %v6783_v15 = vpop.f32.mrb[53].mxu0  ;;  %v6787_v41 = vpop.f32.mrb[53].mxu1 }
 0x17f   : > { %v4851_v18 = vpack.c.bf16 %v6783_v15, %v6779_v61  ;;  %v6789_v44 = vpop.f32.mrb[54].mxu0  ;;  %v4852_v46 = vpack.c.bf16 %v6787_v41, %v6781_v5  ;;  %v6795_v40 = vpop.f32.mrb[54].mxu1 }
 0x180   : > { %v6797_v47 = vpop.f32.mrb[55].mxu0  ;;  %v6806_v57 = vpop.f32.mrb[55].mxu1 }
 0x181   : > { %2261 = vst [vmem:[%s6199_s8 + $0x290] sm:$0xff] %v4851_v18  ;;  %v4859_v38 = vpack.c.bf16 %v6797_v47, %v6789_v44  ;;  %2262 = vst [vmem:[%s6199_s8 + $0x298] sm:$0xff] %v4852_v46  ;;  %v4860_v18 = vpack.c.bf16 %v6806_v57, %v6795_v40  ;;  %v5544_v46 = vld [vmem:[#allocation2 + $0x208] sm:$0xff]  }
 0x183   : > { %2269 = vst [vmem:[%s6199_s8 + $0x2d0] sm:$0xff] %v4859_v38  ;;  %2270 = vst [vmem:[%s6199_s8 + $0x2d8] sm:$0xff] %v4860_v18  ;;  %v5550_v18 = vld [vmem:[#allocation2 + $0x290] sm:$0xff]  }
 0x184   : > { %3558 = vmatmul.mubr.bf16.vlgmr.msra.gmra.mrb[160].mxu0 %v8120_v8  ;;  %3655 = vmatmul.mubr.bf16.vlgmr.msra.gmra.mrb[160].mxu1 %v8121_v51  ;;  %v5553_v8 = vld [vmem:[#allocation2 + $0x2d8] sm:$0xff]  }
 0x185   : > { %3565 = vmatprep.mubr.bf16.mxu0 %v1432_v22  ;;  %3662 = vmatprep.mubr.bf16.mxu1 %v1434_v39  ;;  %v6827_v59 = vpop.f32.mrb[56].mxu0  ;;  %v6829_v35 = vpop.f32.mrb[56].mxu1  ;;  %v5551_v39 = vld [vmem:[#allocation2 + $0x258] sm:$0xff]  }
 0x186   : > { %5156 = vmatpush3.bf16.msra.mxu0 %v5540_v43  ;;  %5220 = vmatpush3.bf16.msra.mxu1 %v5542_v55  ;;  %v6831_v28 = vpop.f32.mrb[57].mxu0  ;;  %v6835_v45 = vpop.f32.mrb[57].mxu1 }
 0x187   : > { %5157 = vmatprep.subr.bf16.mxu0 %v5543_v27  ;;  %5221 = vmatprep.subr.bf16.mxu1 %v5545_v19  ;;  %v4867_v36 = vpack.c.bf16 %v6831_v28, %v6827_v59  ;;  %v6837_v22 = vpop.f32.mrb[58].mxu0  ;;  %v4868_v25 = vpack.c.bf16 %v6835_v45, %v6829_v35  ;;  %v6843_v27 = vpop.f32.mrb[58].mxu1  ;;  %v5548_v19 = vld [vmem:[#allocation2 + $0x210] sm:$0xff]  }
 0x188   : > { %v6845_v43 = vpop.f32.mrb[59].mxu0  ;;  %v6854_v55 = vpop.f32.mrb[59].mxu1 }
 0x189   : > { %2277 = vst [vmem:[%s6199_s8 + $0x310] sm:$0xff] %v4867_v36  ;;  %v1512_v51 = vpack.c.bf16 %v6845_v43, %v6831_v28  ;;  %v4875_v38 = vpack.c.bf16 %v6845_v43, %v6837_v22  ;;  %2278 = vst [vmem:[%s6199_s8 + $0x318] sm:$0xff] %v4868_v25  ;;  %v4876_v36 = vpack.c.bf16 %v6854_v55, %v6843_v27 }
 0x18a   : > { %5158 = vmatpush3.bf16.msra.mxu0 %v5544_v46  ;;  %5222 = vmatpush3.bf16.msra.mxu1 %v5546_v34  ;;  %v1514_v46 = vpack.c.bf16 %v6854_v55, %v6835_v45  ;;  %v5552_v34 = vld [vmem:[#allocation2 + $0x218] sm:$0xff]  }
 0x18b   : > { %5159 = vmatprep.subr.bf16.mxu0 %v5547_v9  ;;  %5223 = vmatprep.subr.bf16.mxu1 %v5549_v7  ;;  %2285 = vst [vmem:[%s6199_s8 + $0x350] sm:$0xff] %v4875_v38  ;;  %2286 = vst [vmem:[%s6199_s8 + $0x358] sm:$0xff] %v4876_v36  ;;  %v5556_v7 = vld [vmem:[#allocation2 + $0x220] sm:$0xff]  }
 0x18c   : > { %3566 = vmatmul.mubr.bf16.gmra.mrb[164].mxu0 %v1431_v4  ;;  %3663 = vmatmul.mubr.bf16.gmra.mrb[164].mxu1 %v1433_v14  ;;  %v5555_v4 = vld [vmem:[#allocation2 + $0x260] sm:$0xff]  }
 0x18d   : > { %3573 = vmatprep.mubr.bf16.mxu0 %v1448_v2  ;;  %3670 = vmatprep.mubr.bf16.mxu1 %v1450_v12  ;;  %v6875_v49 = vpop.f32.mrb[60].mxu0  ;;  %v6877_v52 = vpop.f32.mrb[60].mxu1  ;;  %v5557_v14 = vld [vmem:[#allocation2 + $0x2e0] sm:$0xff]  }
 0x18e   : > { %5160 = vmatpush3.bf16.msra.mxu0 %v5548_v19  ;;  %5224 = vmatpush3.bf16.msra.mxu1 %v5550_v18  ;;  %v6879_v56 = vpop.f32.mrb[61].mxu0  ;;  %v6883_v53 = vpop.f32.mrb[61].mxu1  ;;  %v5558_v38 = vld [vmem:[#allocation2 + $0x2a0] sm:$0xff]   ;;  %v5559_v18 = vld [vmem:[#allocation2 + $0x268] sm:$0xff]  }
 0x18f   : > { %5161 = vmatprep.subr.bf16.mxu0 %v5551_v39  ;;  %5225 = vmatprep.subr.bf16.mxu1 %v5553_v8  ;;  %v4883_v37 = vpack.c.bf16 %v6879_v56, %v6875_v49  ;;  %v6885_v0 = vpop.f32.mrb[62].mxu0  ;;  %v4884_v2 = vpack.c.bf16 %v6883_v53, %v6877_v52  ;;  %v6891_v12 = vpop.f32.mrb[62].mxu1 }
 0x190   : > { %v1527_v24 = vpack.c.bf16 %v6885_v0, %v6875_v49  ;;  %v6893_v9 = vpop.f32.mrb[63].mxu0  ;;  %v1529_v25 = vpack.c.bf16 %v6891_v12, %v6877_v52  ;;  %v6902_v8 = vpop.f32.mrb[63].mxu1 }
 0x191   : > { %2293 = vst [vmem:[%s6199_s8 + $0x390] sm:$0xff] %v4883_v37  ;;  %v1528_v39 = vpack.c.bf16 %v6893_v9, %v6879_v56  ;;  %v4891_v19 = vpack.c.bf16 %v6893_v9, %v6885_v0  ;;  %2294 = vst [vmem:[%s6199_s8 + $0x398] sm:$0xff] %v4884_v2  ;;  %v1530_v36 = vpack.c.bf16 %v6902_v8, %v6883_v53  ;;  %v5561_v37 = vld [vmem:[#allocation2 + $0x2e8] sm:$0xff]   ;;  %v5569_v2 = vld [vmem:[#allocation2 + $0x2f8] sm:$0xff]  }
 0x192   : > { %5162 = vmatpush3.bf16.msra.mxu0 %v5552_v34  ;;  %5226 = vmatpush3.bf16.msra.mxu1 %v5554_v13  ;;  %v4892_v34 = vpack.c.bf16 %v6902_v8, %v6891_v12  ;;  %v5560_v13 = vld [vmem:[#allocation2 + $0x228] sm:$0xff]  }
 0x193   : > { %5163 = vmatprep.subr.bf16.mxu0 %v5555_v4  ;;  %5227 = vmatprep.subr.bf16.mxu1 %v5557_v14  ;;  %2301 = vst [vmem:[%s6199_s8 + $0x3d0] sm:$0xff] %v4891_v19  ;;  %v5564_v14 = vld [vmem:[#allocation2 + $0x230] sm:$0xff]  }
 0x194   : > { %3574 = vmatmul.mubr.bf16.gmra.mrb[168].mxu0 %v1447_v10  ;;  %3671 = vmatmul.mubr.bf16.gmra.mrb[168].mxu1 %v1449_v23  ;;  %2302 = vst [vmem:[%s6199_s8 + $0x3d8] sm:$0xff] %v4892_v34  ;;  %v5563_v10 = vld [vmem:[#allocation2 + $0x270] sm:$0xff]   ;;  %v5567_v34 = vld [vmem:[#allocation2 + $0x278] sm:$0xff]  }
 0x195   : > { %3581 = vmatprep.mubr.bf16.mxu0 %v1464_v54  ;;  %3678 = vmatprep.mubr.bf16.mxu1 %v1466_v20  ;;  %v6923_v42 = vpop.f32.mrb[64].mxu0  ;;  %v6925_v50 = vpop.f32.mrb[64].mxu1  ;;  %v5565_v23 = vld [vmem:[#allocation2 + $0x2f0] sm:$0xff]  }
 0x196   : > { %5164 = vmatpush3.bf16.msra.mxu0 %v5556_v7  ;;  %5228 = vmatpush3.bf16.msra.mxu1 %v5558_v38  ;;  %v6927_v62 = vpop.f32.mrb[65].mxu0  ;;  %v6931_v3 = vpop.f32.mrb[65].mxu1 }
 0x197   : > { %5165 = vmatprep.subr.bf16.mxu0 %v5559_v18  ;;  %5229 = vmatprep.subr.bf16.mxu1 %v5561_v37  ;;  %v4773_v30 = vpack.c.bf16 %v6927_v62, %v6923_v42  ;;  %v6933_v11 = vpop.f32.mrb[66].mxu0  ;;  %v4774_v54 = vpack.c.bf16 %v6931_v3, %v6925_v50  ;;  %v6939_v20 = vpop.f32.mrb[66].mxu1  ;;  %v5566_v18 = vld [vmem:[#allocation2 + $0x2b0] sm:$0xff]  }
 0x198   : > { %v6941_v4 = vpop.f32.mrb[67].mxu0  ;;  %v6950_v38 = vpop.f32.mrb[67].mxu1 }
 0x199   : > { %2183 = vst [vmem:[%s6199_s8 + $0x20] sm:$0xff] %v4773_v30  ;;  %v1420_v7 = vpack.c.bf16 %v6941_v4, %v6927_v62  ;;  %v4781_v19 = vpack.c.bf16 %v6941_v4, %v6933_v11  ;;  %2184 = vst [vmem:[%s6199_s8 + $0x28] sm:$0xff] %v4774_v54  ;;  %v1422_v37 = vpack.c.bf16 %v6950_v38, %v6931_v3  ;;  %v5572_v4 = vld [vmem:[#allocation2 + $0x300] sm:$0xff]  }
 0x19a   : > { %5166 = vmatpush3.bf16.msra.mxu0 %v5560_v13  ;;  %5230 = vmatpush3.bf16.msra.mxu1 %v5562_v48  ;;  %v4782_v13 = vpack.c.bf16 %v6950_v38, %v6939_v20  ;;  %v8122_v30 = vpack.c.bf16 %v6693_v1, %v6683_v6  ;;  %v8123_v48 = vpack.c.bf16 %v6699_v60, %v6685_v17  ;;  %v5570_v1 = vld [vmem:[#allocation2 + $0x2b8] sm:$0xff]  }
 0x19b   : > { %5167 = vmatprep.subr.bf16.mxu0 %v5563_v10  ;;  %5231 = vmatprep.subr.bf16.mxu1 %v5565_v23  ;;  %2191 = vst [vmem:[%s6199_s8 + $0x60] sm:$0xff] %v4781_v19  ;;  %v8124_v10 = vpack.c.bf16 %v6749_v58, %v6735_v21  ;;  %v8125_v54 = vpack.c.bf16 %v6758_v33, %v6739_v31  ;;  %v5571_v23 = vld [vmem:[#allocation2 + $0x340] sm:$0xff]  }
 0x19c   : > { %3582 = vmatmul.mubr.bf16.gmra.mrb[172].mxu0 %v8122_v30  ;;  %3679 = vmatmul.mubr.bf16.gmra.mrb[172].mxu1 %v8123_v48  ;;  %2192 = vst [vmem:[%s6199_s8 + $0x68] sm:$0xff] %v4782_v13  ;;  %v5573_v21 = vld [vmem:[#allocation2 + $0x3c0] sm:$0xff]   ;;  %v8135_v38 = vpack.c.bf16 %v6939_v20, %v6925_v50 }
 0x19d   : > { %3589 = vmatprep.mubr.bf16.mxu0 %v8124_v10  ;;  %3686 = vmatprep.mubr.bf16.mxu1 %v8125_v54  ;;  %v6971_v6 = vpop.f32.mrb[68].mxu0  ;;  %v6973_v17 = vpop.f32.mrb[68].mxu1  ;;  %v8126_v54 = vpack.c.bf16 %v6741_v26, %v6731_v32 }
 0x19e   : > { %5168 = vmatpush3.bf16.msra.mxu0 %v5564_v14  ;;  %5232 = vmatpush3.bf16.msra.mxu1 %v5566_v18  ;;  %v6975_v60 = vpop.f32.mrb[69].mxu0  ;;  %v6979_v58 = vpop.f32.mrb[69].mxu1 }
 0x19f   : > { %5169 = vmatprep.subr.bf16.mxu0 %v5567_v34  ;;  %5233 = vmatprep.subr.bf16.mxu1 %v5569_v2  ;;  %v4789_v31 = vpack.c.bf16 %v6975_v60, %v6971_v6  ;;  %v6981_v33 = vpop.f32.mrb[70].mxu0  ;;  %v4790_v14 = vpack.c.bf16 %v6979_v58, %v6973_v17  ;;  %v6987_v18 = vpop.f32.mrb[70].mxu1 }
 0x1a0   : > { %v1435_v19 = vpack.c.bf16 %v6981_v33, %v6971_v6  ;;  %v6989_v34 = vpop.f32.mrb[71].mxu0  ;;  %v1437_v2 = vpack.c.bf16 %v6987_v18, %v6973_v17  ;;  %v6998_v48 = vpop.f32.mrb[71].mxu1 }
 0x1a1   : > { %2199 = vst [vmem:[%s6199_s8 + $0xa0] sm:$0xff] %v4789_v31  ;;  %v1436_v13 = vpack.c.bf16 %v6989_v34, %v6975_v60  ;;  %v4797_v30 = vpack.c.bf16 %v6989_v34, %v6981_v33  ;;  %2200 = vst [vmem:[%s6199_s8 + $0xa8] sm:$0xff] %v4790_v14  ;;  %v1438_v10 = vpack.c.bf16 %v6998_v48, %v6979_v58  ;;  %v5581_v60 = vld [vmem:[#allocation2 + $0x3d0] sm:$0xff]   ;;  %v5586_v33 = vld [vmem:[#allocation2 + $0x398] sm:$0xff]  }
 0x1a2   : > { %5170 = vmatpush3.bf16.msra.mxu0 %v5568_v63  ;;  %5234 = vmatpush3.bf16.msra.mxu1 %v5570_v1  ;;  %v4798_v63 = vpack.c.bf16 %v6998_v48, %v6987_v18  ;;  %v8127_v31 = vpack.c.bf16 %v6747_v29, %v6733_v16  ;;  %v8128_v1 = vpack.c.bf16 %v6797_v47, %v6783_v15 }
 0x1a3   : > { %5283 = vmatprep.subr.bf16.mxu0 %v5571_v23  ;;  %5347 = vmatprep.subr.bf16.mxu1 %v5573_v21  ;;  %2207 = vst [vmem:[%s6199_s8 + $0xe0] sm:$0xff] %v4797_v30  ;;  %v8129_v23 = vpack.c.bf16 %v6806_v57, %v6787_v41  ;;  %v8131_v30 = vpack.c.bf16 %v6795_v40, %v6781_v5 }
 0x1a4   : > { %3590 = vmatmul.mubr.bf16.gmra.mrb[176].mxu0 %v8126_v54  ;;  %3687 = vmatmul.mubr.bf16.gmra.mrb[176].mxu1 %v8127_v31  ;;  %2208 = vst [vmem:[%s6199_s8 + $0xe8] sm:$0xff] %v4798_v63 }
 0x1a5   : > { %3597 = vmatprep.mubr.bf16.mxu0 %v8128_v1  ;;  %3694 = vmatprep.mubr.bf16.mxu1 %v8129_v23  ;;  %v7019_v14 = vpop.f32.mrb[72].mxu0  ;;  %v7021_v32 = vpop.f32.mrb[72].mxu1 }
 0x1a6   : > { %v7023_v26 = vpop.f32.mrb[73].mxu0  ;;  %v7027_v29 = vpop.f32.mrb[73].mxu1 }
 0x1a7   : > { %v4805_v16 = vpack.c.bf16 %v7023_v26, %v7019_v14  ;;  %v7029_v15 = vpop.f32.mrb[74].mxu0  ;;  %v4806_v47 = vpack.c.bf16 %v7027_v29, %v7021_v32  ;;  %v7035_v57 = vpop.f32.mrb[74].mxu1 }
 0x1a8   : > { %v1451_v41 = vpack.c.bf16 %v7029_v15, %v7019_v14  ;;  %v7037_v21 = vpop.f32.mrb[75].mxu0  ;;  %v7046_v31 = vpop.f32.mrb[75].mxu1 }
 0x1a9   : > { %2215 = vst [vmem:[%s6199_s8 + $0x120] sm:$0xff] %v4805_v16  ;;  %v1452_v63 = vpack.c.bf16 %v7037_v21, %v7023_v26  ;;  %v4813_v54 = vpack.c.bf16 %v7037_v21, %v7029_v15  ;;  %2216 = vst [vmem:[%s6199_s8 + $0x128] sm:$0xff] %v4806_v47  ;;  %v1454_v1 = vpack.c.bf16 %v7046_v31, %v7027_v29  ;;  %v5594_v15 = vld [vmem:[#allocation2 + $0x3a8] sm:$0xff]  }
 0x1aa   : > { %v4814_v23 = vpack.c.bf16 %v7046_v31, %v7035_v57  ;;  %v8130_v16 = vpack.c.bf16 %v6789_v44, %v6779_v61 }
 0x1ab   : > { %2223 = vst [vmem:[%s6199_s8 + $0x160] sm:$0xff] %v4813_v54 }
 0x1ac   : > { %3598 = vmatmul.mubr.bf16.gmra.mrb[180].mxu0 %v8130_v16  ;;  %3695 = vmatmul.mubr.bf16.gmra.mrb[180].mxu1 %v8131_v30  ;;  %2224 = vst [vmem:[%s6199_s8 + $0x168] sm:$0xff] %v4814_v23 }
 0x1ad   : > { %3605 = vmatprep.mubr.bf16.mxu0 %v1512_v51  ;;  %3702 = vmatprep.mubr.bf16.mxu1 %v1514_v46  ;;  %v7067_v47 = vpop.f32.mrb[76].mxu0  ;;  %v7069_v61 = vpop.f32.mrb[76].mxu1  ;;  %v8133_v46 = vpack.c.bf16 %v6843_v27, %v6829_v35 }
 0x1ae   : > { %v7071_v44 = vpop.f32.mrb[77].mxu0  ;;  %v7075_v40 = vpop.f32.mrb[77].mxu1 }
 0x1af   : > { %v4821_v5 = vpack.c.bf16 %v7071_v44, %v7067_v47  ;;  %v7077_v28 = vpop.f32.mrb[78].mxu0  ;;  %v4822_v43 = vpack.c.bf16 %v7075_v40, %v7069_v61  ;;  %v7083_v51 = vpop.f32.mrb[78].mxu1 }
 0x1b0   : > { %v7085_v55 = vpop.f32.mrb[79].mxu0  ;;  %v7094_v23 = vpop.f32.mrb[79].mxu1 }
 0x1b1   : > { %2231 = vst [vmem:[%s6199_s8 + $0x1a0] sm:$0xff] %v4821_v5  ;;  %v1468_v30 = vpack.c.bf16 %v7085_v55, %v7071_v44  ;;  %v4829_v54 = vpack.c.bf16 %v7085_v55, %v7077_v28  ;;  %2232 = vst [vmem:[%s6199_s8 + $0x1a8] sm:$0xff] %v4822_v43  ;;  %v1470_v16 = vpack.c.bf16 %v7094_v23, %v7075_v40  ;;  %v5597_v44 = vld [vmem:[#allocation2 + $0x3f0] sm:$0xff]  }
 0x1b2   : > { %v4830_v45 = vpack.c.bf16 %v7094_v23, %v7083_v51  ;;  %v8132_v5 = vpack.c.bf16 %v6837_v22, %v6827_v59 }
 0x1b3   : > { %2239 = vst [vmem:[%s6199_s8 + $0x1e0] sm:$0xff] %v4829_v54 }
 0x1b4   : > { %3606 = vmatmul.mubr.bf16.gmra.mrb[184].mxu0 %v8132_v5  ;;  %3703 = vmatmul.mubr.bf16.gmra.mrb[184].mxu1 %v8133_v46  ;;  %2240 = vst [vmem:[%s6199_s8 + $0x1e8] sm:$0xff] %v4830_v45  ;;  %v5577_v5 = vld [vmem:[#allocation2 + $0x3c8] sm:$0xff]  }
 0x1b5   : > { %3613 = vmatprep.mubr.bf16.mxu0 %v1528_v39  ;;  %3710 = vmatprep.mubr.bf16.mxu1 %v1530_v36  ;;  %v7115_v43 = vpop.f32.mrb[80].mxu0  ;;  %v7117_v59 = vpop.f32.mrb[80].mxu1 }
 0x1b6   : > { %v7119_v22 = vpop.f32.mrb[81].mxu0  ;;  %v7123_v27 = vpop.f32.mrb[81].mxu1 }
 0x1b7   : > { %v4837_v35 = vpack.c.bf16 %v7119_v22, %v7115_v43  ;;  %v7125_v56 = vpop.f32.mrb[82].mxu0  ;;  %v4838_v9 = vpack.c.bf16 %v7123_v27, %v7117_v59  ;;  %v7131_v39 = vpop.f32.mrb[82].mxu1 }
 0x1b8   : > { %v7133_v8 = vpop.f32.mrb[83].mxu0  ;;  %v7142_v54 = vpop.f32.mrb[83].mxu1 }
 0x1b9   : > { %2247 = vst [vmem:[%s6199_s8 + $0x220] sm:$0xff] %v4837_v35  ;;  %v1484_v45 = vpack.c.bf16 %v7133_v8, %v7119_v22  ;;  %v4845_v46 = vpack.c.bf16 %v7133_v8, %v7125_v56  ;;  %2248 = vst [vmem:[%s6199_s8 + $0x228] sm:$0xff] %v4838_v9  ;;  %v4846_v53 = vpack.c.bf16 %v7142_v54, %v7131_v39 }
 0x1bb   : > { %2255 = vst [vmem:[%s6199_s8 + $0x260] sm:$0xff] %v4845_v46  ;;  %2256 = vst [vmem:[%s6199_s8 + $0x268] sm:$0xff] %v4846_v53  ;;  %v5574_v46 = vld [vmem:[#allocation2 + $0x380] sm:$0xff]  }
 0x1bc   : > { %3614 = vmatmul.mubr.bf16.gmra.mrb[188].mxu0 %v1527_v24  ;;  %3711 = vmatmul.mubr.bf16.gmra.mrb[188].mxu1 %v1529_v25  ;;  %v5575_v25 = vld [vmem:[#allocation2 + $0x348] sm:$0xff]  }
 0x1bd   : > { %3751 = vmatprep.mubr.bf16.mxu0 %v1420_v7  ;;  %3848 = vmatprep.mubr.bf16.mxu1 %v1422_v37  ;;  %v7163_v35 = vpop.f32.mrb[84].mxu0  ;;  %v7165_v9 = vpop.f32.mrb[84].mxu1  ;;  %v8134_v7 = vpack.c.bf16 %v6933_v11, %v6923_v42  ;;  %v5578_v42 = vld [vmem:[#allocation2 + $0x388] sm:$0xff]   ;;  %v5579_v11 = vld [vmem:[#allocation2 + $0x350] sm:$0xff]  }
 0x1be   : > { %v7167_v49 = vpop.f32.mrb[85].mxu0  ;;  %v7171_v0 = vpop.f32.mrb[85].mxu1 }
 0x1bf   : > { %v4853_v52 = vpack.c.bf16 %v7167_v49, %v7163_v35  ;;  %v7173_v24 = vpop.f32.mrb[86].mxu0  ;;  %v4854_v12 = vpack.c.bf16 %v7171_v0, %v7165_v9  ;;  %v7179_v62 = vpop.f32.mrb[86].mxu1 }
 0x1c0   : > { %v7181_v3 = vpop.f32.mrb[87].mxu0  ;;  %v7190_v53 = vpop.f32.mrb[87].mxu1 }
 0x1c1   : > { %2263 = vst [vmem:[%s6199_s8 + $0x2a0] sm:$0xff] %v4853_v52  ;;  %v4861_v37 = vpack.c.bf16 %v7181_v3, %v7173_v24  ;;  %2264 = vst [vmem:[%s6199_s8 + $0x2a8] sm:$0xff] %v4854_v12  ;;  %v4862_v52 = vpack.c.bf16 %v7190_v53, %v7179_v62  ;;  %v5576_v12 = vld [vmem:[#allocation2 + $0x308] sm:$0xff]  }
 0x1c3   : > { %2271 = vst [vmem:[%s6199_s8 + $0x2e0] sm:$0xff] %v4861_v37  ;;  %2272 = vst [vmem:[%s6199_s8 + $0x2e8] sm:$0xff] %v4862_v52  ;;  %v5582_v52 = vld [vmem:[#allocation2 + $0x390] sm:$0xff]  }
 0x1c4   : > { %3752 = vmatmul.mubr.bf16.vlgmr.msra.gmra.mrb[192].mxu0 %v8134_v7  ;;  %3849 = vmatmul.mubr.bf16.vlgmr.msra.gmra.mrb[192].mxu1 %v8135_v38  ;;  %v5585_v7 = vld [vmem:[#allocation2 + $0x3d8] sm:$0xff]  }
 0x1c5   : > { %3759 = vmatprep.mubr.bf16.mxu0 %v1436_v13  ;;  %3856 = vmatprep.mubr.bf16.mxu1 %v1438_v10  ;;  %v7211_v36 = vpop.f32.mrb[88].mxu0  ;;  %v7213_v50 = vpop.f32.mrb[88].mxu1  ;;  %v5583_v10 = vld [vmem:[#allocation2 + $0x358] sm:$0xff]  }
 0x1c6   : > { %5284 = vmatpush3.bf16.msra.mxu0 %v5572_v4  ;;  %5348 = vmatpush3.bf16.msra.mxu1 %v5574_v46  ;;  %v7215_v20 = vpop.f32.mrb[89].mxu0  ;;  %v7219_v58 = vpop.f32.mrb[89].mxu1 }
 0x1c7   : > { %5285 = vmatprep.subr.bf16.mxu0 %v5575_v25  ;;  %5349 = vmatprep.subr.bf16.mxu1 %v5577_v5  ;;  %v4869_v34 = vpack.c.bf16 %v7215_v20, %v7211_v36  ;;  %v7221_v13 = vpop.f32.mrb[90].mxu0  ;;  %v4870_v48 = vpack.c.bf16 %v7219_v58, %v7213_v50  ;;  %v7227_v25 = vpop.f32.mrb[90].mxu1  ;;  %v5580_v5 = vld [vmem:[#allocation2 + $0x310] sm:$0xff]  }
 0x1c8   : > { %v7229_v4 = vpop.f32.mrb[91].mxu0  ;;  %v7238_v46 = vpop.f32.mrb[91].mxu1 }
 0x1c9   : > { %2279 = vst [vmem:[%s6199_s8 + $0x320] sm:$0xff] %v4869_v34  ;;  %v1516_v38 = vpack.c.bf16 %v7229_v4, %v7215_v20  ;;  %v4877_v37 = vpack.c.bf16 %v7229_v4, %v7221_v13  ;;  %2280 = vst [vmem:[%s6199_s8 + $0x328] sm:$0xff] %v4870_v48  ;;  %v4878_v34 = vpack.c.bf16 %v7238_v46, %v7227_v25 }
 0x1ca   : > { %5286 = vmatpush3.bf16.msra.mxu0 %v5576_v12  ;;  %5350 = vmatpush3.bf16.msra.mxu1 %v5578_v42  ;;  %v1518_v12 = vpack.c.bf16 %v7238_v46, %v7219_v58  ;;  %v5584_v42 = vld [vmem:[#allocation2 + $0x318] sm:$0xff]  }
 0x1cb   : > { %5287 = vmatprep.subr.bf16.mxu0 %v5579_v11  ;;  %5351 = vmatprep.subr.bf16.mxu1 %v5581_v60  ;;  %2287 = vst [vmem:[%s6199_s8 + $0x360] sm:$0xff] %v4877_v37  ;;  %2288 = vst [vmem:[%s6199_s8 + $0x368] sm:$0xff] %v4878_v34  ;;  %v5588_v60 = vld [vmem:[#allocation2 + $0x320] sm:$0xff]  }
 0x1cc   : > { %3760 = vmatmul.mubr.bf16.gmra.mrb[196].mxu0 %v1435_v19  ;;  %3857 = vmatmul.mubr.bf16.gmra.mrb[196].mxu1 %v1437_v2  ;;  %v5587_v19 = vld [vmem:[#allocation2 + $0x360] sm:$0xff]  }
 0x1cd   : > { %3767 = vmatprep.mubr.bf16.mxu0 %v1452_v63  ;;  %3864 = vmatprep.mubr.bf16.mxu1 %v1454_v1  ;;  %v7259_v6 = vpop.f32.mrb[92].mxu0  ;;  %v7261_v17 = vpop.f32.mrb[92].mxu1  ;;  %v5589_v2 = vld [vmem:[#allocation2 + $0x3e0] sm:$0xff]  }
 0x1ce   : > { %5288 = vmatpush3.bf16.msra.mxu0 %v5580_v5  ;;  %5352 = vmatpush3.bf16.msra.mxu1 %v5582_v52  ;;  %v7263_v18 = vpop.f32.mrb[93].mxu0  ;;  %v7267_v29 = vpop.f32.mrb[93].mxu1  ;;  %v5590_v37 = vld [vmem:[#allocation2 + $0x3a0] sm:$0xff]   ;;  %v5591_v52 = vld [vmem:[#allocation2 + $0x368] sm:$0xff]  }
 0x1cf   : > { %5289 = vmatprep.subr.bf16.mxu0 %v5583_v10  ;;  %5353 = vmatprep.subr.bf16.mxu1 %v5585_v7  ;;  %v4885_v26 = vpack.c.bf16 %v7263_v18, %v7259_v6  ;;  %v7269_v21 = vpop.f32.mrb[94].mxu0  ;;  %v4886_v63 = vpack.c.bf16 %v7267_v29, %v7261_v17  ;;  %v7275_v1 = vpop.f32.mrb[94].mxu1 }
 0x1d0   : > { %v1531_v31 = vpack.c.bf16 %v7269_v21, %v7259_v6  ;;  %v7277_v11 = vpop.f32.mrb[95].mxu0  ;;  %v1533_v48 = vpack.c.bf16 %v7275_v1, %v7261_v17  ;;  %v7286_v7 = vpop.f32.mrb[95].mxu1 }
 0x1d1   : > { %2295 = vst [vmem:[%s6199_s8 + $0x3a0] sm:$0xff] %v4885_v26  ;;  %v1532_v10 = vpack.c.bf16 %v7277_v11, %v7263_v18  ;;  %v4893_v5 = vpack.c.bf16 %v7277_v11, %v7269_v21  ;;  %2296 = vst [vmem:[%s6199_s8 + $0x3a8] sm:$0xff] %v4886_v63  ;;  %v1534_v34 = vpack.c.bf16 %v7286_v7, %v7267_v29  ;;  %v5593_v26 = vld [vmem:[#allocation2 + $0x3e8] sm:$0xff]  }
 0x1d2   : > { %5290 = vmatpush3.bf16.msra.mxu0 %v5584_v42  ;;  %5354 = vmatpush3.bf16.msra.mxu1 %v5586_v33  ;;  %v4894_v42 = vpack.c.bf16 %v7286_v7, %v7275_v1  ;;  %v8136_v33 = vpack.c.bf16 %v7035_v57, %v7021_v32 }
 0x1d3   : > { %5291 = vmatprep.subr.bf16.mxu0 %v5587_v19  ;;  %5355 = vmatprep.subr.bf16.mxu1 %v5589_v2  ;;  %2303 = vst [vmem:[%s6199_s8 + $0x3e0] sm:$0xff] %v4893_v5  ;;  %v5592_v19 = vld [vmem:[#allocation2 + $0x328] sm:$0xff]   ;;  %v8137_v5 = vpack.c.bf16 %v7077_v28, %v7067_v47  ;;  %v5602_v28 = vld [vmem:[#allocation2 + $0x3b8] sm:$0xff]  }
 0x1d4   : > { %3768 = vmatmul.mubr.bf16.gmra.mrb[200].mxu0 %v1451_v41  ;;  %3865 = vmatmul.mubr.bf16.gmra.mrb[200].mxu1 %v8136_v33  ;;  %2304 = vst [vmem:[%s6199_s8 + $0x3e8] sm:$0xff] %v4894_v42  ;;  %v5595_v41 = vld [vmem:[#allocation2 + $0x370] sm:$0xff]   ;;  %v5599_v33 = vld [vmem:[#allocation2 + $0x378] sm:$0xff]  }
 0x1d5   : > { %3775 = vmatprep.mubr.bf16.mxu0 %v1468_v30  ;;  %3872 = vmatprep.mubr.bf16.mxu1 %v1470_v16  ;;  %v7307_v14 = vpop.f32.mrb[96].mxu0  ;;  %v7309_v32 = vpop.f32.mrb[96].mxu1  ;;  %v5601_v16 = vld [vmem:[#allocation2 + $0x3f8] sm:$0xff]  }
 0x1d6   : > { %5292 = vmatpush3.bf16.msra.mxu0 %v5588_v60  ;;  %5356 = vmatpush3.bf16.msra.mxu1 %v5590_v37  ;;  %v7311_v57 = vpop.f32.mrb[97].mxu0  ;;  %v7315_v40 = vpop.f32.mrb[97].mxu1  ;;  %v5596_v60 = vld [vmem:[#allocation2 + $0x330] sm:$0xff]  }
 0x1d7   : > { %5293 = vmatprep.subr.bf16.mxu0 %v5591_v52  ;;  %5357 = vmatprep.subr.bf16.mxu1 %v5593_v26  ;;  %v4775_v55 = vpack.c.bf16 %v7311_v57, %v7307_v14  ;;  %v7317_v30 = vpop.f32.mrb[98].mxu0  ;;  %v4776_v23 = vpack.c.bf16 %v7315_v40, %v7309_v32  ;;  %v7323_v2 = vpop.f32.mrb[98].mxu1  ;;  %v5598_v26 = vld [vmem:[#allocation2 + $0x3b0] sm:$0xff]  }
 0x1d8   : > { %v7325_v63 = vpop.f32.mrb[99].mxu0  ;;  %v7334_v42 = vpop.f32.mrb[99].mxu1 }
 0x1d9   : > { %2185 = vst [vmem:[%s6199_s8 + $0x30] sm:$0xff] %v4775_v55  ;;  %v1424_v37 = vpack.c.bf16 %v7325_v63, %v7311_v57  ;;  %v4783_v52 = vpack.c.bf16 %v7325_v63, %v7317_v30  ;;  %2186 = vst [vmem:[%s6199_s8 + $0x38] sm:$0xff] %v4776_v23  ;;  %v4784_v55 = vpack.c.bf16 %v7334_v42, %v7323_v2  ;;  %v5600_v23 = vld [vmem:[#allocation2 + $0x338] sm:$0xff]  }
 0x1da   : > { %5294 = vmatpush3.bf16.msra.mxu0 %v5592_v19  ;;  %5358 = vmatpush3.bf16.msra.mxu1 %v5594_v15  ;;  %v1426_v19 = vpack.c.bf16 %v7334_v42, %v7315_v40  ;;  %v8138_v15 = vpack.c.bf16 %v7083_v51, %v7069_v61 }
 0x1db   : > { %5295 = vmatprep.subr.bf16.mxu0 %v5595_v41  ;;  %5359 = vmatprep.subr.bf16.mxu1 %v5597_v44  ;;  %2193 = vst [vmem:[%s6199_s8 + $0x70] sm:$0xff] %v4783_v52  ;;  %2194 = vst [vmem:[%s6199_s8 + $0x78] sm:$0xff] %v4784_v55  ;;  %v8139_v41 = vpack.c.bf16 %v7142_v54, %v7123_v27 }
 0x1dc   : > { %3776 = vmatmul.mubr.bf16.gmra.mrb[204].mxu0 %v8137_v5  ;;  %3873 = vmatmul.mubr.bf16.gmra.mrb[204].mxu1 %v8138_v15  ;;  %v8140_v15 = vpack.c.bf16 %v7125_v56, %v7115_v43 }
 0x1dd   : > { %3783 = vmatprep.mubr.bf16.mxu0 %v1484_v45  ;;  %3880 = vmatprep.mubr.bf16.mxu1 %v8139_v41  ;;  %v7355_v47 = vpop.f32.mrb[100].mxu0  ;;  %v7357_v44 = vpop.f32.mrb[100].mxu1  ;;  %v8141_v41 = vpack.c.bf16 %v7131_v39, %v7117_v59 }
 0x1de   : > { %5296 = vmatpush3.bf16.msra.mxu0 %v5596_v60  ;;  %5360 = vmatpush3.bf16.msra.mxu1 %v5598_v26  ;;  %v7359_v61 = vpop.f32.mrb[101].mxu0  ;;  %v7363_v22 = vpop.f32.mrb[101].mxu1 }
 0x1df   : > { %5297 = vmatprep.subr.bf16.mxu0 %v5599_v33  ;;  %5361 = vmatprep.subr.bf16.mxu1 %v5601_v16  ;;  %v4791_v51 = vpack.c.bf16 %v7359_v61, %v7355_v47  ;;  %v7365_v27 = vpop.f32.mrb[102].mxu0  ;;  %v4792_v8 = vpack.c.bf16 %v7363_v22, %v7357_v44  ;;  %v7371_v54 = vpop.f32.mrb[102].mxu1 }
 0x1e0   : > { %v1439_v45 = vpack.c.bf16 %v7365_v27, %v7355_v47  ;;  %v7373_v60 = vpop.f32.mrb[103].mxu0  ;;  %v1441_v16 = vpack.c.bf16 %v7371_v54, %v7357_v44  ;;  %v7382_v26 = vpop.f32.mrb[103].mxu1 }
 0x1e1   : > { %2201 = vst [vmem:[%s6199_s8 + $0xb0] sm:$0xff] %v4791_v51  ;;  %v1440_v5 = vpack.c.bf16 %v7373_v60, %v7359_v61  ;;  %v4799_v52 = vpack.c.bf16 %v7373_v60, %v7365_v27  ;;  %2202 = vst [vmem:[%s6199_s8 + $0xb8] sm:$0xff] %v4792_v8  ;;  %v1442_v33 = vpack.c.bf16 %v7382_v26, %v7363_v22 }
 0x1e2   : > { %5298 = vmatpush3.bf16.msra.mxu0 %v5600_v23  ;;  %5362 = vmatpush3.bf16.msra.mxu1 %v5602_v28  ;;  %v4800_v55 = vpack.c.bf16 %v7382_v26, %v7371_v54  ;;  %v8142_v23 = vpack.c.bf16 %v7181_v3, %v7167_v49  ;;  %v8143_v28 = vpack.c.bf16 %v7190_v53, %v7171_v0 }
 0x1e3   : > { %2209 = vst [vmem:[%s6199_s8 + $0xf0] sm:$0xff] %v4799_v52  ;;  %v8145_v52 = vpack.c.bf16 %v7179_v62, %v7165_v9 }
 0x1e4   : > { %3784 = vmatmul.mubr.bf16.gmra.mrb[208].mxu0 %v8140_v15  ;;  %3881 = vmatmul.mubr.bf16.gmra.mrb[208].mxu1 %v8141_v41  ;;  %2210 = vst [vmem:[%s6199_s8 + $0xf8] sm:$0xff] %v4800_v55 }
 0x1e5   : > { %3791 = vmatprep.mubr.bf16.mxu0 %v8142_v23  ;;  %3888 = vmatprep.mubr.bf16.mxu1 %v8143_v28  ;;  %v7403_v51 = vpop.f32.mrb[104].mxu0  ;;  %v7405_v43 = vpop.f32.mrb[104].mxu1 }
 0x1e6   : > { %v7407_v56 = vpop.f32.mrb[105].mxu0  ;;  %v7411_v39 = vpop.f32.mrb[105].mxu1 }
 0x1e7   : > { %v4807_v59 = vpack.c.bf16 %v7407_v56, %v7403_v51  ;;  %v7413_v49 = vpop.f32.mrb[106].mxu0  ;;  %v4808_v3 = vpack.c.bf16 %v7411_v39, %v7405_v43  ;;  %v7419_v53 = vpop.f32.mrb[106].mxu1 }
 0x1e8   : > { %v1455_v0 = vpack.c.bf16 %v7413_v49, %v7403_v51  ;;  %v7421_v8 = vpop.f32.mrb[107].mxu0  ;;  %v7430_v41 = vpop.f32.mrb[107].mxu1 }
 0x1e9   : > { %2217 = vst [vmem:[%s6199_s8 + $0x130] sm:$0xff] %v4807_v59  ;;  %v1456_v55 = vpack.c.bf16 %v7421_v8, %v7407_v56  ;;  %v4815_v15 = vpack.c.bf16 %v7421_v8, %v7413_v49  ;;  %2218 = vst [vmem:[%s6199_s8 + $0x138] sm:$0xff] %v4808_v3  ;;  %v1458_v23 = vpack.c.bf16 %v7430_v41, %v7411_v39 }
 0x1ea   : > { %v4816_v28 = vpack.c.bf16 %v7430_v41, %v7419_v53  ;;  %v8144_v59 = vpack.c.bf16 %v7173_v24, %v7163_v35 }
 0x1eb   : > { %2225 = vst [vmem:[%s6199_s8 + $0x170] sm:$0xff] %v4815_v15 }
 0x1ec   : > { %3792 = vmatmul.mubr.bf16.gmra.mrb[212].mxu0 %v8144_v59  ;;  %3889 = vmatmul.mubr.bf16.gmra.mrb[212].mxu1 %v8145_v52  ;;  %2226 = vst [vmem:[%s6199_s8 + $0x178] sm:$0xff] %v4816_v28 }
 0x1ed   : > { %3799 = vmatprep.mubr.bf16.mxu0 %v1516_v38  ;;  %3896 = vmatprep.mubr.bf16.mxu1 %v1518_v12  ;;  %v7451_v3 = vpop.f32.mrb[108].mxu0  ;;  %v8147_v12 = vpack.c.bf16 %v7227_v25, %v7213_v50 }
 0x1ee   : > { %v7453_v35 = vpop.f32.mrb[108].mxu1  ;;  %v7455_v24 = vpop.f32.mrb[109].mxu0 }
 0x1ef   : > { %v4823_v9 = vpack.c.bf16 %v7455_v24, %v7451_v3  ;;  %v7459_v62 = vpop.f32.mrb[109].mxu1  ;;  %v7461_v20 = vpop.f32.mrb[110].mxu0 }
 0x1f0   : > { %v4824_v4 = vpack.c.bf16 %v7459_v62, %v7453_v35  ;;  %v7467_v38 = vpop.f32.mrb[110].mxu1  ;;  %v7469_v46 = vpop.f32.mrb[111].mxu0 }
 0x1f1   : > { %2233 = vst [vmem:[%s6199_s8 + $0x1b0] sm:$0xff] %v4823_v9  ;;  %v1472_v52 = vpack.c.bf16 %v7469_v46, %v7455_v24  ;;  %v4831_v15 = vpack.c.bf16 %v7469_v46, %v7461_v20  ;;  %v7478_v28 = vpop.f32.mrb[111].mxu1  ;;  %v8146_v9 = vpack.c.bf16 %v7221_v13, %v7211_v36  ;;  %v8151_v46 = vpack.c.bf16 %v7461_v20, %v7451_v3 }
 0x1f2   : > { %2234 = vst [vmem:[%s6199_s8 + $0x1b8] sm:$0xff] %v4824_v4  ;;  %v1474_v59 = vpack.c.bf16 %v7478_v28, %v7459_v62  ;;  %v4832_v58 = vpack.c.bf16 %v7478_v28, %v7467_v38  ;;  %v8152_v62 = vpack.c.bf16 %v7467_v38, %v7453_v35 }
 0x1f3   : > { %2241 = vst [vmem:[%s6199_s8 + $0x1f0] sm:$0xff] %v4831_v15 }
 0x1f4   : > { %3800 = vmatmul.mubr.bf16.gmra.mrb[216].mxu0 %v8146_v9  ;;  %3897 = vmatmul.mubr.bf16.gmra.mrb[216].mxu1 %v8147_v12  ;;  %2242 = vst [vmem:[%s6199_s8 + $0x1f8] sm:$0xff] %v4832_v58 }
 0x1f5   : > { %3807 = vmatprep.mubr.bf16.mxu0 %v1532_v10  ;;  %3904 = vmatprep.mubr.bf16.mxu1 %v1534_v34  ;;  %v7499_v4 = vpop.f32.mrb[112].mxu0 }
 0x1f6   : > { %v7501_v36 = vpop.f32.mrb[112].mxu1  ;;  %v7503_v13 = vpop.f32.mrb[113].mxu0 }
 0x1f7   : > { %v4839_v50 = vpack.c.bf16 %v7503_v13, %v7499_v4  ;;  %v7507_v25 = vpop.f32.mrb[113].mxu1  ;;  %v7509_v18 = vpop.f32.mrb[114].mxu0 }
 0x1f8   : > { %v4840_v11 = vpack.c.bf16 %v7507_v25, %v7501_v36  ;;  %v7515_v10 = vpop.f32.mrb[114].mxu1  ;;  %v7517_v7 = vpop.f32.mrb[115].mxu0 }
 0x1f9   : > { %2249 = vst [vmem:[%s6199_s8 + $0x230] sm:$0xff] %v4839_v50  ;;  %v1489_v34 = vpack.c.bf16 %v7515_v10, %v7501_v36  ;;  %v1488_v58 = vpack.c.bf16 %v7517_v7, %v7503_v13  ;;  %v4847_v12 = vpack.c.bf16 %v7517_v7, %v7509_v18  ;;  %v7526_v15 = vpop.f32.mrb[115].mxu1  ;;  %v8153_v7 = vpack.c.bf16 %v7509_v18, %v7499_v4 }
 0x1fa   : > { %2250 = vst [vmem:[%s6199_s8 + $0x238] sm:$0xff] %v4840_v11  ;;  %v1490_v9 = vpack.c.bf16 %v7526_v15, %v7507_v25  ;;  %v4848_v29 = vpack.c.bf16 %v7526_v15, %v7515_v10 }
 0x1fb   : > { %2257 = vst [vmem:[%s6199_s8 + $0x270] sm:$0xff] %v4847_v12 }
 0x1fc   : > { %3808 = vmatmul.mubr.bf16.gmra.mrb[220].mxu0 %v1531_v31  ;;  %3905 = vmatmul.mubr.bf16.gmra.mrb[220].mxu1 %v1533_v48  ;;  %2258 = vst [vmem:[%s6199_s8 + $0x278] sm:$0xff] %v4848_v29 }
 0x1fd   : > { %3945 = vmatprep.mubr.bf16.mxu0 %v1424_v37  ;;  %4042 = vmatprep.mubr.bf16.mxu1 %v1426_v19  ;;  %v7547_v50 = vpop.f32.mrb[116].mxu0  ;;  %v8149_v37 = vpack.c.bf16 %v7323_v2, %v7309_v32 }
 0x1fe   : > { %v7549_v6 = vpop.f32.mrb[116].mxu1  ;;  %v7551_v21 = vpop.f32.mrb[117].mxu0 }
 0x1ff   : > { %v4855_v17 = vpack.c.bf16 %v7551_v21, %v7547_v50  ;;  %v7555_v31 = vpop.f32.mrb[117].mxu1  ;;  %v7557_v1 = vpop.f32.mrb[118].mxu0 }
 0x200   : > { %v4856_v48 = vpack.c.bf16 %v7555_v31, %v7549_v6  ;;  %v1503_v57 = vpack.c.bf16 %v7557_v1, %v7547_v50  ;;  %v7563_v40 = vpop.f32.mrb[118].mxu1  ;;  %v7565_v63 = vpop.f32.mrb[119].mxu0 }
 0x201   : > { %2265 = vst [vmem:[%s6199_s8 + $0x2b0] sm:$0xff] %v4855_v17  ;;  %v1504_v42 = vpack.c.bf16 %v7565_v63, %v7551_v21  ;;  %v4863_v19 = vpack.c.bf16 %v7565_v63, %v7557_v1  ;;  %v7574_v11 = vpop.f32.mrb[119].mxu1  ;;  %v8148_v17 = vpack.c.bf16 %v7317_v30, %v7307_v14 }
 0x202   : > { %2266 = vst [vmem:[%s6199_s8 + $0x2b8] sm:$0xff] %v4856_v48  ;;  %v1506_v29 = vpack.c.bf16 %v7574_v11, %v7555_v31  ;;  %v4864_v12 = vpack.c.bf16 %v7574_v11, %v7563_v40  ;;  %v8154_v31 = vpack.c.bf16 %v7563_v40, %v7549_v6 }
 0x203   : > { %2273 = vst [vmem:[%s6199_s8 + $0x2f0] sm:$0xff] %v4863_v19 }
 0x204   : > { %3946 = vmatmul.mubr.bf16.vlgmr.msra.gmra.mrb[224].mxu0 %v8148_v17  ;;  %4043 = vmatmul.mubr.bf16.vlgmr.msra.gmra.mrb[224].mxu1 %v8149_v37  ;;  %2274 = vst [vmem:[%s6199_s8 + $0x2f8] sm:$0xff] %v4864_v12 }
 0x205   : > { %3953 = vmatprep.mubr.bf16.mxu0 %v1440_v5  ;;  %4050 = vmatprep.mubr.bf16.mxu1 %v1442_v33  ;;  %v7595_v48 = vpop.f32.mrb[120].mxu0 }
 0x206   : > { %v7597_v14 = vpop.f32.mrb[120].mxu1  ;;  %v7599_v30 = vpop.f32.mrb[121].mxu0 }
 0x207   : > { %v4871_v32 = vpack.c.bf16 %v7599_v30, %v7595_v48  ;;  %v7603_v2 = vpop.f32.mrb[121].mxu1  ;;  %v7605_v61 = vpop.f32.mrb[122].mxu0 }
 0x208   : > { %v4872_v60 = vpack.c.bf16 %v7603_v2, %v7597_v14  ;;  %v7611_v5 = vpop.f32.mrb[122].mxu1  ;;  %v7613_v26 = vpop.f32.mrb[123].mxu0 }
 0x209   : > { %2281 = vst [vmem:[%s6199_s8 + $0x330] sm:$0xff] %v4871_v32  ;;  %v1521_v33 = vpack.c.bf16 %v7611_v5, %v7597_v14  ;;  %v1520_v37 = vpack.c.bf16 %v7613_v26, %v7599_v30  ;;  %v4879_v19 = vpack.c.bf16 %v7613_v26, %v7605_v61  ;;  %v7622_v12 = vpop.f32.mrb[123].mxu1  ;;  %v8155_v26 = vpack.c.bf16 %v7605_v61, %v7595_v48 }
 0x20a   : > { %2282 = vst [vmem:[%s6199_s8 + $0x338] sm:$0xff] %v4872_v60  ;;  %v1522_v17 = vpack.c.bf16 %v7622_v12, %v7603_v2  ;;  %v4880_v22 = vpack.c.bf16 %v7622_v12, %v7611_v5 }
 0x20b   : > { %2289 = vst [vmem:[%s6199_s8 + $0x370] sm:$0xff] %v4879_v19 }
 0x20c   : > { %3954 = vmatmul.mubr.bf16.gmra.mrb[228].mxu0 %v1439_v45  ;;  %4051 = vmatmul.mubr.bf16.gmra.mrb[228].mxu1 %v1441_v16  ;;  %2290 = vst [vmem:[%s6199_s8 + $0x378] sm:$0xff] %v4880_v22 }
 0x20d   : > { %3961 = vmatprep.mubr.bf16.mxu0 %v1456_v55  ;;  %4058 = vmatprep.mubr.bf16.mxu1 %v1458_v23  ;;  %v7643_v32 = vpop.f32.mrb[124].mxu0 }
 0x20e   : > { %v7645_v47 = vpop.f32.mrb[124].mxu1  ;;  %v7647_v27 = vpop.f32.mrb[125].mxu0 }
 0x20f   : > { %v4887_v44 = vpack.c.bf16 %v7647_v27, %v7643_v32  ;;  %v7651_v45 = vpop.f32.mrb[125].mxu1  ;;  %v7653_v54 = vpop.f32.mrb[126].mxu0 }
 0x210   : > { %v4888_v16 = vpack.c.bf16 %v7651_v45, %v7645_v47  ;;  %v7659_v39 = vpop.f32.mrb[126].mxu1  ;;  %v7661_v8 = vpop.f32.mrb[127].mxu0 }
 0x211   : > { %2297 = vst [vmem:[%s6199_s8 + $0x3b0] sm:$0xff] %v4887_v44  ;;  %v4895_v23 = vpack.c.bf16 %v7661_v8, %v7653_v54  ;;  %v7670_v60 = vpop.f32.mrb[127].mxu1  ;;  %v8150_v44 = vpack.c.bf16 %v7419_v53, %v7405_v43  ;;  %v8156_v2 = vpack.c.bf16 %v7661_v8, %v7647_v27  ;;  %v8158_v8 = vpack.c.bf16 %v7653_v54, %v7643_v32 }
 0x212   : > { %2298 = vst [vmem:[%s6199_s8 + $0x3b8] sm:$0xff] %v4888_v16  ;;  %v4896_v19 = vpack.c.bf16 %v7670_v60, %v7659_v39  ;;  %v8157_v12 = vpack.c.bf16 %v7670_v60, %v7651_v45  ;;  %v8159_v45 = vpack.c.bf16 %v7659_v39, %v7645_v47 }
 0x213   : > { %2305 = vst [vmem:[%s6199_s8 + $0x3f0] sm:$0xff] %v4895_v23 }
 0x214   : > { %3962 = vmatmul.mubr.bf16.gmra.mrb[232].mxu0 %v1455_v0  ;;  %4059 = vmatmul.mubr.bf16.gmra.mrb[232].mxu1 %v8150_v44  ;;  %2306 = vst [vmem:[%s6199_s8 + $0x3f8] sm:$0xff] %v4896_v19 }
 0x215   : > { %3969 = vmatprep.mubr.bf16.mxu0 %v1472_v52  ;;  %4066 = vmatprep.mubr.bf16.mxu1 %v1474_v59  ;;  %v4915_v16 = vpop.f32.mrb[128].mxu0 }
 0x216   : > { %v4979_v55 = vpop.f32.mrb[128].mxu1  ;;  %v4916_v56 = vpop.f32.mrb[129].mxu0 }
 0x217   : > { %v4917_v22 = vadd.f32 %v4916_v56, %v4915_v16  ;;  %v4980_v51 = vpop.f32.mrb[129].mxu1  ;;  %v4918_v49 = vpop.f32.mrb[130].mxu0 }
 0x218   : > { %v4981_v0 = vadd.f32 %v4980_v51, %v4979_v55  ;;  %v4982_v23 = vpop.f32.mrb[130].mxu1  ;;  %v4919_v41 = vpop.f32.mrb[131].mxu0 }
 0x219   : > { %v4920_v43 = vadd.f32 %v4919_v41, %v4918_v49  ;;  %v4983_v53 = vpop.f32.mrb[131].mxu1 }
 0x21a   : > { %v7691_v44 = vadd.f32 %v4981_v0, %v4917_v22  ;;  %v4984_v24 = vadd.f32 %v4983_v53, %v4982_v23 }
 0x21c   : > { %3970 = vmatmul.mubr.bf16.gmra.mrb[236].mxu0 %v8151_v46  ;;  %4067 = vmatmul.mubr.bf16.gmra.mrb[236].mxu1 %v8152_v62  ;;  %v7702_v52 = vadd.f32 %v4984_v24, %v4920_v43 }
 0x21d   : > { %3977 = vmatprep.mubr.bf16.mxu0 %v1488_v58  ;;  %4074 = vmatprep.mubr.bf16.mxu1 %v1490_v9  ;;  %v4921_v28 = vpop.f32.mrb[132].mxu0 }
 0x21e   : > { %v4985_v59 = vpop.f32.mrb[132].mxu1  ;;  %v4922_v56 = vpop.f32.mrb[133].mxu0 }
 0x21f   : > { %v4923_v55 = vadd.f32 %v4922_v56, %v4921_v28  ;;  %v4986_v3 = vpop.f32.mrb[133].mxu1  ;;  %v4924_v20 = vpop.f32.mrb[134].mxu0 }
 0x220   : > { %v4987_v41 = vadd.f32 %v4986_v3, %v4985_v59  ;;  %v4988_v22 = vpop.f32.mrb[134].mxu1  ;;  %v4925_v35 = vpop.f32.mrb[135].mxu0 }
 0x221   : > { %v4926_v38 = vadd.f32 %v4925_v35, %v4924_v20  ;;  %v4989_v19 = vpop.f32.mrb[135].mxu1 }
 0x222   : > { %v7707_v16 = vadd.f32 %v4987_v41, %v4923_v55  ;;  %v4990_v13 = vadd.f32 %v4989_v19, %v4988_v22 }
 0x224   : > { %3978 = vmatmul.mubr.bf16.gmra.mrb[240].mxu0 %v8153_v7  ;;  %4075 = vmatmul.mubr.bf16.gmra.mrb[240].mxu1 %v1489_v34  ;;  %v7718_v25 = vadd.f32 %v4990_v13, %v4926_v38 }
 0x225   : > { %3985 = vmatprep.mubr.bf16.mxu0 %v1504_v42  ;;  %4082 = vmatprep.mubr.bf16.mxu1 %v1506_v29  ;;  %v4927_v58 = vpop.f32.mrb[136].mxu0 }
 0x226   : > { %v4991_v15 = vpop.f32.mrb[136].mxu1  ;;  %v4928_v9 = vpop.f32.mrb[137].mxu0 }
 0x227   : > { %v4929_v51 = vadd.f32 %v4928_v9, %v4927_v58  ;;  %v4992_v4 = vpop.f32.mrb[137].mxu1  ;;  %v4930_v18 = vpop.f32.mrb[138].mxu0 }
 0x228   : > { %v4993_v49 = vadd.f32 %v4992_v4, %v4991_v15  ;;  %v4994_v0 = vpop.f32.mrb[138].mxu1  ;;  %v4931_v36 = vpop.f32.mrb[139].mxu0 }
 0x229   : > { %v4932_v10 = vadd.f32 %v4931_v36, %v4930_v18  ;;  %v4995_v34 = vpop.f32.mrb[139].mxu1 }
 0x22a   : > { %v7723_v23 = vadd.f32 %v4993_v49, %v4929_v51  ;;  %v4996_v21 = vadd.f32 %v4995_v34, %v4994_v0 }
 0x22c   : > { %3986 = vmatmul.mubr.bf16.gmra.mrb[244].mxu0 %v1503_v57  ;;  %4083 = vmatmul.mubr.bf16.gmra.mrb[244].mxu1 %v8154_v31  ;;  %v7734_v63 = vadd.f32 %v4996_v21, %v4932_v10 }
 0x22d   : > { %3993 = vmatprep.mubr.bf16.mxu0 %v1520_v37  ;;  %4090 = vmatprep.mubr.bf16.mxu1 %v1522_v17  ;;  %v4933_v42 = vpop.f32.mrb[140].mxu0 }
 0x22e   : > { %v4934_v29 = vpop.f32.mrb[141].mxu0 }
 0x22f   : > { %v4997_v11 = vpop.f32.mrb[140].mxu1  ;;  %v4935_v43 = vadd.f32 %v4934_v29, %v4933_v42  ;;  %v4936_v1 = vpop.f32.mrb[142].mxu0 }
 0x230   : > { %v4998_v50 = vpop.f32.mrb[141].mxu1  ;;  %v4937_v6 = vpop.f32.mrb[143].mxu0 }
 0x231   : > { %v4999_v57 = vadd.f32 %v4998_v50, %v4997_v11  ;;  %v5000_v53 = vpop.f32.mrb[142].mxu1  ;;  %v4938_v40 = vadd.f32 %v4937_v6, %v4936_v1 }
 0x232   : > { %v5001_v24 = vpop.f32.mrb[143].mxu1 }
 0x233   : > { %v7739_v46 = vadd.f32 %v4999_v57, %v4935_v43  ;;  %v5002_v30 = vadd.f32 %v5001_v24, %v5000_v53 }
 0x234   : > { %3994 = vmatmul.mubr.bf16.gmra.mrb[248].mxu0 %v8155_v26  ;;  %4091 = vmatmul.mubr.bf16.gmra.mrb[248].mxu1 %v1521_v33 }
 0x235   : > { %4001 = vmatprep.mubr.bf16.mxu0 %v8156_v2  ;;  %v7750_v37 = vadd.f32 %v5002_v30, %v4938_v40  ;;  %4098 = vmatprep.mubr.bf16.mxu1 %v8157_v12 }
 0x236   : > { %v4939_v17 = vpop.f32.mrb[144].mxu0 }
 0x237   : > { %v5003_v62 = vpop.f32.mrb[144].mxu1  ;;  %v4940_v28 = vpop.f32.mrb[145].mxu0 }
 0x238   : > { %v4941_v59 = vadd.f32 %v4940_v28, %v4939_v17  ;;  %v5004_v48 = vpop.f32.mrb[145].mxu1  ;;  %v4942_v61 = vpop.f32.mrb[146].mxu0 }
 0x239   : > { %v5005_v56 = vadd.f32 %v5004_v48, %v5003_v62  ;;  %v5006_v55 = vpop.f32.mrb[146].mxu1  ;;  %v4943_v14 = vpop.f32.mrb[147].mxu0 }
 0x23a   : > { %v4944_v5 = vadd.f32 %v4943_v14, %v4942_v61  ;;  %v5007_v33 = vpop.f32.mrb[147].mxu1 }
 0x23b   : > { %v7755_v3 = vadd.f32 %v5005_v56, %v4941_v59  ;;  %v5008_v27 = vadd.f32 %v5007_v33, %v5006_v55 }
 0x23c   : > { %4002 = vmatmul.mubr.bf16.gmra.mrb[252].mxu0 %v8158_v8  ;;  %4099 = vmatmul.mubr.bf16.gmra.mrb[252].mxu1 %v8159_v45 }
 0x23d   : > { %v7763_v60 = vadd.f32 %v5008_v27, %v4944_v5 }
 0x23e   : > { %v4945_v20 = vpop.f32.mrb[148].mxu0 }
 0x23f   : > { %v5009_v41 = vpop.f32.mrb[148].mxu1  ;;  %v4946_v22 = vpop.f32.mrb[149].mxu0 }
 0x240   : > { %v4947_v35 = vadd.f32 %v4946_v22, %v4945_v20  ;;  %v5010_v38 = vpop.f32.mrb[149].mxu1  ;;  %v4948_v19 = vpop.f32.mrb[150].mxu0 }
 0x241   : > { %v5011_v13 = vadd.f32 %v5010_v38, %v5009_v41  ;;  %v5012_v7 = vpop.f32.mrb[150].mxu1  ;;  %v4949_v58 = vpop.f32.mrb[151].mxu0 }
 0x242   : > { %v4950_v15 = vadd.f32 %v4949_v58, %v4948_v19  ;;  %v5013_v9 = vpop.f32.mrb[151].mxu1 }
 0x243   : > { %v7765_v51 = vadd.f32 %v5011_v13, %v4947_v35  ;;  %v5014_v32 = vadd.f32 %v5013_v9, %v5012_v7 }
 0x245   : > { %v7767_v54 = vadd.f32 %v5014_v32, %v4950_v15 }
 0x247   : > { %v4951_v47 = vpop.f32.mrb[152].mxu0  ;;  %v5015_v39 = vpop.f32.mrb[152].mxu1 }
 0x248   : > { %v4952_v4 = vpop.f32.mrb[153].mxu0  ;;  %v5016_v49 = vpop.f32.mrb[153].mxu1 }
 0x249   : > { %v4953_v18 = vadd.f32 %v4952_v4, %v4951_v47  ;;  %v4954_v0 = vpop.f32.mrb[154].mxu0  ;;  %v5017_v36 = vadd.f32 %v5016_v49, %v5015_v39  ;;  %v5018_v10 = vpop.f32.mrb[154].mxu1 }
 0x24a   : > { %v4955_v34 = vpop.f32.mrb[155].mxu0  ;;  %v5019_v31 = vpop.f32.mrb[155].mxu1 }
 0x24b   : > { %v4956_v21 = vadd.f32 %v4955_v34, %v4954_v0  ;;  %v7769_v42 = vadd.f32 %v5017_v36, %v4953_v18  ;;  %v5020_v11 = vadd.f32 %v5019_v31, %v5018_v10 }
 0x24d   : > { %v7771_v29 = vadd.f32 %v5020_v11, %v4956_v21 }
 0x24f   : > { %v4957_v43 = vpop.f32.mrb[156].mxu0  ;;  %v5021_v50 = vpop.f32.mrb[156].mxu1 }
 0x250   : > { %v4958_v1 = vpop.f32.mrb[157].mxu0  ;;  %v5022_v53 = vpop.f32.mrb[157].mxu1 }
 0x251   : > { %v4959_v57 = vadd.f32 %v4958_v1, %v4957_v43  ;;  %v4960_v6 = vpop.f32.mrb[158].mxu0  ;;  %v5023_v40 = vadd.f32 %v5022_v53, %v5021_v50  ;;  %v5024_v24 = vpop.f32.mrb[158].mxu1 }
 0x252   : > { %v4961_v30 = vpop.f32.mrb[159].mxu0  ;;  %v5025_v2 = vpop.f32.mrb[159].mxu1 }
 0x253   : > { %v4962_v26 = vadd.f32 %v4961_v30, %v4960_v6  ;;  %v7773_v12 = vadd.f32 %v5023_v40, %v4959_v57  ;;  %v5026_v17 = vadd.f32 %v5025_v2, %v5024_v24 }
 0x255   : > { %v7775_v62 = vadd.f32 %v5026_v17, %v4962_v26 }
 0x257   : > { %v5043_v28 = vpop.f32.mrb[160].mxu0  ;;  %v5107_v59 = vpop.f32.mrb[160].mxu1 }
 0x258   : > { %v5044_v48 = vpop.f32.mrb[161].mxu0  ;;  %v5108_v56 = vpop.f32.mrb[161].mxu1 }
 0x259   : > { %v5045_v61 = vadd.f32 %v5044_v48, %v5043_v28  ;;  %v5046_v55 = vpop.f32.mrb[162].mxu0  ;;  %v5109_v14 = vadd.f32 %v5108_v56, %v5107_v59  ;;  %v5110_v5 = vpop.f32.mrb[162].mxu1 }
 0x25a   : > { %v5047_v33 = vpop.f32.mrb[163].mxu0  ;;  %v5111_v45 = vpop.f32.mrb[163].mxu1 }
 0x25b   : > { %v3560_v27 = vadd.f32 %v5045_v61, %v7691_v44  ;;  %v5048_v8 = vadd.f32 %v5047_v33, %v5046_v55  ;;  %v5112_v20 = vadd.f32 %v5111_v45, %v5110_v5 }
 0x25d   : > { %v7778_v41 = vadd.f32 %v5109_v14, %v3560_v27  ;;  %v3563_v22 = vadd.f32 %v5048_v8, %v7702_v52 }
 0x25f   : > { %v7781_v35 = vadd.f32 %v5112_v20, %v3563_v22  ;;  %v5049_v38 = vpop.f32.mrb[164].mxu0  ;;  %v5113_v19 = vpop.f32.mrb[164].mxu1 }
 0x260   : > { %v5050_v13 = vpop.f32.mrb[165].mxu0  ;;  %v5114_v58 = vpop.f32.mrb[165].mxu1 }
 0x261   : > { %v5051_v7 = vadd.f32 %v5050_v13, %v5049_v38  ;;  %v5052_v15 = vpop.f32.mrb[166].mxu0  ;;  %v5115_v9 = vadd.f32 %v5114_v58, %v5113_v19  ;;  %v5116_v32 = vpop.f32.mrb[166].mxu1 }
 0x262   : > { %v5053_v47 = vpop.f32.mrb[167].mxu0  ;;  %v5117_v4 = vpop.f32.mrb[167].mxu1 }
 0x263   : > { %v3568_v44 = vadd.f32 %v5051_v7, %v7707_v16  ;;  %v5054_v39 = vadd.f32 %v5053_v47, %v5052_v15  ;;  %v5118_v18 = vadd.f32 %v5117_v4, %v5116_v32 }
 0x265   : > { %v7784_v49 = vadd.f32 %v5115_v9, %v3568_v44  ;;  %v3571_v52 = vadd.f32 %v5054_v39, %v7718_v25 }
 0x267   : > { %v7787_v0 = vadd.f32 %v5118_v18, %v3571_v52  ;;  %v5055_v36 = vpop.f32.mrb[168].mxu0  ;;  %v5119_v10 = vpop.f32.mrb[168].mxu1 }
 0x268   : > { %v5056_v34 = vpop.f32.mrb[169].mxu0  ;;  %v5120_v31 = vpop.f32.mrb[169].mxu1 }
 0x269   : > { %v5057_v21 = vadd.f32 %v5056_v34, %v5055_v36  ;;  %v5058_v11 = vpop.f32.mrb[170].mxu0  ;;  %v5121_v43 = vadd.f32 %v5120_v31, %v5119_v10  ;;  %v5122_v50 = vpop.f32.mrb[170].mxu1 }
 0x26a   : > { %v5059_v1 = vpop.f32.mrb[171].mxu0  ;;  %v5123_v53 = vpop.f32.mrb[171].mxu1 }
 0x26b   : > { %v3576_v16 = vadd.f32 %v5057_v21, %v7723_v23  ;;  %v5060_v57 = vadd.f32 %v5059_v1, %v5058_v11  ;;  %v5124_v6 = vadd.f32 %v5123_v53, %v5122_v50 }
 0x26d   : > { %v7790_v40 = vadd.f32 %v5121_v43, %v3576_v16  ;;  %v3579_v25 = vadd.f32 %v5060_v57, %v7734_v63 }
 0x26f   : > { %v7793_v24 = vadd.f32 %v5124_v6, %v3579_v25  ;;  %v5061_v30 = vpop.f32.mrb[172].mxu0  ;;  %v5125_v26 = vpop.f32.mrb[172].mxu1 }
 0x270   : > { %v5062_v2 = vpop.f32.mrb[173].mxu0  ;;  %v5126_v28 = vpop.f32.mrb[173].mxu1 }
 0x271   : > { %v5063_v17 = vadd.f32 %v5062_v2, %v5061_v30  ;;  %v5064_v59 = vpop.f32.mrb[174].mxu0  ;;  %v5127_v48 = vadd.f32 %v5126_v28, %v5125_v26  ;;  %v5128_v61 = vpop.f32.mrb[174].mxu1 }
 0x272   : > { %v5065_v56 = vpop.f32.mrb[175].mxu0  ;;  %v5129_v14 = vpop.f32.mrb[175].mxu1 }
 0x273   : > { %v3584_v23 = vadd.f32 %v5063_v17, %v7739_v46  ;;  %v5066_v55 = vadd.f32 %v5065_v56, %v5064_v59  ;;  %v5130_v5 = vadd.f32 %v5129_v14, %v5128_v61 }
 0x275   : > { %v7796_v33 = vadd.f32 %v5127_v48, %v3584_v23  ;;  %v3587_v63 = vadd.f32 %v5066_v55, %v7750_v37 }
 0x277   : > { %v7799_v27 = vadd.f32 %v5130_v5, %v3587_v63  ;;  %v5067_v8 = vpop.f32.mrb[176].mxu0  ;;  %v5131_v45 = vpop.f32.mrb[176].mxu1 }
 0x278   : > { %v5068_v20 = vpop.f32.mrb[177].mxu0  ;;  %v5132_v38 = vpop.f32.mrb[177].mxu1 }
 0x279   : > { %v5069_v22 = vadd.f32 %v5068_v20, %v5067_v8  ;;  %v5070_v19 = vpop.f32.mrb[178].mxu0  ;;  %v5133_v13 = vadd.f32 %v5132_v38, %v5131_v45  ;;  %v5134_v7 = vpop.f32.mrb[178].mxu1 }
 0x27a   : > { %v5071_v58 = vpop.f32.mrb[179].mxu0  ;;  %v5135_v9 = vpop.f32.mrb[179].mxu1 }
 0x27b   : > { %v3592_v46 = vadd.f32 %v5069_v22, %v7755_v3  ;;  %v5072_v15 = vadd.f32 %v5071_v58, %v5070_v19  ;;  %v5136_v32 = vadd.f32 %v5135_v9, %v5134_v7 }
 0x27d   : > { %v7802_v47 = vadd.f32 %v5133_v13, %v3592_v46  ;;  %v3595_v37 = vadd.f32 %v5072_v15, %v7763_v60 }
 0x27f   : > { %v7805_v44 = vadd.f32 %v5136_v32, %v3595_v37  ;;  %v5073_v39 = vpop.f32.mrb[180].mxu0  ;;  %v5137_v4 = vpop.f32.mrb[180].mxu1 }
 0x280   : > { %v5074_v18 = vpop.f32.mrb[181].mxu0  ;;  %v5138_v36 = vpop.f32.mrb[181].mxu1 }
 0x281   : > { %v5075_v52 = vadd.f32 %v5074_v18, %v5073_v39  ;;  %v5076_v10 = vpop.f32.mrb[182].mxu0  ;;  %v5139_v34 = vadd.f32 %v5138_v36, %v5137_v4  ;;  %v5140_v21 = vpop.f32.mrb[182].mxu1 }
 0x282   : > { %v5077_v31 = vpop.f32.mrb[183].mxu0  ;;  %v5141_v43 = vpop.f32.mrb[183].mxu1 }
 0x283   : > { %v3600_v3 = vadd.f32 %v5075_v52, %v7765_v51  ;;  %v5078_v11 = vadd.f32 %v5077_v31, %v5076_v10  ;;  %v5142_v50 = vadd.f32 %v5141_v43, %v5140_v21 }
 0x285   : > { %v7808_v1 = vadd.f32 %v5139_v34, %v3600_v3  ;;  %v3603_v60 = vadd.f32 %v5078_v11, %v7767_v54 }
 0x287   : > { %v7811_v16 = vadd.f32 %v5142_v50, %v3603_v60  ;;  %v5079_v57 = vpop.f32.mrb[184].mxu0  ;;  %v5143_v53 = vpop.f32.mrb[184].mxu1 }
 0x288   : > { %v5080_v6 = vpop.f32.mrb[185].mxu0  ;;  %v5144_v30 = vpop.f32.mrb[185].mxu1 }
 0x289   : > { %v5081_v25 = vadd.f32 %v5080_v6, %v5079_v57  ;;  %v5082_v26 = vpop.f32.mrb[186].mxu0  ;;  %v5145_v2 = vadd.f32 %v5144_v30, %v5143_v53  ;;  %v5146_v17 = vpop.f32.mrb[186].mxu1 }
 0x28a   : > { %v5083_v28 = vpop.f32.mrb[187].mxu0  ;;  %v5147_v48 = vpop.f32.mrb[187].mxu1 }
 0x28b   : > { %v3608_v51 = vadd.f32 %v5081_v25, %v7769_v42  ;;  %v5084_v59 = vadd.f32 %v5083_v28, %v5082_v26  ;;  %v5148_v61 = vadd.f32 %v5147_v48, %v5146_v17 }
 0x28d   : > { %v7814_v56 = vadd.f32 %v5145_v2, %v3608_v51  ;;  %v3611_v54 = vadd.f32 %v5084_v59, %v7771_v29 }
 0x28f   : > { %v7817_v23 = vadd.f32 %v5148_v61, %v3611_v54  ;;  %v5085_v55 = vpop.f32.mrb[188].mxu0  ;;  %v5149_v14 = vpop.f32.mrb[188].mxu1 }
 0x290   : > { %v5086_v5 = vpop.f32.mrb[189].mxu0  ;;  %v5150_v8 = vpop.f32.mrb[189].mxu1 }
 0x291   : > { %v5087_v63 = vadd.f32 %v5086_v5, %v5085_v55  ;;  %v5088_v45 = vpop.f32.mrb[190].mxu0  ;;  %v5151_v20 = vadd.f32 %v5150_v8, %v5149_v14  ;;  %v5152_v22 = vpop.f32.mrb[190].mxu1 }
 0x292   : > { %v5089_v38 = vpop.f32.mrb[191].mxu0  ;;  %v5153_v13 = vpop.f32.mrb[191].mxu1 }
 0x293   : > { %v3616_v42 = vadd.f32 %v5087_v63, %v7773_v12  ;;  %v5090_v19 = vadd.f32 %v5089_v38, %v5088_v45  ;;  %v5154_v7 = vadd.f32 %v5153_v13, %v5152_v22 }
 0x295   : > { %v7820_v58 = vadd.f32 %v5151_v20, %v3616_v42  ;;  %v3619_v29 = vadd.f32 %v5090_v19, %v7775_v62 }
 0x297   : > { %v7823_v46 = vadd.f32 %v5154_v7, %v3619_v29  ;;  %v5171_v15 = vpop.f32.mrb[192].mxu0  ;;  %v5235_v9 = vpop.f32.mrb[192].mxu1 }
 0x298   : > { %v5172_v32 = vpop.f32.mrb[193].mxu0  ;;  %v5236_v39 = vpop.f32.mrb[193].mxu1 }
 0x299   : > { %v5173_v37 = vadd.f32 %v5172_v32, %v5171_v15  ;;  %v5174_v4 = vpop.f32.mrb[194].mxu0  ;;  %v5237_v18 = vadd.f32 %v5236_v39, %v5235_v9  ;;  %v5238_v52 = vpop.f32.mrb[194].mxu1 }
 0x29a   : > { %v5175_v36 = vpop.f32.mrb[195].mxu0  ;;  %v5239_v34 = vpop.f32.mrb[195].mxu1 }
 0x29b   : > { %v3754_v12 = vadd.f32 %v5173_v37, %v7778_v41  ;;  %v5176_v10 = vadd.f32 %v5175_v36, %v5174_v4  ;;  %v5240_v21 = vadd.f32 %v5239_v34, %v5238_v52 }
 0x29d   : > { %v7826_v31 = vadd.f32 %v5237_v18, %v3754_v12  ;;  %v3757_v62 = vadd.f32 %v5176_v10, %v7781_v35 }
 0x29f   : > { %v7829_v3 = vadd.f32 %v5240_v21, %v3757_v62  ;;  %v5177_v11 = vpop.f32.mrb[196].mxu0  ;;  %v5241_v43 = vpop.f32.mrb[196].mxu1 }
 0x2a0   : > { %v5178_v50 = vpop.f32.mrb[197].mxu0  ;;  %v5242_v57 = vpop.f32.mrb[197].mxu1 }
 0x2a1   : > { %v5179_v60 = vadd.f32 %v5178_v50, %v5177_v11  ;;  %v5180_v53 = vpop.f32.mrb[198].mxu0  ;;  %v5243_v6 = vadd.f32 %v5242_v57, %v5241_v43  ;;  %v5244_v25 = vpop.f32.mrb[198].mxu1 }
 0x2a2   : > { %v5181_v30 = vpop.f32.mrb[199].mxu0  ;;  %v5245_v2 = vpop.f32.mrb[199].mxu1 }
 0x2a3   : > { %v3762_v41 = vadd.f32 %v5179_v60, %v7784_v49  ;;  %v5182_v26 = vadd.f32 %v5181_v30, %v5180_v53  ;;  %v5246_v17 = vadd.f32 %v5245_v2, %v5244_v25 }
 0x2a5   : > { %v7832_v28 = vadd.f32 %v5243_v6, %v3762_v41  ;;  %v3765_v35 = vadd.f32 %v5182_v26, %v7787_v0 }
 0x2a7   : > { %v7835_v51 = vadd.f32 %v5246_v17, %v3765_v35  ;;  %v5183_v59 = vpop.f32.mrb[200].mxu0  ;;  %v5247_v48 = vpop.f32.mrb[200].mxu1 }
 0x2a8   : > { %v5184_v61 = vpop.f32.mrb[201].mxu0  ;;  %v5248_v55 = vpop.f32.mrb[201].mxu1 }
 0x2a9   : > { %v5185_v54 = vadd.f32 %v5184_v61, %v5183_v59  ;;  %v5186_v14 = vpop.f32.mrb[202].mxu0  ;;  %v5249_v5 = vadd.f32 %v5248_v55, %v5247_v48  ;;  %v5250_v63 = vpop.f32.mrb[202].mxu1 }
 0x2aa   : > { %v5187_v8 = vpop.f32.mrb[203].mxu0  ;;  %v5251_v20 = vpop.f32.mrb[203].mxu1 }
 0x2ab   : > { %v3770_v49 = vadd.f32 %v5185_v54, %v7790_v40  ;;  %v5188_v45 = vadd.f32 %v5187_v8, %v5186_v14  ;;  %v5252_v22 = vadd.f32 %v5251_v20, %v5250_v63 }
 0x2ad   : > { %v7838_v38 = vadd.f32 %v5249_v5, %v3770_v49  ;;  %v3773_v0 = vadd.f32 %v5188_v45, %v7793_v24 }
 0x2af   : > { %v7841_v42 = vadd.f32 %v5252_v22, %v3773_v0  ;;  %v5189_v19 = vpop.f32.mrb[204].mxu0  ;;  %v5253_v13 = vpop.f32.mrb[204].mxu1 }
 0x2b0   : > { %v5190_v7 = vpop.f32.mrb[205].mxu0  ;;  %v5254_v15 = vpop.f32.mrb[205].mxu1 }
 0x2b1   : > { %v5191_v29 = vadd.f32 %v5190_v7, %v5189_v19  ;;  %v5192_v9 = vpop.f32.mrb[206].mxu0  ;;  %v5255_v32 = vadd.f32 %v5254_v15, %v5253_v13  ;;  %v5256_v37 = vpop.f32.mrb[206].mxu1 }
 0x2b2   : > { %v5193_v39 = vpop.f32.mrb[207].mxu0  ;;  %v5257_v18 = vpop.f32.mrb[207].mxu1 }
 0x2b3   : > { %v3778_v40 = vadd.f32 %v5191_v29, %v7796_v33  ;;  %v5194_v4 = vadd.f32 %v5193_v39, %v5192_v9  ;;  %v5258_v52 = vadd.f32 %v5257_v18, %v5256_v37 }
 0x2b5   : > { %v7844_v36 = vadd.f32 %v5255_v32, %v3778_v40  ;;  %v3781_v24 = vadd.f32 %v5194_v4, %v7799_v27 }
 0x2b7   : > { %v7847_v12 = vadd.f32 %v5258_v52, %v3781_v24  ;;  %v5195_v10 = vpop.f32.mrb[208].mxu0  ;;  %v5259_v34 = vpop.f32.mrb[208].mxu1 }
 0x2b8   : > { %v5196_v21 = vpop.f32.mrb[209].mxu0  ;;  %v5260_v11 = vpop.f32.mrb[209].mxu1 }
 0x2b9   : > { %v5197_v62 = vadd.f32 %v5196_v21, %v5195_v10  ;;  %v5198_v43 = vpop.f32.mrb[210].mxu0  ;;  %v5261_v50 = vadd.f32 %v5260_v11, %v5259_v34  ;;  %v5262_v60 = vpop.f32.mrb[210].mxu1 }
 0x2ba   : > { %v5199_v57 = vpop.f32.mrb[211].mxu0  ;;  %v5263_v6 = vpop.f32.mrb[211].mxu1 }
 0x2bb   : > { %v3786_v33 = vadd.f32 %v5197_v62, %v7802_v47  ;;  %v5200_v53 = vadd.f32 %v5199_v57, %v5198_v43  ;;  %v5264_v25 = vadd.f32 %v5263_v6, %v5262_v60 }
 0x2bd   : > { %v7850_v30 = vadd.f32 %v5261_v50, %v3786_v33  ;;  %v3789_v27 = vadd.f32 %v5200_v53, %v7805_v44 }
 0x2bf   : > { %v7853_v41 = vadd.f32 %v5264_v25, %v3789_v27  ;;  %v5201_v26 = vpop.f32.mrb[212].mxu0  ;;  %v5265_v2 = vpop.f32.mrb[212].mxu1 }
 0x2c0   : > { %v5202_v17 = vpop.f32.mrb[213].mxu0  ;;  %v5266_v59 = vpop.f32.mrb[213].mxu1 }
 0x2c1   : > { %v5203_v35 = vadd.f32 %v5202_v17, %v5201_v26  ;;  %v5204_v48 = vpop.f32.mrb[214].mxu0  ;;  %v5267_v61 = vadd.f32 %v5266_v59, %v5265_v2  ;;  %v5268_v54 = vpop.f32.mrb[214].mxu1 }
 0x2c2   : > { %v5205_v55 = vpop.f32.mrb[215].mxu0  ;;  %v5269_v5 = vpop.f32.mrb[215].mxu1 }
 0x2c3   : > { %v3794_v47 = vadd.f32 %v5203_v35, %v7808_v1  ;;  %v5206_v14 = vadd.f32 %v5205_v55, %v5204_v48  ;;  %v5270_v63 = vadd.f32 %v5269_v5, %v5268_v54 }
 0x2c5   : > { %v7856_v8 = vadd.f32 %v5267_v61, %v3794_v47  ;;  %v3797_v44 = vadd.f32 %v5206_v14, %v7811_v16 }
 0x2c7   : > { %v7859_v49 = vadd.f32 %v5270_v63, %v3797_v44  ;;  %v5207_v45 = vpop.f32.mrb[216].mxu0  ;;  %v5271_v20 = vpop.f32.mrb[216].mxu1 }
 0x2c8   : > { %v5208_v22 = vpop.f32.mrb[217].mxu0  ;;  %v5272_v19 = vpop.f32.mrb[217].mxu1 }
 0x2c9   : > { %v5209_v0 = vadd.f32 %v5208_v22, %v5207_v45  ;;  %v5210_v13 = vpop.f32.mrb[218].mxu0  ;;  %v5273_v7 = vadd.f32 %v5272_v19, %v5271_v20  ;;  %v5274_v29 = vpop.f32.mrb[218].mxu1 }
 0x2ca   : > { %v5211_v15 = vpop.f32.mrb[219].mxu0  ;;  %v5275_v32 = vpop.f32.mrb[219].mxu1 }
 0x2cb   : > { %v3802_v1 = vadd.f32 %v5209_v0, %v7814_v56  ;;  %v5212_v9 = vadd.f32 %v5211_v15, %v5210_v13  ;;  %v5276_v37 = vadd.f32 %v5275_v32, %v5274_v29 }
 0x2cd   : > { %v7862_v39 = vadd.f32 %v5273_v7, %v3802_v1  ;;  %v3805_v16 = vadd.f32 %v5212_v9, %v7817_v23 }
 0x2cf   : > { %v7865_v40 = vadd.f32 %v5276_v37, %v3805_v16  ;;  %v5213_v4 = vpop.f32.mrb[220].mxu0  ;;  %v5277_v18 = vpop.f32.mrb[220].mxu1 }
 0x2d0   : > { %v5214_v52 = vpop.f32.mrb[221].mxu0  ;;  %v5278_v10 = vpop.f32.mrb[221].mxu1 }
 0x2d1   : > { %v5215_v24 = vadd.f32 %v5214_v52, %v5213_v4  ;;  %v5216_v34 = vpop.f32.mrb[222].mxu0  ;;  %v5279_v21 = vadd.f32 %v5278_v10, %v5277_v18  ;;  %v5280_v62 = vpop.f32.mrb[222].mxu1 }
 0x2d2   : > { %v5217_v11 = vpop.f32.mrb[223].mxu0  ;;  %v5281_v50 = vpop.f32.mrb[223].mxu1 }
 0x2d3   : > { %v3810_v56 = vadd.f32 %v5215_v24, %v7820_v58  ;;  %v5218_v43 = vadd.f32 %v5217_v11, %v5216_v34  ;;  %v5282_v60 = vadd.f32 %v5281_v50, %v5280_v62 }
 0x2d5   : > { %v7868_v57 = vadd.f32 %v5279_v21, %v3810_v56  ;;  %v3813_v23 = vadd.f32 %v5218_v43, %v7823_v46 }
 0x2d7   : > { %v7871_v33 = vadd.f32 %v5282_v60, %v3813_v23  ;;  %v5299_v53 = vpop.f32.mrb[224].mxu0  ;;  %v5363_v6 = vpop.f32.mrb[224].mxu1 }
 0x2d8   : > { %v5300_v25 = vpop.f32.mrb[225].mxu0  ;;  %v5364_v26 = vpop.f32.mrb[225].mxu1 }
 0x2d9   : > { %v5301_v27 = vadd.f32 %v5300_v25, %v5299_v53  ;;  %v5302_v2 = vpop.f32.mrb[226].mxu0  ;;  %v5365_v17 = vadd.f32 %v5364_v26, %v5363_v6  ;;  %v5366_v35 = vpop.f32.mrb[226].mxu1 }
 0x2da   : > { %v5303_v59 = vpop.f32.mrb[227].mxu0  ;;  %v5367_v61 = vpop.f32.mrb[227].mxu1 }
 0x2db   : > { %v3948_v58 = vadd.f32 %v5301_v27, %v7826_v31  ;;  %v5304_v48 = vadd.f32 %v5303_v59, %v5302_v2  ;;  %v5368_v54 = vadd.f32 %v5367_v61, %v5366_v35 }
 0x2dd   : > { %v3951_v55 = vadd.f32 %v5304_v48, %v7829_v3  ;;  %v7875_v47 = vadd.f32 %v5365_v17, %v3948_v58 }
 0x2df   : > { %v7877_v46 = vadd.f32 %v5368_v54, %v3951_v55  ;;  %v5305_v14 = vpop.f32.mrb[228].mxu0  ;;  %4123 = vrot.lane.b32.xlu0 %v7875_v47, %s5735_s9  ;;  %v5369_v5 = vpop.f32.mrb[228].mxu1 }
 0x2e0   : > { %v5306_v63 = vpop.f32.mrb[229].mxu0  ;;  %v5370_v45 = vpop.f32.mrb[229].mxu1 }
 0x2e1   : > { %v5307_v44 = vadd.f32 %v5306_v63, %v5305_v14  ;;  %v5308_v20 = vpop.f32.mrb[230].mxu0  ;;  %v5371_v31 = vadd.f32 %v5370_v45, %v5369_v5  ;;  %v5372_v22 = vpop.f32.mrb[230].mxu1 }
 0x2e2   : > { %v5309_v0 = vpop.f32.mrb[231].mxu0  ;;  %v5373_v13 = vpop.f32.mrb[231].mxu1 }
 0x2e3   : > { %v3956_v19 = vadd.f32 %v5307_v44, %v7832_v28  ;;  %v5310_v3 = vadd.f32 %v5309_v0, %v5308_v20  ;;  %4125 = vrot.lane.b32.xlu0 %v7877_v46, %s5735_s9  ;;  %v5374_v7 = vadd.f32 %v5373_v13, %v5372_v22 }
 0x2e5   : > { %v3959_v29 = vadd.f32 %v5310_v3, %v7835_v51  ;;  %v7885_v15 = vadd.f32 %v5371_v31, %v3956_v19 }
 0x2e7   : > { %v7887_v1 = vadd.f32 %v5374_v7, %v3959_v29  ;;  %v5311_v9 = vpop.f32.mrb[232].mxu0  ;;  %4127 = vrot.lane.b32.xlu1 %v7885_v15, %s5735_s9  ;;  %v5375_v32 = vpop.f32.mrb[232].mxu1 }
 0x2e8   : > { %v5312_v37 = vpop.f32.mrb[233].mxu0  ;;  %v5376_v28 = vpop.f32.mrb[233].mxu1 }
 0x2e9   : > { %v5313_v16 = vadd.f32 %v5312_v37, %v5311_v9  ;;  %v5314_v4 = vpop.f32.mrb[234].mxu0  ;;  %v5377_v18 = vadd.f32 %v5376_v28, %v5375_v32  ;;  %v5378_v52 = vpop.f32.mrb[234].mxu1 }
 0x2ea   : > { %v5315_v24 = vpop.f32.mrb[235].mxu0  ;;  %v5379_v51 = vpop.f32.mrb[235].mxu1 }
 0x2eb   : > { %v3964_v10 = vadd.f32 %v5313_v16, %v7838_v38  ;;  %v5316_v34 = vadd.f32 %v5315_v24, %v5314_v4  ;;  %4129 = vrot.lane.b32.xlu1 %v7887_v1, %s5735_s9  ;;  %v5380_v21 = vadd.f32 %v5379_v51, %v5378_v52 }
 0x2ed   : > { %v7894_v62 = vadd.f32 %v5377_v18, %v3964_v10  ;;  %v3967_v11 = vadd.f32 %v5316_v34, %v7841_v42 }
 0x2ef   : > { %v7897_v56 = vadd.f32 %v5380_v21, %v3967_v11  ;;  %v5317_v43 = vpop.f32.mrb[236].mxu0  ;;  %4131 = vrot.lane.b32.xlu0 %v7894_v62, %s5735_s9  ;;  %v5381_v50 = vpop.f32.mrb[236].mxu1 }
 0x2f0   : > { %v5318_v60 = vpop.f32.mrb[237].mxu0  ;;  %v5382_v38 = vpop.f32.mrb[237].mxu1 }
 0x2f1   : > { %v5319_v23 = vadd.f32 %v5318_v60, %v5317_v43  ;;  %v5320_v53 = vpop.f32.mrb[238].mxu0  ;;  %4133 = vrot.lane.b32.xlu1 %v7897_v56, %s5735_s9  ;;  %v5383_v6 = vadd.f32 %v5382_v38, %v5381_v50  ;;  %v5384_v25 = vpop.f32.mrb[238].mxu1 }
 0x2f2   : > { %v5321_v27 = vpop.f32.mrb[239].mxu0  ;;  %v5385_v2 = vpop.f32.mrb[239].mxu1 }
 0x2f3   : > { %v3972_v26 = vadd.f32 %v5319_v23, %v7844_v36  ;;  %v5322_v42 = vadd.f32 %v5321_v27, %v5320_v53  ;;  %v5386_v17 = vadd.f32 %v5385_v2, %v5384_v25 }
 0x2f5   : > { %v7904_v35 = vadd.f32 %v5383_v6, %v3972_v26  ;;  %v3975_v59 = vadd.f32 %v5322_v42, %v7847_v12 }
 0x2f7   : > { %v7907_v58 = vadd.f32 %v5386_v17, %v3975_v59  ;;  %v5323_v48 = vpop.f32.mrb[240].mxu0  ;;  %4135 = vrot.lane.b32.xlu0 %v7904_v35, %s5735_s9  ;;  %v5387_v61 = vpop.f32.mrb[240].mxu1 }
 0x2f8   : > { %v5324_v54 = vpop.f32.mrb[241].mxu0  ;;  %v5388_v14 = vpop.f32.mrb[241].mxu1 }
 0x2f9   : > { %v5325_v55 = vadd.f32 %v5324_v54, %v5323_v48  ;;  %v5326_v5 = vpop.f32.mrb[242].mxu0  ;;  %4137 = vrot.lane.b32.xlu1 %v7907_v58, %s5735_s9  ;;  %v5389_v36 = vadd.f32 %v5388_v14, %v5387_v61  ;;  %v5390_v63 = vpop.f32.mrb[242].mxu1 }
 0x2fa   : > { %v5327_v44 = vpop.f32.mrb[243].mxu0  ;;  %v5391_v20 = vpop.f32.mrb[243].mxu1 }
 0x2fb   : > { %v3980_v45 = vadd.f32 %v5325_v55, %v7850_v30  ;;  %v5328_v12 = vadd.f32 %v5327_v44, %v5326_v5  ;;  %v5392_v31 = vadd.f32 %v5391_v20, %v5390_v63 }
 0x2fd   : > { %v7914_v22 = vadd.f32 %v5389_v36, %v3980_v45  ;;  %v3983_v0 = vadd.f32 %v5328_v12, %v7853_v41 }
 0x2ff   : > { %v7917_v19 = vadd.f32 %v5392_v31, %v3983_v0  ;;  %v5329_v3 = vpop.f32.mrb[244].mxu0  ;;  %4139 = vrot.lane.b32.xlu0 %v7914_v22, %s5735_s9  ;;  %v5393_v13 = vpop.f32.mrb[244].mxu1 }
 0x300   : > { %v5330_v7 = vpop.f32.mrb[245].mxu0  ;;  %v5394_v9 = vpop.f32.mrb[245].mxu1 }
 0x301   : > { %v5331_v29 = vadd.f32 %v5330_v7, %v5329_v3  ;;  %v5332_v32 = vpop.f32.mrb[246].mxu0  ;;  %4141 = vrot.lane.b32.xlu1 %v7917_v19, %s5735_s9  ;;  %v5395_v30 = vadd.f32 %v5394_v9, %v5393_v13  ;;  %v5396_v37 = vpop.f32.mrb[246].mxu1 }
 0x302   : > { %v5333_v16 = vpop.f32.mrb[247].mxu0  ;;  %v5397_v4 = vpop.f32.mrb[247].mxu1 }
 0x303   : > { %v3988_v28 = vadd.f32 %v5331_v29, %v7856_v8  ;;  %v5334_v41 = vadd.f32 %v5333_v16, %v5332_v32  ;;  %v5398_v18 = vadd.f32 %v5397_v4, %v5396_v37 }
 0x305   : > { %v7924_v52 = vadd.f32 %v5395_v30, %v3988_v28  ;;  %v3991_v24 = vadd.f32 %v5334_v41, %v7859_v49 }
 0x307   : > { %v7927_v10 = vadd.f32 %v5398_v18, %v3991_v24  ;;  %v5335_v34 = vpop.f32.mrb[248].mxu0  ;;  %4143 = vrot.lane.b32.xlu0 %v7924_v52, %s5735_s9  ;;  %v5399_v51 = vpop.f32.mrb[248].mxu1 }
 0x308   : > { %v5336_v21 = vpop.f32.mrb[249].mxu0  ;;  %v5400_v43 = vpop.f32.mrb[249].mxu1 }
 0x309   : > { %v5337_v11 = vadd.f32 %v5336_v21, %v5335_v34  ;;  %v5338_v50 = vpop.f32.mrb[250].mxu0  ;;  %4145 = vrot.lane.b32.xlu1 %v7927_v10, %s5735_s9  ;;  %v5401_v8 = vadd.f32 %v5400_v43, %v5399_v51  ;;  %v5402_v60 = vpop.f32.mrb[250].mxu1 }
 0x30a   : > { %v5339_v23 = vpop.f32.mrb[251].mxu0  ;;  %v5403_v53 = vpop.f32.mrb[251].mxu1 }
 0x30b   : > { %v3996_v38 = vadd.f32 %v5337_v11, %v7862_v39  ;;  %v5340_v49 = vadd.f32 %v5339_v23, %v5338_v50  ;;  %v5404_v6 = vadd.f32 %v5403_v53, %v5402_v60 }
 0x30d   : > { %v7934_v25 = vadd.f32 %v5401_v8, %v3996_v38  ;;  %v3999_v27 = vadd.f32 %v5340_v49, %v7865_v40 }
 0x30f   : > { %v7937_v26 = vadd.f32 %v5404_v6, %v3999_v27  ;;  %4147 = vrot.lane.b32.xlu0 %v7934_v25, %s5735_s9  ;;  %v5341_v42 = vpop.f32.mrb[252].mxu0  ;;  %v5405_v2 = vpop.f32.mrb[252].mxu1 }
 0x310   : > { %v5342_v17 = vpop.f32.mrb[253].mxu0  ;;  %v5406_v48 = vpop.f32.mrb[253].mxu1 }
 0x311   : > { %v5343_v59 = vadd.f32 %v5342_v17, %v5341_v42  ;;  %4149 = vrot.lane.b32.xlu1 %v7937_v26, %s5735_s9  ;;  %v5344_v39 = vpop.f32.mrb[254].mxu0  ;;  %v5407_v61 = vadd.f32 %v5406_v48, %v5405_v2  ;;  %v5408_v54 = vpop.f32.mrb[254].mxu1 }
 0x312   : > { %v5345_v55 = vpop.f32.mrb[255].mxu0  ;;  %v5409_v5 = vpop.f32.mrb[255].mxu1 }
 0x313   : > { %v4004_v40 = vadd.f32 %v5343_v59, %v7868_v57  ;;  %v5346_v14 = vadd.f32 %v5345_v55, %v5344_v39  ;;  %v5410_v36 = vadd.f32 %v5409_v5, %v5408_v54 }
 0x315   : > { %v7944_v63 = vadd.f32 %v5407_v61, %v4004_v40  ;;  %v4007_v44 = vadd.f32 %v5346_v14, %v7871_v33 }
 0x317   : > { %v7947_v45 = vadd.f32 %v5410_v36, %v4007_v44  ;;  %4151 = vrot.lane.b32.xlu0 %v7944_v63, %s5735_s9 }
 0x319   : > { %4153 = vrot.lane.b32.xlu1 %v7947_v45, %s5735_s9 }
 0x335   : > { %4188 = vxpose.xlu0.b32.start [1/16] (narrow) %v7875_v47, 16 }
 0x339   : > { %4189 = vxpose.xlu0.b32.cont [2/16] (narrow) %v7877_v46, 16 }
 0x33d   : > { %4190 = vxpose.xlu0.b32.cont [3/16] (narrow) %v7885_v15, 16 }
 0x33e   : > { %5644 = shalt.err (!%p5641_p7)
}
 0x33f   : > { %s5645_s7 = scalar_lea.hbm %s7960_s13, 16384  ;;  %s5649_s15 = scalar_lea.hbm %s8094_s3, 32768 }
 0x340   : > { %p5646_p8 = scmp.ne.s32.totalorder %s7960_s13, %s5645_s7  ;;  %p5650_p1 = scmp.lt.u32.totalorder %s7960_s13, %s8094_s3 }
 0x341   : > { %p5651_p0 = scmp.lt.u32.totalorder %s5649_s15, %s5645_s7  ;;  %p5653_p6 = scmp.lt.u32.totalorder %s5645_s7, %s7960_s13 }
 0x342   : > { %p5647_p11 = pnand %p5646_p8, %p8160_p9 }
 0x343   : > { %p5652_p5 = por %p5651_p0, %p5650_p1 }
 0x344   : > { %p5648_p13 = pneg %p5647_p11 }
 0x345   : > { %p5654_p10 = por %p5653_p6, %p5652_p5 }
 0x347   : > { %p5655_p12 = pnand %p5654_p10, %p5648_p13 }
 0x349   : > { %5658 = shalt.err (!%p5655_p12)
}
 0x34a   : > { %s5737_s16 = smov 1024   ;;  %s5738_s17 = smov 64   ;;  %4191 = vxpose.xlu0.b32.cont [4/16] (narrow) %v7887_v1, 16  ;;  %vm4171_vm1 = vcmask 130048  }
 0x34b   : > { %5415 = dma.vmem_to_hbm [thread:$0]  (%p8160_p9), %s7962_s10, 16384, %s7960_s13, %s4223_s14, %s5737_s16, %s5737_s16, %s5738_s17  }
 0x34c   : > { %s7998_s7 = scalar_lea.vmem %s8096_s5, %s4406_s30  ;;  %s4404_s6 = sshll.u32 %s6170_s26, 4 }
 0x34d   : > { %s244_s30 = scalar_lea.vmem [#allocation6], %s4404_s6  ;;  %s4766_s13 = sshll.u32 %s5794_s22, 7 }
 0x34e   : > { %4192 = vxpose.xlu0.b32.cont [5/16] (narrow) %v7894_v62, 16  ;;  %s4262_s10 = sshll.u32 %s244_s30, 4  ;;  %s8048_s9 = scalar_lea.hbm %s8095_s4, %s4766_s13  ;;  %s8043_s10 = int_to_ptr.vmem [resolvable:$true] %s4262_s10 }
 0x34f   : > { %s4228_s15 = scalar_lea.sflag [#allocation7], %s6170_s26  ;;  %s5659_s11 = scalar_lea.vmem %s8043_s10, 256 }
 0x350   : > { %p5660_p2 = scmp.ne.s32.totalorder %s8043_s10, %s5659_s11  ;;  %s5739_s22 = smov [#allocation6]  }
 0x351   : > { %v4124_v57 = vpop.permute.xlu0 %4123  ;;  %s5663_s12 = sshll.u32 %s5739_s22, 4  ;;  %s5664_s12 = int_to_ptr.vmem [resolvable:$false] %s5663_s12 }
 0x352   : > { %4193 = vxpose.xlu0.b32.cont [6/16] (narrow) %v7897_v56, 16  ;;  %4172 = vst.msk [vmem:[%s7998_s7] sm:$0xff] %vm4171_vm1, %v4124_v57  ;;  %p5661_p3 = pnand %p5660_p2, %p8160_p9  ;;  %s5665_s16 = scalar_lea.vmem %s5664_s12, 512 }
 0x353   : > { %p5666_p7 = scmp.lt.s32.totalorder %s8043_s10, %s5664_s12  ;;  %p5667_p8 = scmp.lt.s32.totalorder %s5665_s16, %s5659_s11 }
 0x354   : > { %p5662_p4 = pneg %p5661_p3 }
 0x355   : > { %v4126_v33 = vpop.permute.xlu0 %4125  ;;  %p5668_p11 = por %p5667_p8, %p5666_p7 }
 0x356   : > { %4194 = vxpose.xlu0.b32.cont [7/16] (narrow) %v7904_v35, 16  ;;  %4173 = vst.msk [vmem:[%s7998_s7 + $0x8] sm:$0xff] %vm4171_vm1, %v4126_v33 }
 0x357   : > { %p5669_p13 = pnand %p5668_p11, %p5662_p4 }
 0x359   : > { %v4128_v47 = vpop.permute.xlu1 %4127 }
 0x35a   : > { %4195 = vxpose.xlu0.b32.cont [8/16] (narrow) %v7907_v58, 16  ;;  %4174 = vst.msk [vmem:[%s7998_s7 + $0x10] sm:$0xff] %vm4171_vm1, %v4128_v47 }
 0x35d   : > { %v4130_v46 = vpop.permute.xlu1 %4129 }
 0x35e   : > { %4196 = vxpose.xlu0.b32.cont [9/16] (narrow) %v7914_v22, 16  ;;  %4175 = vst.msk [vmem:[%s7998_s7 + $0x18] sm:$0xff] %vm4171_vm1, %v4130_v46 }
 0x361   : > { %v4132_v15 = vpop.permute.xlu0 %4131 }
 0x362   : > { %4197 = vxpose.xlu0.b32.cont [10/16] (narrow) %v7917_v19, 16  ;;  %4176 = vst.msk [vmem:[%s7998_s7 + $0x20] sm:$0xff] %vm4171_vm1, %v4132_v15 }
 0x363   : > { %v4134_v1 = vpop.permute.xlu1 %4133 }
 0x364   : > { %4177 = vst.msk [vmem:[%s7998_s7 + $0x28] sm:$0xff] %vm4171_vm1, %v4134_v1 }
 0x366   : > { %4198 = vxpose.xlu0.b32.cont [11/16] (narrow) %v7924_v52, 16 }
 0x369   : > { %v4136_v62 = vpop.permute.xlu0 %4135 }
 0x36a   : > { %4199 = vxpose.xlu0.b32.cont [12/16] (narrow) %v7927_v10, 16  ;;  %4178 = vst.msk [vmem:[%s7998_s7 + $0x30] sm:$0xff] %vm4171_vm1, %v4136_v62 }
 0x36b   : > { %v4138_v56 = vpop.permute.xlu1 %4137 }
 0x36c   : > { %4179 = vst.msk [vmem:[%s7998_s7 + $0x38] sm:$0xff] %vm4171_vm1, %v4138_v56 }
 0x36e   : > { %4200 = vxpose.xlu0.b32.cont [13/16] (narrow) %v7934_v25, 16 }
 0x371   : > { %v4140_v35 = vpop.permute.xlu0 %4139 }
 0x372   : > { %4201 = vxpose.xlu0.b32.cont [14/16] (narrow) %v7937_v26, 16  ;;  %4180 = vst.msk [vmem:[%s7998_s7 + $0x40] sm:$0xff] %vm4171_vm1, %v4140_v35 }
 0x373   : > { %v4142_v58 = vpop.permute.xlu1 %4141 }
 0x374   : > { %4181 = vst.msk [vmem:[%s7998_s7 + $0x48] sm:$0xff] %vm4171_vm1, %v4142_v58 }
 0x376   : > { %4202 = vxpose.xlu0.b32.cont [15/16] (narrow) %v7944_v63, 16 }
 0x379   : > { %v4144_v12 = vpop.permute.xlu0 %4143 }
 0x37a   : > { %4203 = vxpose.xlu0.b32.end [16/16] (narrow) %v7947_v45, 16  ;;  %4182 = vst.msk [vmem:[%s7998_s7 + $0x50] sm:$0xff] %vm4171_vm1, %v4144_v12 }
 0x37b   : > { %v4146_v20 = vpop.permute.xlu1 %4145 }
 0x37c   : > { %4183 = vst.msk [vmem:[%s7998_s7 + $0x58] sm:$0xff] %vm4171_vm1, %v4146_v20 }
 0x381   : > { %v4148_v31 = vpop.permute.xlu0 %4147 }
 0x382   : > { %4184 = vst.msk [vmem:[%s7998_s7 + $0x60] sm:$0xff] %vm4171_vm1, %v4148_v31 }
 0x383   : > { %v4150_v22 = vpop.permute.xlu1 %4149 }
 0x384   : > { %4185 = vst.msk [vmem:[%s7998_s7 + $0x68] sm:$0xff] %vm4171_vm1, %v4150_v22 }
 0x389   : > { %v4152_v0 = vpop.permute.xlu0 %4151 }
 0x38a   : > { %4186 = vst.msk [vmem:[%s7998_s7 + $0x70] sm:$0xff] %vm4171_vm1, %v4152_v0 }
 0x38b   : > { %v4154_v19 = vpop.permute.xlu1 %4153 }
 0x38c   : > { %4187 = vst.msk [vmem:[%s7998_s7 + $0x78] sm:$0xff] %vm4171_vm1, %v4154_v19 }
 0x3be   : > { %v4204_v3 = vpop.trf.xlu0 }
 0x3bf   : > { %4220 = vst [vmem:[%s244_s30] sm:$0xff] %v4204_v3 }
 0x3c2   : > { %v4205_v13 = vpop.trf.xlu0 }
 0x3c3   : > { %4221 = vst [vmem:[%s244_s30 + $0x8] sm:$0xff] %v4205_v13 }
 0x3c4   : > { %5672 = shalt.err (!%p5669_p13)
}
 0x3c5   : > { %s5673_s17 = scalar_lea.hbm %s8048_s9, 256  ;;  %s5677_s7 = scalar_lea.hbm %s8095_s4, 512 }
 0x3c6   : > { %p5674_p1 = scmp.ne.s32.totalorder %s8048_s9, %s5673_s17  ;;  %p5678_p6 = scmp.lt.u32.totalorder %s8048_s9, %s8095_s4 }
 0x3c7   : > { %p5679_p10 = scmp.lt.u32.totalorder %s5677_s7, %s5673_s17  ;;  %p5681_p2 = scmp.lt.u32.totalorder %s5673_s17, %s8048_s9 }
 0x3c8   : > { %p5675_p0 = pnand %p5674_p1, %p8160_p9 }
 0x3c9   : > { %p5680_p12 = por %p5679_p10, %p5678_p6 }
 0x3ca   : > { %p5676_p5 = pneg %p5675_p0 }
 0x3cb   : > { %p5682_p3 = por %p5681_p2, %p5680_p12 }
 0x3cd   : > { %p5683_p4 = pnand %p5682_p3, %p5676_p5 }
 0x3cf   : > { %5686 = shalt.err (!%p5683_p4)
}
 0x3d0   : > { %s5740_s13 = smov 128   ;;  %s5741_s14 = smov 256  }
 0x3d1   : > { %s5742_s8 = smov 8  }
 0x3d2   : > { %5416 = dma.vmem_to_hbm [thread:$0]  (%p8160_p9), %s8043_s10, 256, %s8048_s9, %s4228_s15, %s5740_s13, %s5741_s14, %s5742_s8  }
 0x3d3 PF: > { %p5432_p7 = scmp.ge.s32.totalorder %s5729_s21, 2  ;;  %s4281_s11 = sand.u32 1, %s5717_s18  }
 0x3d4   : > { %p8161_p8 = scmp.ne.s32.totalorder %s8101_s29, 0  ;;  %s4282_s22 = scalar_lea.sflag [#allocation4], %s4281_s11 }
 0x3d6   : > { %p5424_p11 = pnand %p5432_p7, %p8161_p8 }
 0x3d8   : > { %5708 = dma.done.wait (!%p5424_p11), %s4282_s22, 16384  }
 0x3d9   : > { %5710 = vsyncadd (!%p5424_p11), %s4282_s22, 4294950912  ;;  %s4291_s12 = scalar_lea.sflag [#allocation7], %s4281_s11 }
 0x3da   : > { %5712 = dma.done.wait (!%p5424_p11), %s4291_s12, 256  }
 0x3db   : > { %5714 = vsyncadd (!%p5424_p11), %s4291_s12, 4294967040  ;;  %p20_p9 = scmp.ge.s32.totalorder %s5798_s24, 4   ;;  %s8162_s18 = smov %s5721_s19 }
 0x3dc   : > { %s8163_s19 = smov %s5725_s20  ;;  %s8164_s20 = smov %s5809_s27 }
 0x3dd   : > { %s8165_s21 = smov %s5798_s24  ;;  %22 = sbr.rel (!%p20_p9) target bundleno = 6 (0x6), region = 101 }
 0x3e4   :  { %4304 = vsyncpa [#allocation3], 1 }
 0x3e5   :  { %4306 = vsyncpa [#allocation3 + $0x1], 1 }
 0x3e6   :  { %4307 = vsyncpa [#allocation4], 1 }
 0x3e7   :  { %4309 = vsyncpa [#allocation4 + $0x1], 1 }
 0x3e8   :  { %4310 = vsyncpa [#allocation7], 1 }
 0x3e9   :  { %4312 = vsyncpa [#allocation7 + $0x1], 1 }

</bundles_post_ra>
